<compile_context>
chip_gen: v6e
topology: v6e:2x2x1
jax: 0.10.0
libtpu: 0.0.40
codegen_flags: <defaults>
</compile_context>

<pallas_src>
import functools

import jax
import jax.numpy as jnp
from jax.experimental import pallas as pl
from jax.experimental.pallas import tpu as pltpu

_EPS = 1e-5
_VMEM_LIMIT = 32 * 1024 * 1024


def _partial_stats(yf):
    """Per-channel (sum, sum-of-squares) of an f32 tile -> (1, 2, C)."""
    s = jnp.sum(yf, axis=0, keepdims=True)
    ss = jnp.sum(yf * yf, axis=0, keepdims=True)
    return jnp.concatenate([s, ss], axis=0)[None]


# ---- pass 1: conv1 (1x1) + BN1 partial statistics --------------------------
def _conv1x1_stats_kernel(x_ref, w_ref, o_ref, ps_ref):
    y = jnp.dot(x_ref[...], w_ref[...], preferred_element_type=jnp.float32)
    yq = y.astype(o_ref.dtype)
    o_ref[...] = yq
    ps_ref[...] = _partial_stats(yq.astype(jnp.float32))


# ---- pass 2: bn1 + relu + conv2 (3x3, pad 1) + BN2 partial statistics ------
def _bn_relu_conv3x3_kernel(w_img, pad, y_ref, sc_ref, sh_ref, mask_ref,
                            w2g_ref, o_ref, ps_ref, zpad_ref):
    hw, wd = y_ref.shape
    cdt = w2g_ref.dtype

    # BN1 + ReLU in f32 (elementwise work stays f32 on every generation).
    z = jnp.maximum(y_ref[...].astype(jnp.float32) * sc_ref[...] + sh_ref[...],
                    0.0)

    # Zero halo rows and drop the image rows at offset `pad`; every 3x3 tap is
    # then a static-offset row slice of the scratch (no XLU roll, no h-masks).
    zero_pad = jnp.zeros((pad, wd), jnp.float32)
    zpad_ref[pl.ds(0, pad), :] = zero_pad
    zpad_ref[pl.ds(pad + hw, pad), :] = zero_pad
    zpad_ref[pl.ds(pad, hw), :] = z

    # conv2 as 3 matmuls with K = 3*wd: taps grouped by dx (dy handled by the
    # zero padding); only the dx = +/-1 image-edge wrap needs a mask.
    msk = mask_ref[...]                      # (hw, 2) f32 edge validity
    acc = jnp.zeros((hw, wd), jnp.float32)
    for g, dx in enumerate((-1, 0, 1)):
        slab = jnp.concatenate(
            [zpad_ref[pl.ds(pad - w_img + dx, hw), :],
             zpad_ref[pl.ds(pad + dx, hw), :],
             zpad_ref[pl.ds(pad + w_img + dx, hw), :]], axis=-1)  # (hw, 3*wd)
        part = jnp.dot(slab.astype(cdt), w2g_ref[g],
                       preferred_element_type=jnp.float32)
        if dx == -1:
            part = part * msk[:, 0:1]
        elif dx == 1:
            part = part * msk[:, 1:2]
        acc = acc + part

    yq = acc.astype(o_ref.dtype)
    o_ref[...] = yq
    ps_ref[...] = _partial_stats(yq.astype(jnp.float32))


# ---- pass 3: bn2 + relu + conv3 (1x1) + BN3 partial statistics -------------
def _bn_relu_conv1x1_stats_kernel(y_ref, sc_ref, sh_ref, w_ref, o_ref, ps_ref):
    z = jnp.maximum(y_ref[...].astype(jnp.float32) * sc_ref[...] + sh_ref[...],
                    0.0)
    y = jnp.dot(z.astype(w_ref.dtype), w_ref[...],
                preferred_element_type=jnp.float32)
    yq = y.astype(o_ref.dtype)
    o_ref[...] = yq
    ps_ref[...] = _partial_stats(yq.astype(jnp.float32))


# ---- pass 4: bn3 + identity add + relu (all f32) ---------------------------
def _bn_add_relu_kernel(x_ref, y_ref, sc_ref, sh_ref, o_ref):
    y = y_ref[...].astype(jnp.float32) * sc_ref[...] + sh_ref[...]
    o_ref[...] = jnp.maximum(y + x_ref[...], 0.0)


def _bn_scale_shift(ps, count, gamma, beta):
    """Fold per-tile (sum, sumsq) partials into BN scale/shift (training mode)."""
    s = jnp.sum(ps[:, 0, :], axis=0)
    ss = jnp.sum(ps[:, 1, :], axis=0)
    mean = s / count
    var = ss / count - mean * mean          # one-pass biased variance
    scale = gamma.reshape(-1) * jax.lax.rsqrt(var + _EPS)
    shift = beta.reshape(-1) - mean * scale
    return scale.reshape(1, -1), shift.reshape(1, -1)


@functools.partial(jax.jit, static_argnames=("compute_dtype", "tile_m"))
def bottleneck_forward(x_nchw, params, *, compute_dtype=jnp.bfloat16,
                       tile_m=128):
    """Bottleneck forward (stride=1, downsample=None), training-mode BatchNorm."""
    n, cin, h, w = x_nchw.shape
    hw = h * w
    m = n * hw
    wd = params["w1"].shape[1]
    cout = params["w3"].shape[1]
    cdt = jnp.dtype(compute_dtype)
    f32 = jnp.float32
    isz = cdt.itemsize

    assert cin == cout, "downsample=None requires inplanes == planes * 4"
    # Lane-dense channels (pad to 128 upstream otherwise): avoids masked
    # partial stores on the output lane dim.
    assert cin % 128 == 0 and wd % 128 == 0 and cout % 128 == 0
    assert m % tile_m == 0 and tile_m % 8 == 0 and hw % 8 == 0
    nt = m // tile_m
    # NOTE: tile_m can be raised (512-1024) on v5e/v6e for large problems and
    # should be halved on v7x (64 MiB physical VMEM).

    # TODO(synk): keep the surrounding network NHWC end-to-end to drop the two
    # NCHW<->NHWC transposes below (each is an extra HBM pass outside the kernel).
    x_flat = jnp.transpose(x_nchw, (0, 2, 3, 1)).reshape(m, cin)
    x_c = x_flat.astype(cdt)                   # bf16 MXU operand (identity kept f32)

    w1 = params["w1"].astype(cdt)              # (cin, wd)
    w3 = params["w3"].astype(cdt)              # (wd, cout)
    # Group the 9 conv2 taps by dx so conv2 becomes 3 matmuls with K = 3*wd.
    # Tap order inside each group is dy = -1, 0, +1 (tap t = (dy+1)*3 + (dx+1)).
    w2 = params["w2"]                          # (9, wd, wd)
    w2g = jnp.stack(
        [jnp.concatenate([w2[dxi], w2[3 + dxi], w2[6 + dxi]], axis=0)
         for dxi in range(3)], axis=0).astype(cdt)        # (3, 3*wd, wd)

    # dx = -1 / +1 column-edge validity (same for every image); built here so
    # the kernel has no integer div/mod or iota work.
    col = jnp.arange(hw, dtype=jnp.int32) % w
    edge_mask = jnp.stack([col > 0, col < (w - 1)], axis=1).astype(f32)  # (hw, 2)

    cp = pltpu.CompilerParams(
        dimension_semantics=("parallel",),     # shards the grid over v7x's 2 TCs
        vmem_limit_bytes=_VMEM_LIMIT)

    # ---- pass 1: conv1 (1x1) + BN1 partial stats ---------------------------
    y1, ps1 = pl.pallas_call(
        _conv1x1_stats_kernel,
        grid=(nt,),
        in_specs=[pl.BlockSpec((tile_m, cin), lambda i: (i, 0)),
                  pl.BlockSpec((cin, wd), lambda i: (0, 0))],
        out_specs=(pl.BlockSpec((tile_m, wd), lambda i: (i, 0)),
                   pl.BlockSpec((1, 2, wd), lambda i: (i, 0, 0))),
        out_shape=(jax.ShapeDtypeStruct((m, wd), cdt),
                   jax.ShapeDtypeStruct((nt, 2, wd), f32)),
        compiler_params=cp,
        cost_estimate=pl.CostEstimate(
            flops=2 * m * cin * wd, transcendentals=0,
            bytes_accessed=(m * cin + cin * wd + m * wd) * isz),
    )(x_c, w1)
    scale1, shift1 = _bn_scale_shift(ps1, m, params["g1"], params["b1"])

    # ---- pass 2: bn1 + relu + conv2 (3x3, pad 1) + BN2 partial stats -------
    pad = -(-(w + 1) // 8) * 8                 # halo rows, rounded to sublanes
    y2, ps2 = pl.pallas_call(
        functools.partial(_bn_relu_conv3x3_kernel, w, pad),
        grid=(n,),                             # one image per grid step
        in_specs=[pl.BlockSpec((hw, wd), lambda i: (i, 0)),
                  pl.BlockSpec((1, wd), lambda i: (0, 0)),
                  pl.BlockSpec((1, wd), lambda i: (0, 0)),
                  pl.BlockSpec((hw, 2), lambda i: (0, 0)),
                  pl.BlockSpec((3, 3 * wd, wd), lambda i: (0, 0, 0))],
        out_specs=(pl.BlockSpec((hw, wd), lambda i: (i, 0)),
                   pl.BlockSpec((1, 2, wd), lambda i: (i, 0, 0))),
        out_shape=(jax.ShapeDtypeStruct((m, wd), cdt),
                   jax.ShapeDtypeStruct((n, 2, wd), f32)),
        scratch_shapes=[pltpu.VMEM((hw + 2 * pad, wd), f32)],
        compiler_params=cp,
        cost_estimate=pl.CostEstimate(
            flops=2 * m * 9 * wd * wd, transcendentals=0,
            bytes_accessed=(2 * m * wd + 9 * wd * wd) * isz),
    )(y1, scale1, shift1, edge_mask, w2g)
    scale2, shift2 = _bn_scale_shift(ps2, m, params["g2"], params["b2"])

    # ---- pass 3: bn2 + relu + conv3 (1x1) + BN3 partial stats --------------
    y3, ps3 = pl.pallas_call(
        _bn_relu_conv1x1_stats_kernel,
        grid=(nt,),
        in_specs=[pl.BlockSpec((tile_m, wd), lambda i: (i, 0)),
                  pl.BlockSpec((1, wd), lambda i: (0, 0)),
                  pl.BlockSpec((1, wd), lambda i: (0, 0)),
                  pl.BlockSpec((wd, cout), lambda i: (0, 0))],
        out_specs=(pl.BlockSpec((tile_m, cout), lambda i: (i, 0)),
                   pl.BlockSpec((1, 2, cout), lambda i: (i, 0, 0))),
        out_shape=(jax.ShapeDtypeStruct((m, cout), cdt),
                   jax.ShapeDtypeStruct((nt, 2, cout), f32)),
        compiler_params=cp,
        cost_estimate=pl.CostEstimate(
            flops=2 * m * wd * cout, transcendentals=0,
            bytes_accessed=(m * wd + wd * cout + m * cout) * isz),
    )(y2, scale2, shift2, w3)
    scale3, shift3 = _bn_scale_shift(ps3, m, params["g3"], params["b3"])

    # ---- pass 4: bn3 + identity add + relu (f32, aliased into x's buffer) --
    out_flat = pl.pallas_call(
        _bn_add_relu_kernel,
        grid=(nt,),
        in_specs=[pl.BlockSpec((tile_m, cout), lambda i: (i, 0)),
                  pl.BlockSpec((tile_m, cout), lambda i: (i, 0)),
                  pl.BlockSpec((1, cout), lambda i: (0, 0)),
                  pl.BlockSpec((1, cout), lambda i: (0, 0))],
        out_specs=pl.BlockSpec((tile_m, cout), lambda i: (i, 0)),
        out_shape=jax.ShapeDtypeStruct((m, cout), f32),
        input_output_aliases={0: 0},
        compiler_params=cp,
        cost_estimate=pl.CostEstimate(
            flops=3 * m * cout, transcendentals=0,
            bytes_accessed=m * cout * (8 + isz)),
    )(x_flat, y3, scale3, shift3)

    return out_flat.reshape(n, h, w, cout).transpose(0, 3, 1, 2)


def init_params(key, inplanes, planes, base_width=64, groups=1):
    """Deterministic synthetic params matching Bottleneck.__init__ shapes."""
    width = int(planes * (base_width / 64.0)) * groups
    out = planes * 4  # expansion = 4
    k1, k2, k3 = jax.random.split(key, 3)
    # conv weights in kernel layout: (Cin, Cout); conv2 as (9, Cin, Cout).
    w1 = jax.random.normal(k1, (inplanes, width), jnp.float32) * 0.1
    w2 = jax.random.normal(k2, (9, width, width), jnp.float32) * 0.1
    w3 = jax.random.normal(k3, (width, out), jnp.float32) * 0.1
    ones = lambda c: jnp.ones((1, c), jnp.float32)    # BN gamma init (PyTorch)
    zeros = lambda c: jnp.zeros((1, c), jnp.float32)  # BN beta init  (PyTorch)
    return dict(w1=w1, w2=w2, w3=w3,
                g1=ones(width), b1=zeros(width),
                g2=ones(width), b2=zeros(width),
                g3=ones(out), b3=zeros(out))


def reference_forward(x, p):
    """Pure-JAX reference (NCHW, training-mode BN) for the correctness check."""
    def conv(xx, w_oihw, padc):
        return jax.lax.conv_general_dilated(
            xx, w_oihw, window_strides=(1, 1), padding=padc,
            dimension_numbers=("NCHW", "OIHW", "NCHW"))

    def bn(xx, g, b):
        mean = jnp.mean(xx, axis=(0, 2, 3), keepdims=True)
        var = jnp.mean((xx - mean) ** 2, axis=(0, 2, 3), keepdims=True)
        g = g.reshape(1, -1, 1, 1)
        b = b.reshape(1, -1, 1, 1)
        return (xx - mean) * jax.lax.rsqrt(var + _EPS) * g + b

    w1 = p["w1"].T[:, :, None, None]
    wd = p["w2"].shape[1]
    w2 = p["w2"].reshape(3, 3, wd, wd).transpose(3, 2, 0, 1)
    w3 = p["w3"].T[:, :, None, None]

    y = jax.nn.relu(bn(conv(x, w1, [(0, 0), (0, 0)]), p["g1"], p["b1"]))
    y = jax.nn.relu(bn(conv(y, w2, [(1, 1), (1, 1)]), p["g2"], p["b2"]))
    y = bn(conv(y, w3, [(0, 0), (0, 0)]), p["g3"], p["b3"])
    return jax.nn.relu(y + x)


if __name__ == "__main__":
    key = jax.random.PRNGKey(0)
    kx, kp = jax.random.split(key)

    N, H, W = 2, 16, 16
    PLANES = 128                 # width = 128, out = 512: lane-dense channels
    INPLANES = PLANES * 4        # identity residual (downsample=None)

    x = jax.random.normal(kx, (N, INPLANES, H, W), jnp.float32)
    params = init_params(kp, INPLANES, PLANES)

    ref = reference_forward(x, params)

    # Exact-dtype path: validates tiling / conv / chained-BN structure tightly.
    out_f32 = jax.block_until_ready(
        bottleneck_forward(x, params, compute_dtype=jnp.float32, tile_m=128))
    assert out_f32.shape == (N, INPLANES, H, W), out_f32.shape
    err_f32 = float(jnp.max(jnp.abs(out_f32 - ref)))
    assert err_f32 < 2e-3, f"f32 path mismatch vs reference: {err_f32}"

    # Fast path: bf16 MXU operands + bf16 HBM intermediates (BN stats and the
    # residual add stay f32); looser tolerance vs the f32 reference.
    out_bf16 = jax.block_until_ready(
        bottleneck_forward(x, params, compute_dtype=jnp.bfloat16, tile_m=128))
    err_bf16 = float(jnp.max(jnp.abs(out_bf16 - ref)))
    assert err_bf16 < 2.5e-1, f"bf16 path mismatch vs reference: {err_bf16}"

    print("KERNEL_OK")
</pallas_src>

<mosaic_0001>
module attributes {stable_mosaic.version = 11 : i64} {
  func.func @_conv1x1_stats_kernel(%arg0: i32, %arg1: memref<128x512xf32, #tpu.memory_space<vmem>>, %arg2: memref<512x128xf32, #tpu.memory_space<vmem>>, %arg3: memref<128x128xf32, #tpu.memory_space<vmem>>, %arg4: memref<1x2x128xf32, #tpu.memory_space<vmem>>) attributes {dimension_semantics = [#tpu.dimension_semantics<parallel>], iteration_bounds = array<i64: 4>, scalar_prefetch = 0 : i64, scratch_operands = 0 : i64, tpu.core_type = #tpu.core_type<tc>, window_params = [{transform_indices = @transform_0, window_bounds = array<i64: 128, 512>}, {pipeline_mode = #tpu.pipeline_mode<synchronous>, transform_indices = @transform_1, window_bounds = array<i64: 512, 128>}, {transform_indices = @transform_2, window_bounds = array<i64: 128, 128>}, {transform_indices = @transform_3, window_bounds = array<i64: 1, 2, 128>}]} {
    %c0 = arith.constant 0 : index
    %c0_0 = arith.constant 0 : index
    %0 = vector.load %arg1[%c0, %c0_0] : memref<128x512xf32, #tpu.memory_space<vmem>>, vector<128x512xf32>
    %c0_1 = arith.constant 0 : index
    %c0_2 = arith.constant 0 : index
    %1 = vector.load %arg2[%c0_1, %c0_2] : memref<512x128xf32, #tpu.memory_space<vmem>>, vector<512x128xf32>
    %cst = arith.constant dense<0.000000e+00> : vector<128x128xf32>
    %2 = tpu.matmul %0, %1, %cst {dimension_numbers = #tpu.dot_dimension_numbers<[1], [0], [0], [1], [0, 0, 1, 1], [], []>} : vector<128x512xf32>, vector<512x128xf32>, vector<128x128xf32> -> vector<128x128xf32>
    %c0_3 = arith.constant 0 : index
    %c0_4 = arith.constant 0 : index
    %3 = vector.load %arg3[%c0_3, %c0_4] : memref<128x128xf32, #tpu.memory_space<vmem>>, vector<128x128xf32>
    tpu.vector_store %arg3[%c0_3, %c0_4], %2 {strides = array<i32>} : memref<128x128xf32, #tpu.memory_space<vmem>>, vector<128x128xf32>,
    %cst_5 = arith.constant dense<0.000000e+00> : vector<128xf32>
    %4 = vector.multi_reduction <add>, %2, %cst_5 [0] : vector<128x128xf32> to vector<128xf32>
    %5 = vector.shape_cast %4 : vector<128xf32> to vector<1x128xf32>
    %6 = arith.mulf %2, %2 : vector<128x128xf32>
    %cst_6 = arith.constant dense<0.000000e+00> : vector<128xf32>
    %7 = vector.multi_reduction <add>, %6, %cst_6 [0] : vector<128x128xf32> to vector<128xf32>
    %8 = vector.shape_cast %7 : vector<128xf32> to vector<1x128xf32>
    %9 = tpu.concatenate %5, %8 in 0 : vector<1x128xf32>, vector<1x128xf32> -> vector<2x128xf32>
    %10 = vector.shape_cast %9 : vector<2x128xf32> to vector<1x2x128xf32>
    %c0_7 = arith.constant 0 : index
    %c0_8 = arith.constant 0 : index
    %c0_9 = arith.constant 0 : index
    %11 = vector.load %arg4[%c0_7, %c0_8, %c0_9] : memref<1x2x128xf32, #tpu.memory_space<vmem>>, vector<1x2x128xf32>
    tpu.vector_store %arg4[%c0_7, %c0_8, %c0_9], %10 {strides = array<i32>} : memref<1x2x128xf32, #tpu.memory_space<vmem>>, vector<1x2x128xf32>,
    return
  }
  func.func @transform_0(%arg0: i32) -> (i32, i32) {
    %c0_i32 = arith.constant 0 : i32
    %c0_i32_0 = arith.constant 0 : i32
    return %arg0, %c0_i32 : i32, i32
  }
  func.func @transform_1(%arg0: i32) -> (i32, i32) {
    %c0_i32 = arith.constant 0 : i32
    %c0_i32_0 = arith.constant 0 : i32
    %c0_i32_1 = arith.constant 0 : i32
    return %c0_i32, %c0_i32_0 : i32, i32
  }
  func.func @transform_2(%arg0: i32) -> (i32, i32) {
    %c0_i32 = arith.constant 0 : i32
    %c0_i32_0 = arith.constant 0 : i32
    return %arg0, %c0_i32 : i32, i32
  }
  func.func @transform_3(%arg0: i32) -> (i32, i32, i32) {
    %c0_i32 = arith.constant 0 : i32
    %c0_i32_0 = arith.constant 0 : i32
    %c0_i32_1 = arith.constant 0 : i32
    return %arg0, %c0_i32, %c0_i32_0 : i32, i32, i32
  }
}

module attributes {stable_mosaic.version = 11 : i64} {
  func.func @_bn_relu_conv3x3_kernel(%arg0: i32, %arg1: memref<256x128xf32, #tpu.memory_space<vmem>>, %arg2: memref<1x128xf32, #tpu.memory_space<vmem>>, %arg3: memref<1x128xf32, #tpu.memory_space<vmem>>, %arg4: memref<256x2xf32, #tpu.memory_space<vmem>>, %arg5: memref<3x384x128xf32, #tpu.memory_space<vmem>>, %arg6: memref<256x128xf32, #tpu.memory_space<vmem>>, %arg7: memref<1x2x128xf32, #tpu.memory_space<vmem>>, %arg8: memref<304x128xf32, #tpu.memory_space<vmem>>) attributes {dimension_semantics = [#tpu.dimension_semantics<parallel>], iteration_bounds = array<i64: 2>, scalar_prefetch = 0 : i64, scratch_operands = 1 : i64, tpu.core_type = #tpu.core_type<tc>, window_params = [{transform_indices = @transform_0, window_bounds = array<i64: 256, 128>}, {pipeline_mode = #tpu.pipeline_mode<synchronous>, transform_indices = @transform_1, window_bounds = array<i64: 1, 128>}, {pipeline_mode = #tpu.pipeline_mode<synchronous>, transform_indices = @transform_2, window_bounds = array<i64: 1, 128>}, {pipeline_mode = #tpu.pipeline_mode<synchronous>, transform_indices = @transform_3, window_bounds = array<i64: 256, 2>}, {pipeline_mode = #tpu.pipeline_mode<synchronous>, transform_indices = @transform_4, window_bounds = array<i64: 3, 384, 128>}, {transform_indices = @transform_5, window_bounds = array<i64: 256, 128>}, {transform_indices = @transform_6, window_bounds = array<i64: 1, 2, 128>}]} {
    %c0 = arith.constant 0 : index
    %c0_0 = arith.constant 0 : index
    %0 = vector.load %arg1[%c0, %c0_0] : memref<256x128xf32, #tpu.memory_space<vmem>>, vector<256x128xf32>
    %c0_1 = arith.constant 0 : index
    %c0_2 = arith.constant 0 : index
    %1 = vector.load %arg2[%c0_1, %c0_2] : memref<1x128xf32, #tpu.memory_space<vmem>>, vector<1x128xf32>
    %2 = vector.broadcast %1 : vector<1x128xf32> to vector<256x128xf32>
    %3 = arith.mulf %0, %2 : vector<256x128xf32>
    %c0_3 = arith.constant 0 : index
    %c0_4 = arith.constant 0 : index
    %4 = vector.load %arg3[%c0_3, %c0_4] : memref<1x128xf32, #tpu.memory_space<vmem>>, vector<1x128xf32>
    %5 = vector.broadcast %4 : vector<1x128xf32> to vector<256x128xf32>
    %6 = arith.addf %3, %5 : vector<256x128xf32>
    %cst = arith.constant 0.000000e+00 : f32
    %7 = vector.broadcast %cst : f32 to vector<256x128xf32>
    %8 = arith.maximumf %6, %7 : vector<256x128xf32>
    %cst_5 = arith.constant 0.000000e+00 : f32
    %9 = vector.broadcast %cst_5 : f32 to vector<24x128xf32>
    %c0_6 = arith.constant 0 : index
    %c0_7 = arith.constant 0 : index
    %10 = vector.load %arg8[%c0_6, %c0_7] : memref<304x128xf32, #tpu.memory_space<vmem>>, vector<24x128xf32>
    tpu.vector_store %arg8[%c0_6, %c0_7], %9 {strides = array<i32>} : memref<304x128xf32, #tpu.memory_space<vmem>>, vector<24x128xf32>,
    %c280 = arith.constant 280 : index
    %c0_8 = arith.constant 0 : index
    %11 = vector.load %arg8[%c280, %c0_8] : memref<304x128xf32, #tpu.memory_space<vmem>>, vector<24x128xf32>
    tpu.vector_store %arg8[%c280, %c0_8], %9 {strides = array<i32>} : memref<304x128xf32, #tpu.memory_space<vmem>>, vector<24x128xf32>,
    %c24 = arith.constant 24 : index
    %c0_9 = arith.constant 0 : index
    %12 = vector.load %arg8[%c24, %c0_9] : memref<304x128xf32, #tpu.memory_space<vmem>>, vector<256x128xf32>
    tpu.vector_store %arg8[%c24, %c0_9], %8 {strides = array<i32>} : memref<304x128xf32, #tpu.memory_space<vmem>>, vector<256x128xf32>,
    %c0_10 = arith.constant 0 : index
    %c0_11 = arith.constant 0 : index
    %13 = vector.load %arg4[%c0_10, %c0_11] : memref<256x2xf32, #tpu.memory_space<vmem>>, vector<256x2xf32>
    %cst_12 = arith.constant 0.000000e+00 : f32
    %14 = vector.broadcast %cst_12 : f32 to vector<256x128xf32>
    %c7 = arith.constant 7 : index
    %c0_13 = arith.constant 0 : index
    %15 = vector.load %arg8[%c7, %c0_13] : memref<304x128xf32, #tpu.memory_space<vmem>>, vector<256x128xf32>
    %c23 = arith.constant 23 : index
    %c0_14 = arith.constant 0 : index
    %16 = vector.load %arg8[%c23, %c0_14] : memref<304x128xf32, #tpu.memory_space<vmem>>, vector<256x128xf32>
    %c39 = arith.constant 39 : index
    %c0_15 = arith.constant 0 : index
    %17 = vector.load %arg8[%c39, %c0_15] : memref<304x128xf32, #tpu.memory_space<vmem>>, vector<256x128xf32>
    %18 = tpu.concatenate %15, %16, %17 in 1 : vector<256x128xf32>, vector<256x128xf32>, vector<256x128xf32> -> vector<256x384xf32>
    %c0_16 = arith.constant 0 : index
    %c0_17 = arith.constant 0 : index
    %c0_18 = arith.constant 0 : index
    %19 = vector.load %arg5[%c0_16, %c0_17, %c0_18] : memref<3x384x128xf32, #tpu.memory_space<vmem>>, vector<1x384x128xf32>
    %20 = vector.shape_cast %19 : vector<1x384x128xf32> to vector<384x128xf32>
    %cst_19 = arith.constant dense<0.000000e+00> : vector<256x128xf32>
    %21 = tpu.matmul %18, %20, %cst_19 {dimension_numbers = #tpu.dot_dimension_numbers<[1], [0], [0], [1], [0, 0, 1, 1], [], []>} : vector<256x384xf32>, vector<384x128xf32>, vector<256x128xf32> -> vector<256x128xf32>
    %22 = vector.extract_strided_slice %13 {offsets = [0, 0], sizes = [256, 1], strides = [1, 1]} : vector<256x2xf32> to vector<256x1xf32>
    %23 = vector.broadcast %22 : vector<256x1xf32> to vector<256x128xf32>
    %24 = arith.mulf %21, %23 : vector<256x128xf32>
    %25 = arith.addf %14, %24 : vector<256x128xf32>
    %c8 = arith.constant 8 : index
    %c0_20 = arith.constant 0 : index
    %26 = vector.load %arg8[%c8, %c0_20] : memref<304x128xf32, #tpu.memory_space<vmem>>, vector<256x128xf32>
    %c24_21 = arith.constant 24 : index
    %c0_22 = arith.constant 0 : index
    %27 = vector.load %arg8[%c24_21, %c0_22] : memref<304x128xf32, #tpu.memory_space<vmem>>, vector<256x128xf32>
    %c40 = arith.constant 40 : index
    %c0_23 = arith.constant 0 : index
    %28 = vector.load %arg8[%c40, %c0_23] : memref<304x128xf32, #tpu.memory_space<vmem>>, vector<256x128xf32>
    %29 = tpu.concatenate %26, %27, %28 in 1 : vector<256x128xf32>, vector<256x128xf32>, vector<256x128xf32> -> vector<256x384xf32>
    %c1 = arith.constant 1 : index
    %c0_24 = arith.constant 0 : index
    %c0_25 = arith.constant 0 : index
    %30 = vector.load %arg5[%c1, %c0_24, %c0_25] : memref<3x384x128xf32, #tpu.memory_space<vmem>>, vector<1x384x128xf32>
    %31 = vector.shape_cast %30 : vector<1x384x128xf32> to vector<384x128xf32>
    %cst_26 = arith.constant dense<0.000000e+00> : vector<256x128xf32>
    %32 = tpu.matmul %29, %31, %cst_26 {dimension_numbers = #tpu.dot_dimension_numbers<[1], [0], [0], [1], [0, 0, 1, 1], [], []>} : vector<256x384xf32>, vector<384x128xf32>, vector<256x128xf32> -> vector<256x128xf32>
    %33 = arith.addf %25, %32 : vector<256x128xf32>
    %c9 = arith.constant 9 : index
    %c0_27 = arith.constant 0 : index
    %34 = vector.load %arg8[%c9, %c0_27] : memref<304x128xf32, #tpu.memory_space<vmem>>, vector<256x128xf32>
    %c25 = arith.constant 25 : index
    %c0_28 = arith.constant 0 : index
    %35 = vector.load %arg8[%c25, %c0_28] : memref<304x128xf32, #tpu.memory_space<vmem>>, vector<256x128xf32>
    %c41 = arith.constant 41 : index
    %c0_29 = arith.constant 0 : index
    %36 = vector.load %arg8[%c41, %c0_29] : memref<304x128xf32, #tpu.memory_space<vmem>>, vector<256x128xf32>
    %37 = tpu.concatenate %34, %35, %36 in 1 : vector<256x128xf32>, vector<256x128xf32>, vector<256x128xf32> -> vector<256x384xf32>
    %c2 = arith.constant 2 : index
    %c0_30 = arith.constant 0 : index
    %c0_31 = arith.constant 0 : index
    %38 = vector.load %arg5[%c2, %c0_30, %c0_31] : memref<3x384x128xf32, #tpu.memory_space<vmem>>, vector<1x384x128xf32>
    %39 = vector.shape_cast %38 : vector<1x384x128xf32> to vector<384x128xf32>
    %cst_32 = arith.constant dense<0.000000e+00> : vector<256x128xf32>
    %40 = tpu.matmul %37, %39, %cst_32 {dimension_numbers = #tpu.dot_dimension_numbers<[1], [0], [0], [1], [0, 0, 1, 1], [], []>} : vector<256x384xf32>, vector<384x128xf32>, vector<256x128xf32> -> vector<256x128xf32>
    %41 = vector.extract_strided_slice %13 {offsets = [0, 1], sizes = [256, 1], strides = [1, 1]} : vector<256x2xf32> to vector<256x1xf32>
    %42 = vector.broadcast %41 : vector<256x1xf32> to vector<256x128xf32>
    %43 = arith.mulf %40, %42 : vector<256x128xf32>
    %44 = arith.addf %33, %43 : vector<256x128xf32>
    %c0_33 = arith.constant 0 : index
    %c0_34 = arith.constant 0 : index
    %45 = vector.load %arg6[%c0_33, %c0_34] : memref<256x128xf32, #tpu.memory_space<vmem>>, vector<256x128xf32>
    tpu.vector_store %arg6[%c0_33, %c0_34], %44 {strides = array<i32>} : memref<256x128xf32, #tpu.memory_space<vmem>>, vector<256x128xf32>,
    %cst_35 = arith.constant dense<0.000000e+00> : vector<128xf32>
    %46 = vector.multi_reduction <add>, %44, %cst_35 [0] : vector<256x128xf32> to vector<128xf32>
    %47 = vector.shape_cast %46 : vector<128xf32> to vector<1x128xf32>
    %48 = arith.mulf %44, %44 : vector<256x128xf32>
    %cst_36 = arith.constant dense<0.000000e+00> : vector<128xf32>
    %49 = vector.multi_reduction <add>, %48, %cst_36 [0] : vector<256x128xf32> to vector<128xf32>
    %50 = vector.shape_cast %49 : vector<128xf32> to vector<1x128xf32>
    %51 = tpu.concatenate %47, %50 in 0 : vector<1x128xf32>, vector<1x128xf32> -> vector<2x128xf32>
    %52 = vector.shape_cast %51 : vector<2x128xf32> to vector<1x2x128xf32>
    %c0_37 = arith.constant 0 : index
    %c0_38 = arith.constant 0 : index
    %c0_39 = arith.constant 0 : index
    %53 = vector.load %arg7[%c0_37, %c0_38, %c0_39] : memref<1x2x128xf32, #tpu.memory_space<vmem>>, vector<1x2x128xf32>
    tpu.vector_store %arg7[%c0_37, %c0_38, %c0_39], %52 {strides = array<i32>} : memref<1x2x128xf32, #tpu.memory_space<vmem>>, vector<1x2x128xf32>,
    return
  }
  func.func @transform_0(%arg0: i32) -> (i32, i32) {
    %c0_i32 = arith.constant 0 : i32
    %c0_i32_0 = arith.constant 0 : i32
    return %arg0, %c0_i32 : i32, i32
  }
  func.func @transform_1(%arg0: i32) -> (i32, i32) {
    %c0_i32 = arith.constant 0 : i32
    %c0_i32_0 = arith.constant 0 : i32
    %c0_i32_1 = arith.constant 0 : i32
    return %c0_i32, %c0_i32_0 : i32, i32
  }
  func.func @transform_2(%arg0: i32) -> (i32, i32) {
    %c0_i32 = arith.constant 0 : i32
    %c0_i32_0 = arith.constant 0 : i32
    %c0_i32_1 = arith.constant 0 : i32
    return %c0_i32, %c0_i32_0 : i32, i32
  }
  func.func @transform_3(%arg0: i32) -> (i32, i32) {
    %c0_i32 = arith.constant 0 : i32
    %c0_i32_0 = arith.constant 0 : i32
    %c0_i32_1 = arith.constant 0 : i32
    return %c0_i32, %c0_i32_0 : i32, i32
  }
  func.func @transform_4(%arg0: i32) -> (i32, i32, i32) {
    %c0_i32 = arith.constant 0 : i32
    %c0_i32_0 = arith.constant 0 : i32
    %c0_i32_1 = arith.constant 0 : i32
    %c0_i32_2 = arith.constant 0 : i32
    return %c0_i32, %c0_i32_0, %c0_i32_1 : i32, i32, i32
  }
  func.func @transform_5(%arg0: i32) -> (i32, i32) {
    %c0_i32 = arith.constant 0 : i32
    %c0_i32_0 = arith.constant 0 : i32
    return %arg0, %c0_i32 : i32, i32
  }
  func.func @transform_6(%arg0: i32) -> (i32, i32, i32) {
    %c0_i32 = arith.constant 0 : i32
    %c0_i32_0 = arith.constant 0 : i32
    %c0_i32_1 = arith.constant 0 : i32
    return %arg0, %c0_i32, %c0_i32_0 : i32, i32, i32
  }
}

module attributes {stable_mosaic.version = 11 : i64} {
  func.func @_bn_relu_conv1x1_stats_kernel(%arg0: i32, %arg1: memref<128x128xf32, #tpu.memory_space<vmem>>, %arg2: memref<1x128xf32, #tpu.memory_space<vmem>>, %arg3: memref<1x128xf32, #tpu.memory_space<vmem>>, %arg4: memref<128x512xf32, #tpu.memory_space<vmem>>, %arg5: memref<128x512xf32, #tpu.memory_space<vmem>>, %arg6: memref<1x2x512xf32, #tpu.memory_space<vmem>>) attributes {dimension_semantics = [#tpu.dimension_semantics<parallel>], iteration_bounds = array<i64: 4>, scalar_prefetch = 0 : i64, scratch_operands = 0 : i64, tpu.core_type = #tpu.core_type<tc>, window_params = [{transform_indices = @transform_0, window_bounds = array<i64: 128, 128>}, {pipeline_mode = #tpu.pipeline_mode<synchronous>, transform_indices = @transform_1, window_bounds = array<i64: 1, 128>}, {pipeline_mode = #tpu.pipeline_mode<synchronous>, transform_indices = @transform_2, window_bounds = array<i64: 1, 128>}, {pipeline_mode = #tpu.pipeline_mode<synchronous>, transform_indices = @transform_3, window_bounds = array<i64: 128, 512>}, {transform_indices = @transform_4, window_bounds = array<i64: 128, 512>}, {transform_indices = @transform_5, window_bounds = array<i64: 1, 2, 512>}]} {
    %c0 = arith.constant 0 : index
    %c0_0 = arith.constant 0 : index
    %0 = vector.load %arg1[%c0, %c0_0] : memref<128x128xf32, #tpu.memory_space<vmem>>, vector<128x128xf32>
    %c0_1 = arith.constant 0 : index
    %c0_2 = arith.constant 0 : index
    %1 = vector.load %arg2[%c0_1, %c0_2] : memref<1x128xf32, #tpu.memory_space<vmem>>, vector<1x128xf32>
    %2 = vector.broadcast %1 : vector<1x128xf32> to vector<128x128xf32>
    %3 = arith.mulf %0, %2 : vector<128x128xf32>
    %c0_3 = arith.constant 0 : index
    %c0_4 = arith.constant 0 : index
    %4 = vector.load %arg3[%c0_3, %c0_4] : memref<1x128xf32, #tpu.memory_space<vmem>>, vector<1x128xf32>
    %5 = vector.broadcast %4 : vector<1x128xf32> to vector<128x128xf32>
    %6 = arith.addf %3, %5 : vector<128x128xf32>
    %cst = arith.constant 0.000000e+00 : f32
    %7 = vector.broadcast %cst : f32 to vector<128x128xf32>
    %8 = arith.maximumf %6, %7 : vector<128x128xf32>
    %c0_5 = arith.constant 0 : index
    %c0_6 = arith.constant 0 : index
    %9 = vector.load %arg4[%c0_5, %c0_6] : memref<128x512xf32, #tpu.memory_space<vmem>>, vector<128x512xf32>
    %cst_7 = arith.constant dense<0.000000e+00> : vector<128x512xf32>
    %10 = tpu.matmul %8, %9, %cst_7 {dimension_numbers = #tpu.dot_dimension_numbers<[1], [0], [0], [1], [0, 0, 1, 1], [], []>} : vector<128x128xf32>, vector<128x512xf32>, vector<128x512xf32> -> vector<128x512xf32>
    %c0_8 = arith.constant 0 : index
    %c0_9 = arith.constant 0 : index
    %11 = vector.load %arg5[%c0_8, %c0_9] : memref<128x512xf32, #tpu.memory_space<vmem>>, vector<128x512xf32>
    tpu.vector_store %arg5[%c0_8, %c0_9], %10 {strides = array<i32>} : memref<128x512xf32, #tpu.memory_space<vmem>>, vector<128x512xf32>,
    %cst_10 = arith.constant dense<0.000000e+00> : vector<512xf32>
    %12 = vector.multi_reduction <add>, %10, %cst_10 [0] : vector<128x512xf32> to vector<512xf32>
    %13 = vector.shape_cast %12 : vector<512xf32> to vector<1x512xf32>
    %14 = arith.mulf %10, %10 : vector<128x512xf32>
    %cst_11 = arith.constant dense<0.000000e+00> : vector<512xf32>
    %15 = vector.multi_reduction <add>, %14, %cst_11 [0] : vector<128x512xf32> to vector<512xf32>
    %16 = vector.shape_cast %15 : vector<512xf32> to vector<1x512xf32>
    %17 = tpu.concatenate %13, %16 in 0 : vector<1x512xf32>, vector<1x512xf32> -> vector<2x512xf32>
    %18 = vector.shape_cast %17 : vector<2x512xf32> to vector<1x2x512xf32>
    %c0_12 = arith.constant 0 : index
    %c0_13 = arith.constant 0 : index
    %c0_14 = arith.constant 0 : index
    %19 = vector.load %arg6[%c0_12, %c0_13, %c0_14] : memref<1x2x512xf32, #tpu.memory_space<vmem>>, vector<1x2x512xf32>
    tpu.vector_store %arg6[%c0_12, %c0_13, %c0_14], %18 {strides = array<i32>} : memref<1x2x512xf32, #tpu.memory_space<vmem>>, vector<1x2x512xf32>,
    return
  }
  func.func @transform_0(%arg0: i32) -> (i32, i32) {
    %c0_i32 = arith.constant 0 : i32
    %c0_i32_0 = arith.constant 0 : i32
    return %arg0, %c0_i32 : i32, i32
  }
  func.func @transform_1(%arg0: i32) -> (i32, i32) {
    %c0_i32 = arith.constant 0 : i32
    %c0_i32_0 = arith.constant 0 : i32
    %c0_i32_1 = arith.constant 0 : i32
    return %c0_i32, %c0_i32_0 : i32, i32
  }
  func.func @transform_2(%arg0: i32) -> (i32, i32) {
    %c0_i32 = arith.constant 0 : i32
    %c0_i32_0 = arith.constant 0 : i32
    %c0_i32_1 = arith.constant 0 : i32
    return %c0_i32, %c0_i32_0 : i32, i32
  }
  func.func @transform_3(%arg0: i32) -> (i32, i32) {
    %c0_i32 = arith.constant 0 : i32
    %c0_i32_0 = arith.constant 0 : i32
    %c0_i32_1 = arith.constant 0 : i32
    return %c0_i32, %c0_i32_0 : i32, i32
  }
  func.func @transform_4(%arg0: i32) -> (i32, i32) {
    %c0_i32 = arith.constant 0 : i32
    %c0_i32_0 = arith.constant 0 : i32
    return %arg0, %c0_i32 : i32, i32
  }
  func.func @transform_5(%arg0: i32) -> (i32, i32, i32) {
    %c0_i32 = arith.constant 0 : i32
    %c0_i32_0 = arith.constant 0 : i32
    %c0_i32_1 = arith.constant 0 : i32
    return %arg0, %c0_i32, %c0_i32_0 : i32, i32, i32
  }
}

module attributes {stable_mosaic.version = 11 : i64} {
  func.func @_bn_add_relu_kernel(%arg0: i32, %arg1: memref<128x512xf32, #tpu.memory_space<vmem>>, %arg2: memref<128x512xf32, #tpu.memory_space<vmem>>, %arg3: memref<1x512xf32, #tpu.memory_space<vmem>>, %arg4: memref<1x512xf32, #tpu.memory_space<vmem>>, %arg5: memref<128x512xf32, #tpu.memory_space<vmem>>) attributes {dimension_semantics = [#tpu.dimension_semantics<parallel>], iteration_bounds = array<i64: 4>, scalar_prefetch = 0 : i64, scratch_operands = 0 : i64, tpu.core_type = #tpu.core_type<tc>, window_params = [{transform_indices = @transform_0, window_bounds = array<i64: 128, 512>}, {transform_indices = @transform_1, window_bounds = array<i64: 128, 512>}, {pipeline_mode = #tpu.pipeline_mode<synchronous>, transform_indices = @transform_2, window_bounds = array<i64: 1, 512>}, {pipeline_mode = #tpu.pipeline_mode<synchronous>, transform_indices = @transform_3, window_bounds = array<i64: 1, 512>}, {transform_indices = @transform_4, window_bounds = array<i64: 128, 512>}]} {
    %c0 = arith.constant 0 : index
    %c0_0 = arith.constant 0 : index
    %0 = vector.load %arg2[%c0, %c0_0] : memref<128x512xf32, #tpu.memory_space<vmem>>, vector<128x512xf32>
    %c0_1 = arith.constant 0 : index
    %c0_2 = arith.constant 0 : index
    %1 = vector.load %arg3[%c0_1, %c0_2] : memref<1x512xf32, #tpu.memory_space<vmem>>, vector<1x512xf32>
    %2 = vector.broadcast %1 : vector<1x512xf32> to vector<128x512xf32>
    %3 = arith.mulf %0, %2 : vector<128x512xf32>
    %c0_3 = arith.constant 0 : index
    %c0_4 = arith.constant 0 : index
    %4 = vector.load %arg4[%c0_3, %c0_4] : memref<1x512xf32, #tpu.memory_space<vmem>>, vector<1x512xf32>
    %5 = vector.broadcast %4 : vector<1x512xf32> to vector<128x512xf32>
    %6 = arith.addf %3, %5 : vector<128x512xf32>
    %c0_5 = arith.constant 0 : index
    %c0_6 = arith.constant 0 : index
    %7 = vector.load %arg1[%c0_5, %c0_6] : memref<128x512xf32, #tpu.memory_space<vmem>>, vector<128x512xf32>
    %8 = arith.addf %6, %7 : vector<128x512xf32>
    %cst = arith.constant 0.000000e+00 : f32
    %9 = vector.broadcast %cst : f32 to vector<128x512xf32>
    %10 = arith.maximumf %8, %9 : vector<128x512xf32>
    %c0_7 = arith.constant 0 : index
    %c0_8 = arith.constant 0 : index
    %11 = vector.load %arg5[%c0_7, %c0_8] : memref<128x512xf32, #tpu.memory_space<vmem>>, vector<128x512xf32>
    tpu.vector_store %arg5[%c0_7, %c0_8], %10 {strides = array<i32>} : memref<128x512xf32, #tpu.memory_space<vmem>>, vector<128x512xf32>,
    return
  }
  func.func @transform_0(%arg0: i32) -> (i32, i32) {
    %c0_i32 = arith.constant 0 : i32
    %c0_i32_0 = arith.constant 0 : i32
    return %arg0, %c0_i32 : i32, i32
  }
  func.func @transform_1(%arg0: i32) -> (i32, i32) {
    %c0_i32 = arith.constant 0 : i32
    %c0_i32_0 = arith.constant 0 : i32
    return %arg0, %c0_i32 : i32, i32
  }
  func.func @transform_2(%arg0: i32) -> (i32, i32) {
    %c0_i32 = arith.constant 0 : i32
    %c0_i32_0 = arith.constant 0 : i32
    %c0_i32_1 = arith.constant 0 : i32
    return %c0_i32, %c0_i32_0 : i32, i32
  }
  func.func @transform_3(%arg0: i32) -> (i32, i32) {
    %c0_i32 = arith.constant 0 : i32
    %c0_i32_0 = arith.constant 0 : i32
    %c0_i32_1 = arith.constant 0 : i32
    return %c0_i32, %c0_i32_0 : i32, i32
  }
  func.func @transform_4(%arg0: i32) -> (i32, i32) {
    %c0_i32 = arith.constant 0 : i32
    %c0_i32_0 = arith.constant 0 : i32
    return %arg0, %c0_i32 : i32, i32
  }
}

</mosaic_0001>

<bundles_post_ra>
// kernel: bottleneck_forward.4
= control target key start
LH: loop header
LB: loop body
LE: loop exit
PB: predicated region body
PF: predicated region fallthrough
CT: control target
= control target key end

     0   :  { %s980_s12 = smov 0   ;;  %s1301_s0 = inlined_call_operand.vmem [shape: f32[512,512], index: 0, kind: input, shape index: {}]   ;;  %s1302_s1 = inlined_call_operand.vmem [shape: f32[512,128], index: 1, kind: input, shape index: {}]   ;;  %s1303_s2 = inlined_call_operand.vmem [shape: f32[512,128], index: 2, kind: output, shape index: {0}]   ;;  %s1304_s3 = inlined_call_operand.vmem [shape: f32[4,2,128], index: 3, kind: output, shape index: {1}]  }
   0x1 LB: > { %s986_s13 = sadd.s32 4294967295, %s958_s12   ;;  %p774_p0 = scmp.ge.s32.totalorder %s958_s12, 1  ;;  %s958_s12 = sphi %s980_s12, %s14_s12  }
   0x2   : > { %p142_p1 = scmp.lt.s32.totalorder %s958_s12, 5 }
   0x4   : > { %p143_p2 = pnand %p774_p0, %p142_p1 }
   0x5   : > { %s775_s24 = sshll.u32 (!%p143_p2), %s986_s13, 4  ;;  %p184_p4 = scmp.lt.s32.totalorder (!%p143_p2), %s986_s13, 3 }
   0x6   : > { %146 = sbr.rel (%p143_p2) target bundleno = 324 (0x144), region = 28  ;;  %p1101_p3 = scmp.lt.s32.totalorder (!%p143_p2), %s775_s24, 63 }
   0xb   : > { %v283_v0 = vld [vmem:[%s1302_s1 + $0xf8] sm:$0xff]  ;;  %v282_v4 = vld [vmem:[%s1302_s1 + $0xf0] sm:$0xff]  ;;  %v281_v8 = vld [vmem:[%s1302_s1 + $0xe8] sm:$0xff]  ;;  %s1307_s24 = smov (!%p1101_p3, %s775_s24), 63  ;;  %s1309_s13 = smov (!%p184_p4, %s986_s13), 3  ;;  %vm680_vm0 = vcmask 1040384  }
   0xc   : > { %v315_v1 = vld [vmem:[%s1302_s1 + $0x1f8] sm:$0xff]  ;;  %784 = vmatprep.subr.mxu0 %v283_v0  ;;  %v314_v5 = vld [vmem:[%s1302_s1 + $0x1f0] sm:$0xff]  ;;  %v313_v9 = vld [vmem:[%s1302_s1 + $0x1e8] sm:$0xff]  ;;  %s783_s21 = sshll.u32 %s1307_s24, 5  ;;  %s779_s26 = sshll.u32 %s1307_s24, 3 }
   0xd   : > { %v267_v2 = vld [vmem:[%s1302_s1 + $0x78] sm:$0xff]  ;;  %864 = vmatprep.subr.mxu1 %v315_v1  ;;  %v266_v6 = vld [vmem:[%s1302_s1 + $0x70] sm:$0xff]  ;;  %v265_v10 = vld [vmem:[%s1302_s1 + $0x68] sm:$0xff]  ;;  %s1181_s10 = scalar_lea.vmem %s1301_s0, %s783_s21  ;;  %s1269_s29 = scalar_lea.vmem %s1303_s2, %s779_s26 }
   0xe   : > { %v299_v3 = vld [vmem:[%s1302_s1 + $0x178] sm:$0xff]  ;;  %785 = vmatpush3.msra.mxu0 %v267_v2  ;;  %v298_v7 = vld [vmem:[%s1302_s1 + $0x170] sm:$0xff]  ;;  %v297_v11 = vld [vmem:[%s1302_s1 + $0x168] sm:$0xff]  ;;  %s780_s24 = sshll.u32 %s1309_s13, 1 }
   0xf   : > { %865 = vmatpush3.msra.mxu1 %v299_v3  ;;  %786 = vmatprep.subr.mxu0 %v282_v4  ;;  %v280_v12 = vld [vmem:[%s1302_s1 + $0xe0] sm:$0xff]  ;;  %v279_v16 = vld [vmem:[%s1302_s1 + $0xd8] sm:$0xff]  ;;  %v278_v20 = vld [vmem:[%s1302_s1 + $0xd0] sm:$0xff]  ;;  %s187_s5 = scalar_lea.vmem %s1304_s3, %s780_s24 }
  0x10   : > { %866 = vmatprep.subr.mxu1 %v314_v5  ;;  %787 = vmatpush3.msra.mxu0 %v266_v6  ;;  %v312_v13 = vld [vmem:[%s1302_s1 + $0x1e0] sm:$0xff]  ;;  %v311_v17 = vld [vmem:[%s1302_s1 + $0x1d8] sm:$0xff]  ;;  %v310_v21 = vld [vmem:[%s1302_s1 + $0x1d0] sm:$0xff] }
  0x11   : > { %867 = vmatpush3.msra.mxu1 %v298_v7  ;;  %788 = vmatprep.subr.mxu0 %v281_v8  ;;  %v264_v14 = vld [vmem:[%s1302_s1 + $0x60] sm:$0xff]  ;;  %v263_v18 = vld [vmem:[%s1302_s1 + $0x58] sm:$0xff]  ;;  %v262_v22 = vld [vmem:[%s1302_s1 + $0x50] sm:$0xff] }
  0x12   : > { %868 = vmatprep.subr.mxu1 %v313_v9  ;;  %v296_v15 = vld [vmem:[%s1302_s1 + $0x160] sm:$0xff]  ;;  %789 = vmatpush3.msra.mxu0 %v265_v10  ;;  %v295_v19 = vld [vmem:[%s1302_s1 + $0x158] sm:$0xff]  ;;  %v294_v23 = vld [vmem:[%s1302_s1 + $0x150] sm:$0xff] }
  0x13   : > { %869 = vmatpush3.msra.mxu1 %v297_v11  ;;  %790 = vmatprep.subr.mxu0 %v280_v12  ;;  %v277_v24 = vld [vmem:[%s1302_s1 + $0xc8] sm:$0xff]  ;;  %v276_v28 = vld [vmem:[%s1302_s1 + $0xc0] sm:$0xff]  ;;  %v275_v32 = vld [vmem:[%s1302_s1 + $0xb8] sm:$0xff] }
  0x14   : > { %870 = vmatprep.subr.mxu1 %v312_v13  ;;  %791 = vmatpush3.msra.mxu0 %v264_v14  ;;  %v309_v25 = vld [vmem:[%s1302_s1 + $0x1c8] sm:$0xff]  ;;  %v308_v29 = vld [vmem:[%s1302_s1 + $0x1c0] sm:$0xff]  ;;  %v307_v33 = vld [vmem:[%s1302_s1 + $0x1b8] sm:$0xff] }
  0x15   : > { %871 = vmatpush3.msra.mxu1 %v296_v15  ;;  %792 = vmatprep.subr.mxu0 %v279_v16  ;;  %v261_v26 = vld [vmem:[%s1302_s1 + $0x48] sm:$0xff]  ;;  %v260_v30 = vld [vmem:[%s1302_s1 + $0x40] sm:$0xff]  ;;  %v259_v34 = vld [vmem:[%s1302_s1 + $0x38] sm:$0xff] }
  0x16   : > { %872 = vmatprep.subr.mxu1 %v311_v17  ;;  %793 = vmatpush3.msra.mxu0 %v263_v18  ;;  %v293_v27 = vld [vmem:[%s1302_s1 + $0x148] sm:$0xff]  ;;  %v292_v31 = vld [vmem:[%s1302_s1 + $0x140] sm:$0xff]  ;;  %v291_v35 = vld [vmem:[%s1302_s1 + $0x138] sm:$0xff] }
  0x17   : > { %873 = vmatpush3.msra.mxu1 %v295_v19  ;;  %794 = vmatprep.subr.mxu0 %v278_v20  ;;  %v274_v36 = vld [vmem:[%s1302_s1 + $0xb0] sm:$0xff]  ;;  %v273_v40 = vld [vmem:[%s1302_s1 + $0xa8] sm:$0xff]  ;;  %v272_v44 = vld [vmem:[%s1302_s1 + $0xa0] sm:$0xff] }
  0x18   : > { %874 = vmatprep.subr.mxu1 %v310_v21  ;;  %795 = vmatpush3.msra.mxu0 %v262_v22  ;;  %v306_v37 = vld [vmem:[%s1302_s1 + $0x1b0] sm:$0xff]  ;;  %v305_v41 = vld [vmem:[%s1302_s1 + $0x1a8] sm:$0xff]  ;;  %v304_v45 = vld [vmem:[%s1302_s1 + $0x1a0] sm:$0xff] }
  0x19   : > { %875 = vmatpush3.msra.mxu1 %v294_v23  ;;  %796 = vmatprep.subr.mxu0 %v277_v24  ;;  %v258_v38 = vld [vmem:[%s1302_s1 + $0x30] sm:$0xff]  ;;  %v257_v42 = vld [vmem:[%s1302_s1 + $0x28] sm:$0xff]  ;;  %v256_v46 = vld [vmem:[%s1302_s1 + $0x20] sm:$0xff] }
  0x1a   : > { %876 = vmatprep.subr.mxu1 %v309_v25  ;;  %797 = vmatpush3.msra.mxu0 %v261_v26  ;;  %v290_v39 = vld [vmem:[%s1302_s1 + $0x130] sm:$0xff]  ;;  %v289_v43 = vld [vmem:[%s1302_s1 + $0x128] sm:$0xff]  ;;  %v288_v47 = vld [vmem:[%s1302_s1 + $0x120] sm:$0xff] }
  0x1b   : > { %877 = vmatpush3.msra.mxu1 %v293_v27  ;;  %798 = vmatprep.subr.mxu0 %v276_v28  ;;  %v271_v48 = vld [vmem:[%s1302_s1 + $0x98] sm:$0xff]  ;;  %v270_v52 = vld [vmem:[%s1302_s1 + $0x90] sm:$0xff]  ;;  %v269_v56 = vld [vmem:[%s1302_s1 + $0x88] sm:$0xff] }
  0x1c   : > { %878 = vmatprep.subr.mxu1 %v308_v29  ;;  %799 = vmatpush3.msra.mxu0 %v260_v30  ;;  %v303_v49 = vld [vmem:[%s1302_s1 + $0x198] sm:$0xff]  ;;  %v302_v53 = vld [vmem:[%s1302_s1 + $0x190] sm:$0xff]  ;;  %v301_v57 = vld [vmem:[%s1302_s1 + $0x188] sm:$0xff] }
  0x1d   : > { %879 = vmatpush3.msra.mxu1 %v292_v31  ;;  %800 = vmatprep.subr.mxu0 %v275_v32  ;;  %v255_v50 = vld [vmem:[%s1302_s1 + $0x18] sm:$0xff]  ;;  %v254_v54 = vld [vmem:[%s1302_s1 + $0x10] sm:$0xff]  ;;  %v253_v58 = vld [vmem:[%s1302_s1 + $0x8] sm:$0xff] }
  0x1e   : > { %880 = vmatprep.subr.mxu1 %v307_v33  ;;  %801 = vmatpush3.msra.mxu0 %v259_v34  ;;  %v287_v51 = vld [vmem:[%s1302_s1 + $0x118] sm:$0xff]  ;;  %v286_v55 = vld [vmem:[%s1302_s1 + $0x110] sm:$0xff]  ;;  %v285_v59 = vld [vmem:[%s1302_s1 + $0x108] sm:$0xff] }
  0x1f   : > { %881 = vmatpush3.msra.mxu1 %v291_v35  ;;  %802 = vmatprep.subr.mxu0 %v274_v36  ;;  %v268_v60 = vld [vmem:[%s1302_s1 + $0x80] sm:$0xff]  ;;  %v189_v63 = vld [vmem:[%s1181_s10 + $0x8] sm:$0xff]  ;;  %v191_v1 = vld [vmem:[%s1181_s10 + $0x18] sm:$0xff] }
  0x20   : > { %882 = vmatprep.subr.mxu1 %v306_v37  ;;  %803 = vmatpush3.msra.mxu0 %v258_v38  ;;  %v300_v61 = vld [vmem:[%s1302_s1 + $0x180] sm:$0xff]  ;;  %v190_v3 = vld [vmem:[%s1181_s10 + $0x10] sm:$0xff]  ;;  %v193_v4 = vld [vmem:[%s1181_s10 + $0x28] sm:$0xff] }
  0x21   : > { %883 = vmatpush3.msra.mxu1 %v290_v39  ;;  %804 = vmatprep.subr.mxu0 %v273_v40  ;;  %v252_v62 = vld [vmem:[%s1302_s1] sm:$0xff]  ;;  %v195_v5 = vld [vmem:[%s1181_s10 + $0x38] sm:$0xff]  ;;  %v194_v7 = vld [vmem:[%s1181_s10 + $0x30] sm:$0xff] }
  0x22   : > { %884 = vmatprep.subr.mxu1 %v305_v41  ;;  %805 = vmatpush3.msra.mxu0 %v257_v42  ;;  %v284_v0 = vld [vmem:[%s1302_s1 + $0x100] sm:$0xff]  ;;  %v197_v8 = vld [vmem:[%s1181_s10 + $0x48] sm:$0xff]  ;;  %v199_v9 = vld [vmem:[%s1181_s10 + $0x58] sm:$0xff] }
  0x23   : > { %885 = vmatpush3.msra.mxu1 %v289_v43  ;;  %806 = vmatprep.subr.mxu0 %v272_v44  ;;  %v188_v2 = vld [vmem:[%s1181_s10] sm:$0xff]  ;;  %v198_v11 = vld [vmem:[%s1181_s10 + $0x50] sm:$0xff]  ;;  %v201_v12 = vld [vmem:[%s1181_s10 + $0x68] sm:$0xff] }
  0x24   : > { %886 = vmatprep.subr.mxu1 %v304_v45  ;;  %807 = vmatpush3.msra.mxu0 %v256_v46  ;;  %v192_v6 = vld [vmem:[%s1181_s10 + $0x20] sm:$0xff]  ;;  %v203_v13 = vld [vmem:[%s1181_s10 + $0x78] sm:$0xff]  ;;  %v202_v15 = vld [vmem:[%s1181_s10 + $0x70] sm:$0xff] }
  0x25   : > { %887 = vmatpush3.msra.mxu1 %v288_v47  ;;  %808 = vmatprep.subr.mxu0 %v271_v48  ;;  %v196_v10 = vld [vmem:[%s1181_s10 + $0x40] sm:$0xff]  ;;  %v205_v16 = vld [vmem:[%s1181_s10 + $0x88] sm:$0xff]  ;;  %v207_v17 = vld [vmem:[%s1181_s10 + $0x98] sm:$0xff] }
  0x26   : > { %888 = vmatprep.subr.mxu1 %v303_v49  ;;  %809 = vmatpush3.msra.mxu0 %v255_v50  ;;  %v200_v14 = vld [vmem:[%s1181_s10 + $0x60] sm:$0xff]  ;;  %v206_v19 = vld [vmem:[%s1181_s10 + $0x90] sm:$0xff]  ;;  %v209_v20 = vld [vmem:[%s1181_s10 + $0xa8] sm:$0xff] }
  0x27   : > { %889 = vmatpush3.msra.mxu1 %v287_v51  ;;  %810 = vmatprep.subr.mxu0 %v270_v52  ;;  %v204_v18 = vld [vmem:[%s1181_s10 + $0x80] sm:$0xff]  ;;  %v211_v21 = vld [vmem:[%s1181_s10 + $0xb8] sm:$0xff]  ;;  %v210_v23 = vld [vmem:[%s1181_s10 + $0xb0] sm:$0xff] }
  0x28   : > { %890 = vmatprep.subr.mxu1 %v302_v53  ;;  %811 = vmatpush3.msra.mxu0 %v254_v54  ;;  %v208_v22 = vld [vmem:[%s1181_s10 + $0xa0] sm:$0xff]  ;;  %v213_v24 = vld [vmem:[%s1181_s10 + $0xc8] sm:$0xff]  ;;  %v215_v25 = vld [vmem:[%s1181_s10 + $0xd8] sm:$0xff] }
  0x29   : > { %891 = vmatpush3.msra.mxu1 %v286_v55  ;;  %812 = vmatprep.subr.mxu0 %v269_v56  ;;  %v212_v26 = vld [vmem:[%s1181_s10 + $0xc0] sm:$0xff]  ;;  %v214_v27 = vld [vmem:[%s1181_s10 + $0xd0] sm:$0xff]  ;;  %v217_v28 = vld [vmem:[%s1181_s10 + $0xe8] sm:$0xff] }
  0x2a   : > { %892 = vmatprep.subr.mxu1 %v301_v57  ;;  %813 = vmatpush3.msra.mxu0 %v253_v58  ;;  %v219_v29 = vld [vmem:[%s1181_s10 + $0xf8] sm:$0xff]  ;;  %v216_v30 = vld [vmem:[%s1181_s10 + $0xe0] sm:$0xff]  ;;  %v218_v31 = vld [vmem:[%s1181_s10 + $0xf0] sm:$0xff] }
  0x2b   : > { %893 = vmatpush3.msra.mxu1 %v285_v59  ;;  %814 = vmatprep.subr.mxu0 %v268_v60  ;;  %v221_v32 = vld [vmem:[%s1181_s10 + $0x108] sm:$0xff]  ;;  %v223_v33 = vld [vmem:[%s1181_s10 + $0x118] sm:$0xff]  ;;  %v220_v34 = vld [vmem:[%s1181_s10 + $0x100] sm:$0xff] }
  0x2c   : > { %894 = vmatprep.subr.mxu1 %v300_v61  ;;  %815 = vmatpush3.msra.mxu0 %v252_v62  ;;  %v222_v35 = vld [vmem:[%s1181_s10 + $0x110] sm:$0xff]  ;;  %v225_v36 = vld [vmem:[%s1181_s10 + $0x128] sm:$0xff]  ;;  %v227_v37 = vld [vmem:[%s1181_s10 + $0x138] sm:$0xff] }
  0x2d   : > { %380 = vmatprep.mubr.f32.mxu0 %v189_v63  ;;  %895 = vmatpush3.msra.mxu1 %v284_v0  ;;  %v224_v38 = vld [vmem:[%s1181_s10 + $0x120] sm:$0xff]  ;;  %v226_v39 = vld [vmem:[%s1181_s10 + $0x130] sm:$0xff]  ;;  %v229_v40 = vld [vmem:[%s1181_s10 + $0x148] sm:$0xff] }
  0x2e   : > { %525 = vmatprep.mubr.f32.mxu1 %v191_v1  ;;  %381 = vmatmul.mubr.f32.vlgmr.msra.gmra.mxu0 %v188_v2  ;;  %v231_v41 = vld [vmem:[%s1181_s10 + $0x158] sm:$0xff]  ;;  %v228_v42 = vld [vmem:[%s1181_s10 + $0x140] sm:$0xff]  ;;  %v230_v43 = vld [vmem:[%s1181_s10 + $0x150] sm:$0xff] }
  0x2f   : > { %526 = vmatmul.mubr.f32.vlgmr.msra.gmra.mxu1 %v190_v3  ;;  %385 = vmatprep.mubr.f32.mxu0 %v193_v4  ;;  %v233_v44 = vld [vmem:[%s1181_s10 + $0x168] sm:$0xff]  ;;  %v235_v45 = vld [vmem:[%s1181_s10 + $0x178] sm:$0xff]  ;;  %v232_v46 = vld [vmem:[%s1181_s10 + $0x160] sm:$0xff] }
  0x30   : > { %530 = vmatprep.mubr.f32.mxu1 %v195_v5  ;;  %v234_v47 = vld [vmem:[%s1181_s10 + $0x170] sm:$0xff]  ;;  %v237_v48 = vld [vmem:[%s1181_s10 + $0x188] sm:$0xff]  ;;  %v239_v49 = vld [vmem:[%s1181_s10 + $0x198] sm:$0xff] }
  0x31   : > { %v236_v50 = vld [vmem:[%s1181_s10 + $0x180] sm:$0xff]  ;;  %v238_v51 = vld [vmem:[%s1181_s10 + $0x190] sm:$0xff]  ;;  %v241_v52 = vld [vmem:[%s1181_s10 + $0x1a8] sm:$0xff] }
  0x32   : > { %386 = vmatmul.mubr.f32.gmra.mxu0 %v192_v6  ;;  %v243_v53 = vld [vmem:[%s1181_s10 + $0x1b8] sm:$0xff]  ;;  %v240_v54 = vld [vmem:[%s1181_s10 + $0x1a0] sm:$0xff]  ;;  %v242_v55 = vld [vmem:[%s1181_s10 + $0x1b0] sm:$0xff] }
  0x33   : > { %531 = vmatmul.mubr.f32.gmra.mxu1 %v194_v7  ;;  %390 = vmatprep.mubr.f32.mxu0 %v197_v8  ;;  %v245_v56 = vld [vmem:[%s1181_s10 + $0x1c8] sm:$0xff]  ;;  %v247_v57 = vld [vmem:[%s1181_s10 + $0x1d8] sm:$0xff]  ;;  %v244_v58 = vld [vmem:[%s1181_s10 + $0x1c0] sm:$0xff] }
  0x34   : > { %535 = vmatprep.mubr.f32.mxu1 %v199_v9  ;;  %v246_v59 = vld [vmem:[%s1181_s10 + $0x1d0] sm:$0xff]  ;;  %v249_v60 = vld [vmem:[%s1181_s10 + $0x1e8] sm:$0xff]  ;;  %v251_v61 = vld [vmem:[%s1181_s10 + $0x1f8] sm:$0xff] }
  0x35   : > { %v248_v62 = vld [vmem:[%s1181_s10 + $0x1e0] sm:$0xff]  ;;  %v250_v63 = vld [vmem:[%s1181_s10 + $0x1f0] sm:$0xff] }
  0x36   : > { %391 = vmatmul.mubr.f32.gmra.mxu0 %v196_v10 }
  0x37   : > { %536 = vmatmul.mubr.f32.gmra.mxu1 %v198_v11  ;;  %395 = vmatprep.mubr.f32.mxu0 %v201_v12 }
  0x38   : > { %540 = vmatprep.mubr.f32.mxu1 %v203_v13 }
  0x3a   : > { %396 = vmatmul.mubr.f32.gmra.mxu0 %v200_v14 }
  0x3b   : > { %541 = vmatmul.mubr.f32.gmra.mxu1 %v202_v15  ;;  %400 = vmatprep.mubr.f32.mxu0 %v205_v16 }
  0x3c   : > { %545 = vmatprep.mubr.f32.mxu1 %v207_v17 }
  0x3e   : > { %401 = vmatmul.mubr.f32.gmra.mxu0 %v204_v18 }
  0x3f   : > { %546 = vmatmul.mubr.f32.gmra.mxu1 %v206_v19  ;;  %405 = vmatprep.mubr.f32.mxu0 %v209_v20 }
  0x40   : > { %550 = vmatprep.mubr.f32.mxu1 %v211_v21 }
  0x42   : > { %406 = vmatmul.mubr.f32.gmra.mxu0 %v208_v22 }
  0x43   : > { %551 = vmatmul.mubr.f32.gmra.mxu1 %v210_v23  ;;  %410 = vmatprep.mubr.f32.mxu0 %v213_v24 }
  0x44   : > { %555 = vmatprep.mubr.f32.mxu1 %v215_v25 }
  0x46   : > { %411 = vmatmul.mubr.f32.gmra.mxu0 %v212_v26 }
  0x47   : > { %556 = vmatmul.mubr.f32.gmra.mxu1 %v214_v27  ;;  %415 = vmatprep.mubr.f32.mxu0 %v217_v28 }
  0x48   : > { %560 = vmatprep.mubr.f32.mxu1 %v219_v29 }
  0x4a   : > { %416 = vmatmul.mubr.f32.gmra.mxu0 %v216_v30 }
  0x4b   : > { %561 = vmatmul.mubr.f32.gmra.mxu1 %v218_v31  ;;  %420 = vmatprep.mubr.f32.mxu0 %v221_v32 }
  0x4c   : > { %565 = vmatprep.mubr.f32.mxu1 %v223_v33 }
  0x4e   : > { %421 = vmatmul.mubr.f32.gmra.mxu0 %v220_v34 }
  0x4f   : > { %566 = vmatmul.mubr.f32.gmra.mxu1 %v222_v35  ;;  %425 = vmatprep.mubr.f32.mxu0 %v225_v36 }
  0x50   : > { %570 = vmatprep.mubr.f32.mxu1 %v227_v37 }
  0x52   : > { %426 = vmatmul.mubr.f32.gmra.mxu0 %v224_v38 }
  0x53   : > { %571 = vmatmul.mubr.f32.gmra.mxu1 %v226_v39  ;;  %430 = vmatprep.mubr.f32.mxu0 %v229_v40 }
  0x54   : > { %575 = vmatprep.mubr.f32.mxu1 %v231_v41 }
  0x56   : > { %431 = vmatmul.mubr.f32.gmra.mxu0 %v228_v42 }
  0x57   : > { %576 = vmatmul.mubr.f32.gmra.mxu1 %v230_v43  ;;  %435 = vmatprep.mubr.f32.mxu0 %v233_v44 }
  0x58   : > { %580 = vmatprep.mubr.f32.mxu1 %v235_v45 }
  0x5a   : > { %436 = vmatmul.mubr.f32.gmra.mxu0 %v232_v46 }
  0x5b   : > { %581 = vmatmul.mubr.f32.gmra.mxu1 %v234_v47  ;;  %440 = vmatprep.mubr.f32.mxu0 %v237_v48 }
  0x5c   : > { %585 = vmatprep.mubr.f32.mxu1 %v239_v49 }
  0x5e   : > { %441 = vmatmul.mubr.f32.gmra.mxu0 %v236_v50 }
  0x5f   : > { %586 = vmatmul.mubr.f32.gmra.mxu1 %v238_v51  ;;  %445 = vmatprep.mubr.f32.mxu0 %v241_v52 }
  0x60   : > { %590 = vmatprep.mubr.f32.mxu1 %v243_v53 }
  0x62   : > { %446 = vmatmul.mubr.f32.gmra.mxu0 %v240_v54 }
  0x63   : > { %591 = vmatmul.mubr.f32.gmra.mxu1 %v242_v55  ;;  %450 = vmatprep.mubr.f32.mxu0 %v245_v56 }
  0x64   : > { %595 = vmatprep.mubr.f32.mxu1 %v247_v57 }
  0x66   : > { %451 = vmatmul.mubr.f32.gmra.mxu0 %v244_v58 }
  0x67   : > { %596 = vmatmul.mubr.f32.gmra.mxu1 %v246_v59  ;;  %455 = vmatprep.mubr.f32.mxu0 %v249_v60 }
  0x68   : > { %600 = vmatprep.mubr.f32.mxu1 %v251_v61 }
  0x6a   : > { %456 = vmatmul.mubr.f32.gmra.mxu0 %v248_v62 }
  0x6b   : > { %601 = vmatmul.mubr.f32.gmra.mxu1 %v250_v63 }
  0xee   : > { %v816_v0 = vpop.f32.mrf.mxu0 }
  0xef   : > { %v896_v1 = vpop.f32.mrf.mxu1 }
  0xf0   : > { %v817_v2 = vpop.f32.mrf.mxu0 }
  0xf1   : > { %v897_v3 = vpop.f32.mrf.mxu1  ;;  %v818_v4 = vadd.f32 %v817_v2, %v816_v0 }
  0xf2   : > { %v898_v5 = vadd.f32 %v897_v3, %v896_v1  ;;  %v819_v6 = vpop.f32.mrf.mxu0 }
  0xf3   : > { %v899_v7 = vpop.f32.mrf.mxu1 }
  0xf4   : > { %v1271_v8 = vadd.f32 %v898_v5, %v818_v4  ;;  %v820_v9 = vpop.f32.mrf.mxu0 }
  0xf5   : > { %v900_v10 = vpop.f32.mrf.mxu1  ;;  %v821_v11 = vadd.f32 %v820_v9, %v819_v6 }
  0xf6   : > { %606 = vst [vmem:[%s1269_s29] sm:$0xff] %v1271_v8  ;;  %v901_v12 = vadd.f32 %v900_v10, %v899_v7  ;;  %v822_v13 = vpop.f32.mrf.mxu0  ;;  %v643_v2 = vmul.f32 %v1271_v8, %v1271_v8 }
  0xf7   : > { %v902_v14 = vpop.f32.mrf.mxu1 }
  0xf8   : > { %v533_v15 = vadd.f32 %v901_v12, %v821_v11  ;;  %v823_v16 = vpop.f32.mrf.mxu0 }
  0xf9   : > { %v903_v17 = vpop.f32.mrf.mxu1  ;;  %v824_v18 = vadd.f32 %v823_v16, %v822_v13 }
  0xfa   : > { %607 = vst [vmem:[%s1269_s29 + $0x8] sm:$0xff] %v533_v15  ;;  %v904_v19 = vadd.f32 %v903_v17, %v902_v14  ;;  %v825_v20 = vpop.f32.mrf.mxu0  ;;  %v644_v62 = vmul.f32 %v533_v15, %v533_v15  ;;  %v622_v6 = vadd.f32 %v533_v15, %v1271_v8 }
  0xfb   : > { %v905_v21 = vpop.f32.mrf.mxu1 }
  0xfc   : > { %v538_v22 = vadd.f32 %v904_v19, %v824_v18  ;;  %v826_v23 = vpop.f32.mrf.mxu0  ;;  %v659_v10 = vadd.f32 %v644_v62, %v643_v2 }
  0xfd   : > { %v906_v24 = vpop.f32.mrf.mxu1  ;;  %v827_v25 = vadd.f32 %v826_v23, %v825_v20 }
  0xfe   : > { %608 = vst [vmem:[%s1269_s29 + $0x10] sm:$0xff] %v538_v22  ;;  %v907_v26 = vadd.f32 %v906_v24, %v905_v21  ;;  %v828_v27 = vpop.f32.mrf.mxu0  ;;  %v645_v3 = vmul.f32 %v538_v22, %v538_v22  ;;  %v623_v14 = vadd.f32 %v622_v6, %v538_v22 }
  0xff   : > { %v908_v28 = vpop.f32.mrf.mxu1 }
 0x100   : > { %v543_v29 = vadd.f32 %v907_v26, %v827_v25  ;;  %v829_v30 = vpop.f32.mrf.mxu0  ;;  %v660_v17 = vadd.f32 %v659_v10, %v645_v3 }
 0x101   : > { %v909_v31 = vpop.f32.mrf.mxu1  ;;  %v830_v32 = vadd.f32 %v829_v30, %v828_v27 }
 0x102   : > { %609 = vst [vmem:[%s1269_s29 + $0x18] sm:$0xff] %v543_v29  ;;  %v910_v33 = vadd.f32 %v909_v31, %v908_v28  ;;  %v831_v34 = vpop.f32.mrf.mxu0  ;;  %v646_v11 = vmul.f32 %v543_v29, %v543_v29  ;;  %v624_v21 = vadd.f32 %v623_v14, %v543_v29 }
 0x103   : > { %v911_v35 = vpop.f32.mrf.mxu1 }
 0x104   : > { %v548_v36 = vadd.f32 %v910_v33, %v830_v32  ;;  %v832_v37 = vpop.f32.mrf.mxu0  ;;  %v661_v25 = vadd.f32 %v660_v17, %v646_v11 }
 0x105   : > { %v912_v38 = vpop.f32.mrf.mxu1  ;;  %v833_v39 = vadd.f32 %v832_v37, %v831_v34 }
 0x106   : > { %610 = vst [vmem:[%s1269_s29 + $0x20] sm:$0xff] %v548_v36  ;;  %v913_v40 = vadd.f32 %v912_v38, %v911_v35  ;;  %v834_v41 = vpop.f32.mrf.mxu0  ;;  %v647_v18 = vmul.f32 %v548_v36, %v548_v36  ;;  %v625_v27 = vadd.f32 %v624_v21, %v548_v36 }
 0x107   : > { %v914_v42 = vpop.f32.mrf.mxu1 }
 0x108   : > { %v553_v43 = vadd.f32 %v913_v40, %v833_v39  ;;  %v835_v44 = vpop.f32.mrf.mxu0  ;;  %v662_v30 = vadd.f32 %v661_v25, %v647_v18 }
 0x109   : > { %v915_v45 = vpop.f32.mrf.mxu1  ;;  %v836_v46 = vadd.f32 %v835_v44, %v834_v41 }
 0x10a   : > { %611 = vst [vmem:[%s1269_s29 + $0x28] sm:$0xff] %v553_v43  ;;  %v916_v47 = vadd.f32 %v915_v45, %v914_v42  ;;  %v837_v48 = vpop.f32.mrf.mxu0  ;;  %v648_v8 = vmul.f32 %v553_v43, %v553_v43  ;;  %v626_v33 = vadd.f32 %v625_v27, %v553_v43 }
 0x10b   : > { %v917_v49 = vpop.f32.mrf.mxu1 }
 0x10c   : > { %v558_v50 = vadd.f32 %v916_v47, %v836_v46  ;;  %v838_v51 = vpop.f32.mrf.mxu0  ;;  %v663_v37 = vadd.f32 %v662_v30, %v648_v8 }
 0x10d   : > { %v918_v52 = vpop.f32.mrf.mxu1  ;;  %v839_v53 = vadd.f32 %v838_v51, %v837_v48 }
 0x10e   : > { %612 = vst [vmem:[%s1269_s29 + $0x30] sm:$0xff] %v558_v50  ;;  %v919_v54 = vadd.f32 %v918_v52, %v917_v49  ;;  %v840_v55 = vpop.f32.mrf.mxu0  ;;  %v649_v31 = vmul.f32 %v558_v50, %v558_v50  ;;  %v627_v40 = vadd.f32 %v626_v33, %v558_v50 }
 0x10f   : > { %v920_v56 = vpop.f32.mrf.mxu1 }
 0x110   : > { %v563_v57 = vadd.f32 %v919_v54, %v839_v53  ;;  %v841_v58 = vpop.f32.mrf.mxu0  ;;  %v664_v42 = vadd.f32 %v663_v37, %v649_v31 }
 0x111   : > { %v921_v59 = vpop.f32.mrf.mxu1  ;;  %v842_v60 = vadd.f32 %v841_v58, %v840_v55 }
 0x112   : > { %613 = vst [vmem:[%s1269_s29 + $0x38] sm:$0xff] %v563_v57  ;;  %v922_v61 = vadd.f32 %v921_v59, %v920_v56  ;;  %v843_v63 = vpop.f32.mrf.mxu0  ;;  %v650_v29 = vmul.f32 %v563_v57, %v563_v57  ;;  %v628_v46 = vadd.f32 %v627_v40, %v563_v57 }
 0x113   : > { %v923_v0 = vpop.f32.mrf.mxu1 }
 0x114   : > { %v568_v1 = vadd.f32 %v922_v61, %v842_v60  ;;  %v844_v4 = vpop.f32.mrf.mxu0  ;;  %v665_v49 = vadd.f32 %v664_v42, %v650_v29 }
 0x115   : > { %v924_v5 = vpop.f32.mrf.mxu1  ;;  %v845_v7 = vadd.f32 %v844_v4, %v843_v63 }
 0x116   : > { %614 = vst [vmem:[%s1269_s29 + $0x40] sm:$0xff] %v568_v1  ;;  %v925_v9 = vadd.f32 %v924_v5, %v923_v0  ;;  %v846_v12 = vpop.f32.mrf.mxu0  ;;  %v651_v44 = vmul.f32 %v568_v1, %v568_v1  ;;  %v629_v53 = vadd.f32 %v628_v46, %v568_v1 }
 0x117   : > { %v926_v13 = vpop.f32.mrf.mxu1 }
 0x118   : > { %v573_v16 = vadd.f32 %v925_v9, %v845_v7  ;;  %v847_v19 = vpop.f32.mrf.mxu0  ;;  %v666_v55 = vadd.f32 %v665_v49, %v651_v44 }
 0x119   : > { %v927_v20 = vpop.f32.mrf.mxu1  ;;  %v848_v23 = vadd.f32 %v847_v19, %v846_v12 }
 0x11a   : > { %615 = vst [vmem:[%s1269_s29 + $0x48] sm:$0xff] %v573_v16  ;;  %v928_v24 = vadd.f32 %v927_v20, %v926_v13  ;;  %v849_v15 = vpop.f32.mrf.mxu0  ;;  %v652_v43 = vmul.f32 %v573_v16, %v573_v16  ;;  %v630_v59 = vadd.f32 %v629_v53, %v573_v16 }
 0x11b   : > { %v929_v26 = vpop.f32.mrf.mxu1 }
 0x11c   : > { %v578_v28 = vadd.f32 %v928_v24, %v848_v23  ;;  %v850_v32 = vpop.f32.mrf.mxu0  ;;  %v667_v62 = vadd.f32 %v666_v55, %v652_v43 }
 0x11d   : > { %v930_v22 = vpop.f32.mrf.mxu1  ;;  %v851_v34 = vadd.f32 %v850_v32, %v849_v15 }
 0x11e   : > { %616 = vst [vmem:[%s1269_s29 + $0x50] sm:$0xff] %v578_v28  ;;  %v931_v35 = vadd.f32 %v930_v22, %v929_v26  ;;  %v852_v38 = vpop.f32.mrf.mxu0  ;;  %v653_v56 = vmul.f32 %v578_v28, %v578_v28  ;;  %v631_v2 = vadd.f32 %v630_v59, %v578_v28 }
 0x11f   : > { %v932_v39 = vpop.f32.mrf.mxu1 }
 0x120   : > { %v583_v41 = vadd.f32 %v931_v35, %v851_v34  ;;  %v853_v45 = vpop.f32.mrf.mxu0  ;;  %v668_v4 = vadd.f32 %v667_v62, %v653_v56 }
 0x121   : > { %v933_v36 = vpop.f32.mrf.mxu1  ;;  %v854_v47 = vadd.f32 %v853_v45, %v852_v38 }
 0x122   : > { %617 = vst [vmem:[%s1269_s29 + $0x58] sm:$0xff] %v583_v41  ;;  %v934_v48 = vadd.f32 %v933_v36, %v932_v39  ;;  %v855_v51 = vpop.f32.mrf.mxu0  ;;  %v654_v57 = vmul.f32 %v583_v41, %v583_v41  ;;  %v632_v7 = vadd.f32 %v631_v2, %v583_v41 }
 0x123   : > { %v935_v52 = vpop.f32.mrf.mxu1 }
 0x124   : > { %v588_v54 = vadd.f32 %v934_v48, %v854_v47  ;;  %v856_v58 = vpop.f32.mrf.mxu0  ;;  %v669_v11 = vadd.f32 %v668_v4, %v654_v57 }
 0x125   : > { %v936_v50 = vpop.f32.mrf.mxu1  ;;  %v857_v60 = vadd.f32 %v856_v58, %v855_v51 }
 0x126   : > { %618 = vst [vmem:[%s1269_s29 + $0x60] sm:$0xff] %v588_v54  ;;  %v937_v61 = vadd.f32 %v936_v50, %v935_v52  ;;  %v858_v63 = vpop.f32.mrf.mxu0  ;;  %v655_v5 = vmul.f32 %v588_v54, %v588_v54  ;;  %v633_v14 = vadd.f32 %v632_v7, %v588_v54 }
 0x127   : > { %v938_v0 = vpop.f32.mrf.mxu1 }
 0x128   : > { %v593_v3 = vadd.f32 %v937_v61, %v857_v60  ;;  %v859_v6 = vpop.f32.mrf.mxu0  ;;  %v670_v18 = vadd.f32 %v669_v11, %v655_v5 }
 0x129   : > { %v939_v1 = vpop.f32.mrf.mxu1  ;;  %v860_v9 = vadd.f32 %v859_v6, %v858_v63 }
 0x12a   : > { %619 = vst [vmem:[%s1269_s29 + $0x68] sm:$0xff] %v593_v3  ;;  %v940_v10 = vadd.f32 %v939_v1, %v938_v0  ;;  %v861_v12 = vpop.f32.mrf.mxu0  ;;  %v656_v16 = vmul.f32 %v593_v3, %v593_v3  ;;  %v634_v21 = vadd.f32 %v633_v14, %v593_v3 }
 0x12b   : > { %v941_v13 = vpop.f32.mrf.mxu1 }
 0x12c   : > { %v598_v17 = vadd.f32 %v940_v10, %v860_v9  ;;  %v862_v19 = vpop.f32.mrf.mxu0  ;;  %v671_v8 = vadd.f32 %v670_v18, %v656_v16 }
 0x12d   : > { %v942_v20 = vpop.f32.mrf.mxu1  ;;  %v863_v24 = vadd.f32 %v862_v19, %v861_v12 }
 0x12e   : > { %620 = vst [vmem:[%s1269_s29 + $0x70] sm:$0xff] %v598_v17  ;;  %v657_v23 = vmul.f32 %v598_v17, %v598_v17  ;;  %v943_v25 = vadd.f32 %v942_v20, %v941_v13  ;;  %v635_v15 = vadd.f32 %v634_v21, %v598_v17 }
 0x130   : > { %v603_v26 = vadd.f32 %v943_v25, %v863_v24  ;;  %v672_v27 = vadd.f32 %v671_v8, %v657_v23 }
 0x132   : > { %621 = vst [vmem:[%s1269_s29 + $0x78] sm:$0xff] %v603_v26  ;;  %v636_v28 = vadd.f32 %v635_v15, %v603_v26  ;;  %v658_v30 = vmul.f32 %v603_v26, %v603_v26 }
 0x134   : > { %v637_v31 = vrot.slane %v636_v28, 4  ;;  %v673_v32 = vadd.f32 %v672_v27, %v658_v30 }
 0x136   : > { %v638_v22 = vadd.f32 %v637_v31, %v636_v28  ;;  %v674_v33 = vrot.slane %v673_v32, 4 }
 0x138   : > { %v639_v34 = vrot.slane %v638_v22, 2  ;;  %v675_v35 = vadd.f32 %v674_v33, %v673_v32 }
 0x13a   : > { %v640_v37 = vadd.f32 %v639_v34, %v638_v22  ;;  %v676_v29 = vrot.slane %v675_v35, 2 }
 0x13c   : > { %v641_v38 = vrot.slane %v640_v37, 1  ;;  %v677_v39 = vadd.f32 %v676_v29, %v675_v35 }
 0x13e   : > { %v678_v40 = vrot.slane %v677_v39, 1  ;;  %v642_v41 = vadd.f32 %v641_v38, %v640_v37 }
 0x140   : > { %v679_v42 = vadd.f32 %v678_v40, %v677_v39 }
 0x142   : > { %v681_v44 = vsel %vm680_vm0, %v642_v41, %v679_v42 }
 0x143   : > { %682 = vst [vmem:[%s187_s5] sm:$0x3] %v681_v44 }
 0x144 PF: > { %s14_s12 = sadd.s32 1, %s958_s12  }
 0x145   : > { %p11_p5 = scmp.ge.s32.totalorder %s14_s12, 6  }
 0x147   :  { %13 = sbr.rel (!%p11_p5) target bundleno = 1 (0x1), region = 70 }

// kernel: bottleneck_forward.6
= control target key start
LH: loop header
LB: loop body
LE: loop exit
PB: predicated region body
PF: predicated region fallthrough
CT: control target
= control target key end

     0   :  { %s1190_s18 = smov 0   ;;  %s1677_s0 = inlined_call_operand.vmem [shape: f32[512,128], index: 0, kind: input, shape index: {}]   ;;  %s1678_s1 = inlined_call_operand.vmem [shape: f32[1,128], index: 1, kind: input, shape index: {}]   ;;  %s1679_s2 = inlined_call_operand.vmem [shape: f32[1,128], index: 2, kind: input, shape index: {}]   ;;  %s1680_s3 = inlined_call_operand.vmem [shape: f32[128,512], index: 3, kind: input, shape index: {}]   ;;  %s1681_s4 = inlined_call_operand.vmem [shape: f32[512,512], index: 4, kind: output, shape index: {0}]   ;;  %s1682_s5 = inlined_call_operand.vmem [shape: f32[4,2,512], index: 5, kind: output, shape index: {1}]  }
   0x1 LB: > { %s1196_s19 = sadd.s32 4294967295, %s1156_s18   ;;  %p1126_p0 = scmp.ge.s32.totalorder %s1156_s18, 1  ;;  %s1156_s18 = sphi %s1190_s18, %s16_s18  }
   0x2   : > { %p191_p1 = scmp.lt.s32.totalorder %s1156_s18, 5 }
   0x4   : > { %p192_p2 = pnand %p1126_p0, %p191_p1 }
   0x5   : > { %s1127_s25 = sshll.u32 (!%p192_p2), %s1196_s19, 4  ;;  %p238_p4 = scmp.lt.s32.totalorder (!%p192_p2), %s1196_s19, 3 }
   0x6   : > { %195 = sbr.rel (%p192_p2) target bundleno = 325 (0x145), region = 36  ;;  %p1263_p3 = scmp.lt.s32.totalorder (!%p192_p2), %s1127_s25, 63 }
   0xb   : > { %v382_v0 = vld [vmem:[%s1680_s3 + $0x1e8] sm:$0xff]  ;;  %v384_v1 = vld [vmem:[%s1680_s3 + $0x1f8] sm:$0xff]  ;;  %v381_v2 = vld [vmem:[%s1680_s3 + $0x1e0] sm:$0xff]  ;;  %s1685_s25 = smov (!%p1263_p3, %s1127_s25), 63  ;;  %vm1003_vm0 = vcmask 1040384   ;;  %s1687_s19 = smov (!%p238_p4, %s1196_s19), 3 }
   0xc   : > { %385 = vmatprep.subr.mxu0 %v382_v0  ;;  %546 = vmatprep.subr.mxu1 %v384_v1  ;;  %v383_v3 = vld [vmem:[%s1680_s3 + $0x1f0] sm:$0xff]  ;;  %v378_v4 = vld [vmem:[%s1680_s3 + $0x1c8] sm:$0xff]  ;;  %v380_v5 = vld [vmem:[%s1680_s3 + $0x1d8] sm:$0xff]  ;;  %s1128_s27 = sshll.u32 %s1685_s25, 3 }
   0xd   : > { %386 = vmatpush1.msra.mxu0 %v381_v2  ;;  %547 = vmatpush1.msra.mxu1 %v383_v3  ;;  %v377_v6 = vld [vmem:[%s1680_s3 + $0x1c0] sm:$0xff]  ;;  %v379_v7 = vld [vmem:[%s1680_s3 + $0x1d0] sm:$0xff]  ;;  %v374_v8 = vld [vmem:[%s1680_s3 + $0x1a8] sm:$0xff]  ;;  %s1343_s17 = scalar_lea.vmem %s1677_s0, %s1128_s27 }
   0xe   : > { %387 = vmatprep.subr.mxu0 %v378_v4  ;;  %548 = vmatprep.subr.mxu1 %v380_v5  ;;  %v376_v9 = vld [vmem:[%s1680_s3 + $0x1b8] sm:$0xff]  ;;  %v373_v10 = vld [vmem:[%s1680_s3 + $0x1a0] sm:$0xff]  ;;  %v375_v11 = vld [vmem:[%s1680_s3 + $0x1b0] sm:$0xff] }
   0xf   : > { %388 = vmatpush1.msra.mxu0 %v377_v6  ;;  %549 = vmatpush1.msra.mxu1 %v379_v7  ;;  %v370_v12 = vld [vmem:[%s1680_s3 + $0x188] sm:$0xff]  ;;  %v372_v13 = vld [vmem:[%s1680_s3 + $0x198] sm:$0xff]  ;;  %v369_v14 = vld [vmem:[%s1680_s3 + $0x180] sm:$0xff] }
  0x10   : > { %389 = vmatprep.subr.mxu0 %v374_v8  ;;  %550 = vmatprep.subr.mxu1 %v376_v9  ;;  %v371_v15 = vld [vmem:[%s1680_s3 + $0x190] sm:$0xff]  ;;  %v366_v16 = vld [vmem:[%s1680_s3 + $0x168] sm:$0xff]  ;;  %v368_v17 = vld [vmem:[%s1680_s3 + $0x178] sm:$0xff] }
  0x11   : > { %390 = vmatpush1.msra.mxu0 %v373_v10  ;;  %551 = vmatpush1.msra.mxu1 %v375_v11  ;;  %v365_v18 = vld [vmem:[%s1680_s3 + $0x160] sm:$0xff]  ;;  %v367_v19 = vld [vmem:[%s1680_s3 + $0x170] sm:$0xff]  ;;  %v362_v20 = vld [vmem:[%s1680_s3 + $0x148] sm:$0xff] }
  0x12   : > { %391 = vmatprep.subr.mxu0 %v370_v12  ;;  %552 = vmatprep.subr.mxu1 %v372_v13  ;;  %v364_v21 = vld [vmem:[%s1680_s3 + $0x158] sm:$0xff]  ;;  %v361_v22 = vld [vmem:[%s1680_s3 + $0x140] sm:$0xff]  ;;  %v363_v23 = vld [vmem:[%s1680_s3 + $0x150] sm:$0xff]  ;;  %v1158_v12 = vmov 0.0  }
  0x13   : > { %392 = vmatpush1.msra.mxu0 %v369_v14  ;;  %553 = vmatpush1.msra.mxu1 %v371_v15  ;;  %v358_v24 = vld [vmem:[%s1680_s3 + $0x128] sm:$0xff]  ;;  %v360_v25 = vld [vmem:[%s1680_s3 + $0x138] sm:$0xff]  ;;  %v357_v26 = vld [vmem:[%s1680_s3 + $0x120] sm:$0xff] }
  0x14   : > { %393 = vmatprep.subr.mxu0 %v366_v16  ;;  %554 = vmatprep.subr.mxu1 %v368_v17  ;;  %v359_v27 = vld [vmem:[%s1680_s3 + $0x130] sm:$0xff]  ;;  %v354_v28 = vld [vmem:[%s1680_s3 + $0x108] sm:$0xff]  ;;  %v356_v29 = vld [vmem:[%s1680_s3 + $0x118] sm:$0xff] }
  0x15   : > { %394 = vmatpush1.msra.mxu0 %v365_v18  ;;  %555 = vmatpush1.msra.mxu1 %v367_v19  ;;  %v353_v30 = vld [vmem:[%s1680_s3 + $0x100] sm:$0xff]  ;;  %v355_v31 = vld [vmem:[%s1680_s3 + $0x110] sm:$0xff]  ;;  %v350_v32 = vld [vmem:[%s1680_s3 + $0xe8] sm:$0xff] }
  0x16   : > { %395 = vmatprep.subr.mxu0 %v362_v20  ;;  %556 = vmatprep.subr.mxu1 %v364_v21  ;;  %v352_v33 = vld [vmem:[%s1680_s3 + $0xf8] sm:$0xff]  ;;  %v349_v34 = vld [vmem:[%s1680_s3 + $0xe0] sm:$0xff]  ;;  %v351_v35 = vld [vmem:[%s1680_s3 + $0xf0] sm:$0xff] }
  0x17   : > { %396 = vmatpush1.msra.mxu0 %v361_v22  ;;  %557 = vmatpush1.msra.mxu1 %v363_v23  ;;  %v346_v36 = vld [vmem:[%s1680_s3 + $0xc8] sm:$0xff]  ;;  %v348_v37 = vld [vmem:[%s1680_s3 + $0xd8] sm:$0xff]  ;;  %v345_v38 = vld [vmem:[%s1680_s3 + $0xc0] sm:$0xff] }
  0x18   : > { %397 = vmatprep.subr.mxu0 %v358_v24  ;;  %558 = vmatprep.subr.mxu1 %v360_v25  ;;  %v347_v39 = vld [vmem:[%s1680_s3 + $0xd0] sm:$0xff]  ;;  %v342_v40 = vld [vmem:[%s1680_s3 + $0xa8] sm:$0xff]  ;;  %v344_v41 = vld [vmem:[%s1680_s3 + $0xb8] sm:$0xff] }
  0x19   : > { %398 = vmatpush1.msra.mxu0 %v357_v26  ;;  %559 = vmatpush1.msra.mxu1 %v359_v27  ;;  %v341_v42 = vld [vmem:[%s1680_s3 + $0xa0] sm:$0xff]  ;;  %v343_v43 = vld [vmem:[%s1680_s3 + $0xb0] sm:$0xff]  ;;  %v338_v44 = vld [vmem:[%s1680_s3 + $0x88] sm:$0xff] }
  0x1a   : > { %399 = vmatprep.subr.mxu0 %v354_v28  ;;  %560 = vmatprep.subr.mxu1 %v356_v29  ;;  %v340_v45 = vld [vmem:[%s1680_s3 + $0x98] sm:$0xff]  ;;  %v337_v46 = vld [vmem:[%s1680_s3 + $0x80] sm:$0xff]  ;;  %v339_v47 = vld [vmem:[%s1680_s3 + $0x90] sm:$0xff] }
  0x1b   : > { %400 = vmatpush1.msra.mxu0 %v353_v30  ;;  %561 = vmatpush1.msra.mxu1 %v355_v31  ;;  %v243_v48 = vld [vmem:[%s1343_s17] sm:$0xff]  ;;  %v334_v50 = vld [vmem:[%s1680_s3 + $0x68] sm:$0xff]  ;;  %v336_v51 = vld [vmem:[%s1680_s3 + $0x78] sm:$0xff] }
  0x1c   : > { %401 = vmatprep.subr.mxu0 %v350_v32  ;;  %562 = vmatprep.subr.mxu1 %v352_v33  ;;  %v1367_v49 = vld [vmem:[%s1678_s1] ss:$0 sm:$0xff]  ;;  %v335_v54 = vld [vmem:[%s1680_s3 + $0x70] sm:$0xff]  ;;  %v244_v56 = vld [vmem:[%s1343_s17 + $0x8] sm:$0xff] }
  0x1d   : > { %402 = vmatpush1.msra.mxu0 %v349_v34  ;;  %563 = vmatpush1.msra.mxu1 %v351_v35  ;;  %v333_v52 = vld [vmem:[%s1680_s3 + $0x60] sm:$0xff]  ;;  %v266_v53 = vmul.f32 %v1367_v49, %v243_v48  ;;  %v330_v57 = vld [vmem:[%s1680_s3 + $0x48] sm:$0xff]  ;;  %v332_v58 = vld [vmem:[%s1680_s3 + $0x58] sm:$0xff]  ;;  %v267_v0 = vmul.f32 %v1367_v49, %v244_v56 }
  0x1e   : > { %403 = vmatprep.subr.mxu0 %v346_v36  ;;  %564 = vmatprep.subr.mxu1 %v348_v37  ;;  %v1385_v55 = vld [vmem:[%s1679_s2] ss:$0 sm:$0xff]  ;;  %v331_v60 = vld [vmem:[%s1680_s3 + $0x50] sm:$0xff]  ;;  %v326_v61 = vld [vmem:[%s1680_s3 + $0x28] sm:$0xff] }
  0x1f   : > { %404 = vmatpush1.msra.mxu0 %v345_v38  ;;  %565 = vmatpush1.msra.mxu1 %v347_v39  ;;  %v329_v59 = vld [vmem:[%s1680_s3 + $0x40] sm:$0xff]  ;;  %v328_v62 = vld [vmem:[%s1680_s3 + $0x38] sm:$0xff]  ;;  %v289_v63 = vadd.f32 %v1385_v55, %v266_v53  ;;  %v327_v2 = vld [vmem:[%s1680_s3 + $0x30] sm:$0xff]  ;;  %v290_v9 = vadd.f32 %v1385_v55, %v267_v0 }
  0x20   : > { %405 = vmatprep.subr.mxu0 %v342_v40  ;;  %566 = vmatprep.subr.mxu1 %v344_v41  ;;  %v325_v1 = vld [vmem:[%s1680_s3 + $0x20] sm:$0xff]  ;;  %v245_v3 = vld [vmem:[%s1343_s17 + $0x10] sm:$0xff]  ;;  %v322_v4 = vld [vmem:[%s1680_s3 + $0x8] sm:$0xff] }
  0x21   : > { %406 = vmatpush1.msra.mxu0 %v341_v42  ;;  %567 = vmatpush1.msra.mxu1 %v343_v43  ;;  %v324_v5 = vld [vmem:[%s1680_s3 + $0x18] sm:$0xff]  ;;  %v321_v6 = vld [vmem:[%s1680_s3] sm:$0xff]  ;;  %v323_v7 = vld [vmem:[%s1680_s3 + $0x10] sm:$0xff]  ;;  %v305_v8 = vmax.f32 %v289_v63, 0.0  ;;  %v268_v10 = vmul.f32 %v1367_v49, %v245_v3  ;;  %v306_v13 = vmax.f32 %v290_v9, 0.0 }
  0x22   : > { %407 = vmatprep.subr.mxu0 %v338_v44  ;;  %568 = vmatprep.subr.mxu1 %v340_v45  ;;  %v246_v11 = vld [vmem:[%s1343_s17 + $0x18] sm:$0xff]  ;;  %v247_v16 = vld [vmem:[%s1343_s17 + $0x20] sm:$0xff]  ;;  %v248_v20 = vld [vmem:[%s1343_s17 + $0x28] sm:$0xff] }
  0x23   : > { %408 = vmatpush1.msra.mxu0 %v337_v46  ;;  %569 = vmatpush1.msra.mxu1 %v339_v47  ;;  %v291_v14 = vadd.f32 %v1385_v55, %v268_v10  ;;  %v269_v15 = vmul.f32 %v1367_v49, %v246_v11  ;;  %v270_v19 = vmul.f32 %v1367_v49, %v247_v16  ;;  %v249_v24 = vld [vmem:[%s1343_s17 + $0x30] sm:$0xff]  ;;  %v250_v28 = vld [vmem:[%s1343_s17 + $0x38] sm:$0xff]  ;;  %v251_v32 = vld [vmem:[%s1343_s17 + $0x40] sm:$0xff] }
  0x24   : > { %409 = vmatprep.subr.mxu0 %v334_v50  ;;  %570 = vmatprep.subr.mxu1 %v336_v51  ;;  %v271_v23 = vmul.f32 %v1367_v49, %v248_v20  ;;  %v272_v27 = vmul.f32 %v1367_v49, %v249_v24  ;;  %v273_v31 = vmul.f32 %v1367_v49, %v250_v28  ;;  %v252_v36 = vld [vmem:[%s1343_s17 + $0x48] sm:$0xff]  ;;  %v253_v40 = vld [vmem:[%s1343_s17 + $0x50] sm:$0xff]  ;;  %v254_v44 = vld [vmem:[%s1343_s17 + $0x58] sm:$0xff] }
  0x25   : > { %410 = vmatpush1.msra.mxu0 %v333_v52  ;;  %571 = vmatpush1.msra.mxu1 %v335_v54  ;;  %v307_v17 = vmax.f32 %v291_v14, 0.0  ;;  %v292_v18 = vadd.f32 %v1385_v55, %v269_v15  ;;  %v293_v22 = vadd.f32 %v1385_v55, %v270_v19  ;;  %v274_v35 = vmul.f32 %v1367_v49, %v251_v32  ;;  %v255_v48 = vld [vmem:[%s1343_s17 + $0x60] sm:$0xff]  ;;  %v256_v53 = vld [vmem:[%s1343_s17 + $0x68] sm:$0xff] }
  0x26   : > { %411 = vmatprep.subr.mxu0 %v330_v57  ;;  %572 = vmatprep.subr.mxu1 %v332_v58  ;;  %v294_v26 = vadd.f32 %v1385_v55, %v271_v23  ;;  %v295_v30 = vadd.f32 %v1385_v55, %v272_v27  ;;  %v296_v34 = vadd.f32 %v1385_v55, %v273_v31  ;;  %v257_v58 = vld [vmem:[%s1343_s17 + $0x70] sm:$0xff] }
  0x27   : > { %412 = vmatpush1.msra.mxu0 %v329_v59  ;;  %573 = vmatpush1.msra.mxu1 %v331_v60  ;;  %v308_v21 = vmax.f32 %v292_v18, 0.0  ;;  %v309_v25 = vmax.f32 %v293_v22, 0.0  ;;  %v297_v38 = vadd.f32 %v1385_v55, %v274_v35  ;;  %v275_v39 = vmul.f32 %v1367_v49, %v252_v36 }
  0x28   : > { %413 = vmatprep.subr.mxu0 %v326_v61  ;;  %574 = vmatprep.subr.mxu1 %v328_v62  ;;  %v310_v29 = vmax.f32 %v294_v26, 0.0  ;;  %v311_v33 = vmax.f32 %v295_v30, 0.0  ;;  %v312_v37 = vmax.f32 %v296_v34, 0.0  ;;  %v276_v43 = vmul.f32 %v1367_v49, %v253_v40  ;;  %v258_v62 = vld [vmem:[%s1343_s17 + $0x78] sm:$0xff]  ;;  %s1138_s17 = sshll.u32 %s1685_s25, 5  ;;  %s1139_s25 = sshll.u32 %s1687_s19, 3 }
  0x29   : > { %414 = vmatpush1.msra.mxu0 %v325_v1  ;;  %575 = vmatpush1.msra.mxu1 %v327_v2  ;;  %v313_v41 = vmax.f32 %v297_v38, 0.0  ;;  %v298_v42 = vadd.f32 %v1385_v55, %v275_v39  ;;  %v277_v47 = vmul.f32 %v1367_v49, %v254_v44  ;;  %v278_v52 = vmul.f32 %v1367_v49, %v255_v48  ;;  %s1505_s29 = scalar_lea.vmem %s1681_s4, %s1138_s17  ;;  %s242_s7 = scalar_lea.vmem %s1682_s5, %s1139_s25 }
  0x2a   : > { %415 = vmatprep.subr.mxu0 %v322_v4  ;;  %576 = vmatprep.subr.mxu1 %v324_v5  ;;  %v299_v46 = vadd.f32 %v1385_v55, %v276_v43  ;;  %v279_v57 = vmul.f32 %v1367_v49, %v256_v53  ;;  %v280_v61 = vmul.f32 %v1367_v49, %v257_v58 }
  0x2b   : > { %416 = vmatpush1.msra.mxu0 %v321_v6  ;;  %449 = vmatprep.mubr.f32.mxu0 %v1158_v12  ;;  %v314_v45 = vmax.f32 %v298_v42, 0.0  ;;  %v300_v51 = vadd.f32 %v1385_v55, %v277_v47  ;;  %v301_v56 = vadd.f32 %v1385_v55, %v278_v52  ;;  %v281_v1 = vmul.f32 %v1367_v49, %v258_v62 }
  0x2c   : > { %577 = vmatpush1.msra.mxu1 %v323_v7  ;;  %610 = vmatprep.mubr.f32.mxu1 %v1158_v12  ;;  %v315_v50 = vmax.f32 %v299_v46, 0.0  ;;  %v302_v60 = vadd.f32 %v1385_v55, %v279_v57  ;;  %v303_v0 = vadd.f32 %v1385_v55, %v280_v61 }
  0x2d   : > { %450 = vmatmul.mubr.f32.vlgmr.msra.gmra.mxu0 %v305_v8  ;;  %611 = vmatmul.mubr.f32.vlgmr.msra.gmra.mxu1 %v305_v8  ;;  %v316_v54 = vmax.f32 %v300_v51, 0.0  ;;  %v317_v59 = vmax.f32 %v301_v56, 0.0  ;;  %v304_v3 = vadd.f32 %v1385_v55, %v281_v1 }
  0x2e   : > { %455 = vmatprep.mubr.f32.mxu0 %v1158_v12  ;;  %616 = vmatprep.mubr.f32.mxu1 %v1158_v12  ;;  %v318_v63 = vmax.f32 %v302_v60, 0.0  ;;  %v319_v2 = vmax.f32 %v303_v0, 0.0 }
  0x2f   : > { %v320_v4 = vmax.f32 %v304_v3, 0.0 }
  0x31   : > { %456 = vmatmul.mubr.f32.gmra.mxu0 %v306_v13  ;;  %617 = vmatmul.mubr.f32.gmra.mxu1 %v306_v13 }
  0x32   : > { %461 = vmatprep.mubr.f32.mxu0 %v1158_v12  ;;  %622 = vmatprep.mubr.f32.mxu1 %v1158_v12 }
  0x35   : > { %462 = vmatmul.mubr.f32.gmra.mxu0 %v307_v17  ;;  %623 = vmatmul.mubr.f32.gmra.mxu1 %v307_v17 }
  0x36   : > { %467 = vmatprep.mubr.f32.mxu0 %v1158_v12  ;;  %628 = vmatprep.mubr.f32.mxu1 %v1158_v12 }
  0x39   : > { %468 = vmatmul.mubr.f32.gmra.mxu0 %v308_v21  ;;  %629 = vmatmul.mubr.f32.gmra.mxu1 %v308_v21 }
  0x3a   : > { %473 = vmatprep.mubr.f32.mxu0 %v1158_v12  ;;  %634 = vmatprep.mubr.f32.mxu1 %v1158_v12 }
  0x3d   : > { %474 = vmatmul.mubr.f32.gmra.mxu0 %v309_v25  ;;  %635 = vmatmul.mubr.f32.gmra.mxu1 %v309_v25 }
  0x3e   : > { %479 = vmatprep.mubr.f32.mxu0 %v1158_v12  ;;  %640 = vmatprep.mubr.f32.mxu1 %v1158_v12 }
  0x41   : > { %480 = vmatmul.mubr.f32.gmra.mxu0 %v310_v29  ;;  %641 = vmatmul.mubr.f32.gmra.mxu1 %v310_v29 }
  0x42   : > { %485 = vmatprep.mubr.f32.mxu0 %v1158_v12  ;;  %646 = vmatprep.mubr.f32.mxu1 %v1158_v12 }
  0x45   : > { %486 = vmatmul.mubr.f32.gmra.mxu0 %v311_v33  ;;  %647 = vmatmul.mubr.f32.gmra.mxu1 %v311_v33 }
  0x46   : > { %491 = vmatprep.mubr.f32.mxu0 %v1158_v12  ;;  %652 = vmatprep.mubr.f32.mxu1 %v1158_v12 }
  0x49   : > { %492 = vmatmul.mubr.f32.gmra.mxu0 %v312_v37  ;;  %653 = vmatmul.mubr.f32.gmra.mxu1 %v312_v37 }
  0x4a   : > { %497 = vmatprep.mubr.f32.mxu0 %v1158_v12  ;;  %658 = vmatprep.mubr.f32.mxu1 %v1158_v12 }
  0x4d   : > { %498 = vmatmul.mubr.f32.gmra.mxu0 %v313_v41  ;;  %659 = vmatmul.mubr.f32.gmra.mxu1 %v313_v41 }
  0x4e   : > { %503 = vmatprep.mubr.f32.mxu0 %v1158_v12  ;;  %664 = vmatprep.mubr.f32.mxu1 %v1158_v12 }
  0x51   : > { %504 = vmatmul.mubr.f32.gmra.mxu0 %v314_v45  ;;  %665 = vmatmul.mubr.f32.gmra.mxu1 %v314_v45 }
  0x52   : > { %509 = vmatprep.mubr.f32.mxu0 %v1158_v12  ;;  %670 = vmatprep.mubr.f32.mxu1 %v1158_v12 }
  0x55   : > { %510 = vmatmul.mubr.f32.gmra.mxu0 %v315_v50  ;;  %671 = vmatmul.mubr.f32.gmra.mxu1 %v315_v50 }
  0x56   : > { %515 = vmatprep.mubr.f32.mxu0 %v1158_v12  ;;  %676 = vmatprep.mubr.f32.mxu1 %v1158_v12 }
  0x59   : > { %516 = vmatmul.mubr.f32.gmra.mxu0 %v316_v54  ;;  %677 = vmatmul.mubr.f32.gmra.mxu1 %v316_v54 }
  0x5a   : > { %521 = vmatprep.mubr.f32.mxu0 %v1158_v12  ;;  %682 = vmatprep.mubr.f32.mxu1 %v1158_v12 }
  0x5d   : > { %522 = vmatmul.mubr.f32.gmra.mxu0 %v317_v59  ;;  %683 = vmatmul.mubr.f32.gmra.mxu1 %v317_v59 }
  0x5e   : > { %527 = vmatprep.mubr.f32.mxu0 %v1158_v12  ;;  %688 = vmatprep.mubr.f32.mxu1 %v1158_v12 }
  0x61   : > { %528 = vmatmul.mubr.f32.gmra.mxu0 %v318_v63  ;;  %689 = vmatmul.mubr.f32.gmra.mxu1 %v318_v63 }
  0x62   : > { %533 = vmatprep.mubr.f32.mxu0 %v1158_v12  ;;  %694 = vmatprep.mubr.f32.mxu1 %v1158_v12 }
  0x65   : > { %534 = vmatmul.mubr.f32.gmra.mxu0 %v319_v2  ;;  %695 = vmatmul.mubr.f32.gmra.mxu1 %v319_v2 }
  0x66   : > { %539 = vmatprep.mubr.f32.mxu0 %v1158_v12  ;;  %700 = vmatprep.mubr.f32.mxu1 %v1158_v12 }
  0x69   : > { %540 = vmatmul.mubr.f32.gmra.mxu0 %v320_v4  ;;  %701 = vmatmul.mubr.f32.gmra.mxu1 %v320_v4 }
  0xed   : > { %v451_v49 = vpop.f32.mrf.mxu0  ;;  %v612_v55 = vpop.f32.mrf.mxu1 }
  0xee   : > { %707 = vst [vmem:[%s1505_s29] sm:$0xff] %v451_v49  ;;  %709 = vst [vmem:[%s1505_s29 + $0x10] sm:$0xff] %v612_v55  ;;  %v855_v25 = vmul.f32 %v451_v49, %v451_v49  ;;  %v857_v27 = vmul.f32 %v612_v55, %v612_v55 }
  0xef   : > { %v453_v5 = vpop.f32.mrf.mxu0  ;;  %v614_v6 = vpop.f32.mrf.mxu1 }
  0xf0   : > { %708 = vst [vmem:[%s1505_s29 + $0x8] sm:$0xff] %v453_v5  ;;  %710 = vst [vmem:[%s1505_s29 + $0x18] sm:$0xff] %v614_v6  ;;  %v856_v28 = vmul.f32 %v453_v5, %v453_v5  ;;  %v858_v33 = vmul.f32 %v614_v6, %v614_v6 }
  0xf1   : > { %v457_v7 = vpop.f32.mrf.mxu0  ;;  %v618_v8 = vpop.f32.mrf.mxu1 }
  0xf2   : > { %711 = vst [vmem:[%s1505_s29 + $0x20] sm:$0xff] %v457_v7  ;;  %713 = vst [vmem:[%s1505_s29 + $0x30] sm:$0xff] %v618_v8  ;;  %v859_v21 = vmul.f32 %v457_v7, %v457_v7  ;;  %v861_v22 = vmul.f32 %v618_v8, %v618_v8  ;;  %v771_v34 = vadd.f32 %v457_v7, %v451_v49 }
  0xf3   : > { %v459_v9 = vpop.f32.mrf.mxu0  ;;  %v620_v10 = vpop.f32.mrf.mxu1  ;;  %v813_v36 = vadd.f32 %v618_v8, %v612_v55 }
  0xf4   : > { %712 = vst [vmem:[%s1505_s29 + $0x28] sm:$0xff] %v459_v9  ;;  %714 = vst [vmem:[%s1505_s29 + $0x38] sm:$0xff] %v620_v10  ;;  %v860_v26 = vmul.f32 %v459_v9, %v459_v9  ;;  %v862_v29 = vmul.f32 %v620_v10, %v620_v10  ;;  %v919_v35 = vadd.f32 %v859_v21, %v855_v25 }
  0xf5   : > { %v463_v11 = vpop.f32.mrf.mxu0  ;;  %v624_v12 = vpop.f32.mrf.mxu1  ;;  %v961_v37 = vadd.f32 %v861_v22, %v857_v27  ;;  %v792_v38 = vadd.f32 %v459_v9, %v453_v5  ;;  %v834_v44 = vadd.f32 %v620_v10, %v614_v6 }
  0xf6   : > { %715 = vst [vmem:[%s1505_s29 + $0x40] sm:$0xff] %v463_v11  ;;  %717 = vst [vmem:[%s1505_s29 + $0x50] sm:$0xff] %v624_v12  ;;  %v863_v30 = vmul.f32 %v463_v11, %v463_v11  ;;  %v865_v39 = vmul.f32 %v624_v12, %v624_v12  ;;  %v940_v43 = vadd.f32 %v860_v26, %v856_v28 }
  0xf7   : > { %v465_v13 = vpop.f32.mrf.mxu0  ;;  %v626_v14 = vpop.f32.mrf.mxu1  ;;  %v982_v47 = vadd.f32 %v862_v29, %v858_v33  ;;  %v772_v48 = vadd.f32 %v771_v34, %v463_v11  ;;  %v814_v51 = vadd.f32 %v813_v36, %v624_v12 }
  0xf8   : > { %716 = vst [vmem:[%s1505_s29 + $0x48] sm:$0xff] %v465_v13  ;;  %718 = vst [vmem:[%s1505_s29 + $0x58] sm:$0xff] %v626_v14  ;;  %v864_v40 = vmul.f32 %v465_v13, %v465_v13  ;;  %v866_v45 = vmul.f32 %v626_v14, %v626_v14  ;;  %v920_v50 = vadd.f32 %v919_v35, %v863_v30 }
  0xf9   : > { %v1519_v15 = vpop.f32.mrf.mxu0  ;;  %v1521_v16 = vpop.f32.mrf.mxu1  ;;  %v793_v54 = vadd.f32 %v792_v38, %v465_v13  ;;  %v835_v56 = vadd.f32 %v834_v44, %v626_v14  ;;  %v962_v59 = vadd.f32 %v961_v37, %v865_v39 }
  0xfa   : > { %719 = vst [vmem:[%s1505_s29 + $0x60] sm:$0xff] %v1519_v15  ;;  %721 = vst [vmem:[%s1505_s29 + $0x70] sm:$0xff] %v1521_v16  ;;  %v867_v46 = vmul.f32 %v1519_v15, %v1519_v15  ;;  %v869_v57 = vmul.f32 %v1521_v16, %v1521_v16  ;;  %v941_v60 = vadd.f32 %v940_v43, %v864_v40 }
  0xfb   : > { %v1527_v17 = vpop.f32.mrf.mxu0  ;;  %v1529_v18 = vpop.f32.mrf.mxu1  ;;  %v983_v1 = vadd.f32 %v982_v47, %v866_v45  ;;  %v773_v2 = vadd.f32 %v772_v48, %v1519_v15  ;;  %v815_v4 = vadd.f32 %v814_v51, %v1521_v16 }
  0xfc   : > { %720 = vst [vmem:[%s1505_s29 + $0x68] sm:$0xff] %v1527_v17  ;;  %722 = vst [vmem:[%s1505_s29 + $0x78] sm:$0xff] %v1529_v18  ;;  %v868_v58 = vmul.f32 %v1527_v17, %v1527_v17  ;;  %v870_v61 = vmul.f32 %v1529_v18, %v1529_v18  ;;  %v921_v3 = vadd.f32 %v920_v50, %v867_v46 }
  0xfd   : > { %v1535_v19 = vpop.f32.mrf.mxu0  ;;  %v1537_v20 = vpop.f32.mrf.mxu1  ;;  %v794_v49 = vadd.f32 %v793_v54, %v1527_v17  ;;  %v836_v55 = vadd.f32 %v835_v56, %v1529_v18  ;;  %v963_v9 = vadd.f32 %v962_v59, %v869_v57 }
  0xfe   : > { %723 = vst [vmem:[%s1505_s29 + $0x80] sm:$0xff] %v1535_v19  ;;  %725 = vst [vmem:[%s1505_s29 + $0x90] sm:$0xff] %v1537_v20  ;;  %v871_v62 = vmul.f32 %v1535_v19, %v1535_v19  ;;  %v873_v5 = vmul.f32 %v1537_v20, %v1537_v20  ;;  %v942_v10 = vadd.f32 %v941_v60, %v868_v58 }
  0xff   : > { %v1543_v23 = vpop.f32.mrf.mxu0  ;;  %v1545_v24 = vpop.f32.mrf.mxu1  ;;  %v984_v13 = vadd.f32 %v983_v1, %v870_v61  ;;  %v774_v14 = vadd.f32 %v773_v2, %v1535_v19  ;;  %v816_v16 = vadd.f32 %v815_v4, %v1537_v20 }
 0x100   : > { %724 = vst [vmem:[%s1505_s29 + $0x88] sm:$0xff] %v1543_v23  ;;  %726 = vst [vmem:[%s1505_s29 + $0x98] sm:$0xff] %v1545_v24  ;;  %v872_v6 = vmul.f32 %v1543_v23, %v1543_v23  ;;  %v874_v11 = vmul.f32 %v1545_v24, %v1545_v24  ;;  %v922_v15 = vadd.f32 %v921_v3, %v871_v62 }
 0x101   : > { %v1551_v31 = vpop.f32.mrf.mxu0  ;;  %v1553_v32 = vpop.f32.mrf.mxu1  ;;  %v795_v21 = vadd.f32 %v794_v49, %v1543_v23  ;;  %v837_v22 = vadd.f32 %v836_v55, %v1545_v24  ;;  %v964_v19 = vadd.f32 %v963_v9, %v873_v5 }
 0x102   : > { %727 = vst [vmem:[%s1505_s29 + $0xa0] sm:$0xff] %v1551_v31  ;;  %729 = vst [vmem:[%s1505_s29 + $0xb0] sm:$0xff] %v1553_v32  ;;  %v875_v12 = vmul.f32 %v1551_v31, %v1551_v31  ;;  %v877_v25 = vmul.f32 %v1553_v32, %v1553_v32  ;;  %v943_v27 = vadd.f32 %v942_v10, %v872_v6 }
 0x103   : > { %v1559_v41 = vpop.f32.mrf.mxu0  ;;  %v1561_v42 = vpop.f32.mrf.mxu1  ;;  %v985_v24 = vadd.f32 %v984_v13, %v874_v11  ;;  %v775_v30 = vadd.f32 %v774_v14, %v1551_v31  ;;  %v817_v34 = vadd.f32 %v816_v16, %v1553_v32 }
 0x104   : > { %728 = vst [vmem:[%s1505_s29 + $0xa8] sm:$0xff] %v1559_v41  ;;  %730 = vst [vmem:[%s1505_s29 + $0xb8] sm:$0xff] %v1561_v42  ;;  %v876_v26 = vmul.f32 %v1559_v41, %v1559_v41  ;;  %v878_v20 = vmul.f32 %v1561_v42, %v1561_v42  ;;  %v923_v33 = vadd.f32 %v922_v15, %v875_v12 }
 0x105   : > { %v1569_v52 = vpop.f32.mrf.mxu0  ;;  %v1571_v53 = vpop.f32.mrf.mxu1  ;;  %v796_v35 = vadd.f32 %v795_v21, %v1559_v41  ;;  %v838_v36 = vadd.f32 %v837_v22, %v1561_v42  ;;  %v965_v43 = vadd.f32 %v964_v19, %v877_v25 }
 0x106   : > { %731 = vst [vmem:[%s1505_s29 + $0xc0] sm:$0xff] %v1569_v52  ;;  %733 = vst [vmem:[%s1505_s29 + $0xd0] sm:$0xff] %v1571_v53  ;;  %v879_v23 = vmul.f32 %v1569_v52, %v1569_v52  ;;  %v881_v37 = vmul.f32 %v1571_v53, %v1571_v53  ;;  %v944_v44 = vadd.f32 %v943_v27, %v876_v26 }
 0x107   : > { %v489_v63 = vpop.f32.mrf.mxu0  ;;  %v650_v0 = vpop.f32.mrf.mxu1  ;;  %v986_v45 = vadd.f32 %v985_v24, %v878_v20  ;;  %v776_v41 = vadd.f32 %v775_v30, %v1569_v52  ;;  %v818_v46 = vadd.f32 %v817_v34, %v1571_v53 }
 0x108   : > { %732 = vst [vmem:[%s1505_s29 + $0xc8] sm:$0xff] %v489_v63  ;;  %734 = vst [vmem:[%s1505_s29 + $0xd8] sm:$0xff] %v650_v0  ;;  %v880_v38 = vmul.f32 %v489_v63, %v489_v63  ;;  %v882_v31 = vmul.f32 %v650_v0, %v650_v0  ;;  %v924_v42 = vadd.f32 %v923_v33, %v879_v23 }
 0x109   : > { %v1595_v7 = vpop.f32.mrf.mxu0  ;;  %v1597_v8 = vpop.f32.mrf.mxu1  ;;  %v797_v50 = vadd.f32 %v796_v35, %v489_v63  ;;  %v839_v51 = vadd.f32 %v838_v36, %v650_v0  ;;  %v966_v57 = vadd.f32 %v965_v43, %v881_v37 }
 0x10a   : > { %735 = vst [vmem:[%s1505_s29 + $0xe0] sm:$0xff] %v1595_v7  ;;  %737 = vst [vmem:[%s1505_s29 + $0xf0] sm:$0xff] %v1597_v8  ;;  %v883_v32 = vmul.f32 %v1595_v7, %v1595_v7  ;;  %v885_v54 = vmul.f32 %v1597_v8, %v1597_v8  ;;  %v945_v58 = vadd.f32 %v944_v44, %v880_v38 }
 0x10b   : > { %v495_v17 = vpop.f32.mrf.mxu0  ;;  %v656_v18 = vpop.f32.mrf.mxu1  ;;  %v987_v62 = vadd.f32 %v986_v45, %v882_v31  ;;  %v777_v53 = vadd.f32 %v776_v41, %v1595_v7  ;;  %v819_v0 = vadd.f32 %v818_v46, %v1597_v8 }
 0x10c   : > { %736 = vst [vmem:[%s1505_s29 + $0xe8] sm:$0xff] %v495_v17  ;;  %738 = vst [vmem:[%s1505_s29 + $0xf8] sm:$0xff] %v656_v18  ;;  %v884_v56 = vmul.f32 %v495_v17, %v495_v17  ;;  %v886_v59 = vmul.f32 %v656_v18, %v656_v18  ;;  %v925_v63 = vadd.f32 %v924_v42, %v883_v32 }
 0x10d   : > { %v499_v28 = vpop.f32.mrf.mxu0  ;;  %v660_v29 = vpop.f32.mrf.mxu1  ;;  %v798_v1 = vadd.f32 %v797_v50, %v495_v17  ;;  %v840_v2 = vadd.f32 %v839_v51, %v656_v18  ;;  %v967_v5 = vadd.f32 %v966_v57, %v885_v54 }
 0x10e   : > { %739 = vst [vmem:[%s1505_s29 + $0x100] sm:$0xff] %v499_v28  ;;  %741 = vst [vmem:[%s1505_s29 + $0x110] sm:$0xff] %v660_v29  ;;  %v887_v60 = vmul.f32 %v499_v28, %v499_v28  ;;  %v889_v3 = vmul.f32 %v660_v29, %v660_v29  ;;  %v946_v6 = vadd.f32 %v945_v58, %v884_v56 }
 0x10f   : > { %v501_v39 = vpop.f32.mrf.mxu0  ;;  %v662_v40 = vpop.f32.mrf.mxu1  ;;  %v988_v7 = vadd.f32 %v987_v62, %v886_v59  ;;  %v778_v11 = vadd.f32 %v777_v53, %v499_v28  ;;  %v820_v8 = vadd.f32 %v819_v0, %v660_v29 }
 0x110   : > { %740 = vst [vmem:[%s1505_s29 + $0x108] sm:$0xff] %v501_v39  ;;  %742 = vst [vmem:[%s1505_s29 + $0x118] sm:$0xff] %v662_v40  ;;  %v888_v4 = vmul.f32 %v501_v39, %v501_v39  ;;  %v890_v9 = vmul.f32 %v662_v40, %v662_v40  ;;  %v926_v12 = vadd.f32 %v925_v63, %v887_v60 }
 0x111   : > { %v505_v47 = vpop.f32.mrf.mxu0  ;;  %v666_v48 = vpop.f32.mrf.mxu1  ;;  %v799_v15 = vadd.f32 %v798_v1, %v501_v39  ;;  %v841_v16 = vadd.f32 %v840_v2, %v662_v40  ;;  %v968_v21 = vadd.f32 %v967_v5, %v889_v3 }
 0x112   : > { %743 = vst [vmem:[%s1505_s29 + $0x120] sm:$0xff] %v505_v47  ;;  %745 = vst [vmem:[%s1505_s29 + $0x130] sm:$0xff] %v666_v48  ;;  %v891_v10 = vmul.f32 %v505_v47, %v505_v47  ;;  %v893_v17 = vmul.f32 %v666_v48, %v666_v48  ;;  %v947_v22 = vadd.f32 %v946_v6, %v888_v4 }
 0x113   : > { %v507_v52 = vpop.f32.mrf.mxu0  ;;  %v668_v61 = vpop.f32.mrf.mxu1  ;;  %v989_v20 = vadd.f32 %v988_v7, %v890_v9  ;;  %v779_v23 = vadd.f32 %v778_v11, %v505_v47  ;;  %v821_v29 = vadd.f32 %v820_v8, %v666_v48 }
 0x114   : > { %744 = vst [vmem:[%s1505_s29 + $0x128] sm:$0xff] %v507_v52  ;;  %746 = vst [vmem:[%s1505_s29 + $0x138] sm:$0xff] %v668_v61  ;;  %v892_v18 = vmul.f32 %v507_v52, %v507_v52  ;;  %v894_v25 = vmul.f32 %v668_v61, %v668_v61  ;;  %v927_v28 = vadd.f32 %v926_v12, %v891_v10 }
 0x115   : > { %v511_v49 = vpop.f32.mrf.mxu0  ;;  %v672_v55 = vpop.f32.mrf.mxu1  ;;  %v800_v24 = vadd.f32 %v799_v15, %v507_v52  ;;  %v842_v30 = vadd.f32 %v841_v16, %v668_v61  ;;  %v969_v37 = vadd.f32 %v968_v21, %v893_v17 }
 0x116   : > { %747 = vst [vmem:[%s1505_s29 + $0x140] sm:$0xff] %v511_v49  ;;  %749 = vst [vmem:[%s1505_s29 + $0x150] sm:$0xff] %v672_v55  ;;  %v895_v26 = vmul.f32 %v511_v49, %v511_v49  ;;  %v897_v33 = vmul.f32 %v672_v55, %v672_v55  ;;  %v948_v38 = vadd.f32 %v947_v22, %v892_v18 }
 0x117   : > { %v513_v13 = vpop.f32.mrf.mxu0  ;;  %v674_v14 = vpop.f32.mrf.mxu1  ;;  %v990_v43 = vadd.f32 %v989_v20, %v894_v25  ;;  %v780_v44 = vadd.f32 %v779_v23, %v511_v49  ;;  %v822_v32 = vadd.f32 %v821_v29, %v672_v55 }
 0x118   : > { %748 = vst [vmem:[%s1505_s29 + $0x148] sm:$0xff] %v513_v13  ;;  %750 = vst [vmem:[%s1505_s29 + $0x158] sm:$0xff] %v674_v14  ;;  %v896_v34 = vmul.f32 %v513_v13, %v513_v13  ;;  %v898_v39 = vmul.f32 %v674_v14, %v674_v14  ;;  %v928_v31 = vadd.f32 %v927_v28, %v895_v26 }
 0x119   : > { %v517_v19 = vpop.f32.mrf.mxu0  ;;  %v678_v27 = vpop.f32.mrf.mxu1  ;;  %v801_v42 = vadd.f32 %v800_v24, %v513_v13  ;;  %v843_v46 = vadd.f32 %v842_v30, %v674_v14  ;;  %v970_v50 = vadd.f32 %v969_v37, %v897_v33 }
 0x11a   : > { %751 = vst [vmem:[%s1505_s29 + $0x160] sm:$0xff] %v517_v19  ;;  %753 = vst [vmem:[%s1505_s29 + $0x170] sm:$0xff] %v678_v27  ;;  %v899_v40 = vmul.f32 %v517_v19, %v517_v19  ;;  %v901_v47 = vmul.f32 %v678_v27, %v678_v27  ;;  %v949_v51 = vadd.f32 %v948_v38, %v896_v34 }
 0x11b   : > { %v519_v35 = vpop.f32.mrf.mxu0  ;;  %v680_v36 = vpop.f32.mrf.mxu1  ;;  %v781_v54 = vadd.f32 %v780_v44, %v517_v19  ;;  %v991_v59 = vadd.f32 %v990_v43, %v898_v39  ;;  %v823_v52 = vadd.f32 %v822_v32, %v678_v27 }
 0x11c   : > { %752 = vst [vmem:[%s1505_s29 + $0x168] sm:$0xff] %v519_v35  ;;  %754 = vst [vmem:[%s1505_s29 + $0x178] sm:$0xff] %v680_v36  ;;  %v900_v48 = vmul.f32 %v519_v35, %v519_v35  ;;  %v902_v56 = vmul.f32 %v680_v36, %v680_v36  ;;  %v929_v60 = vadd.f32 %v928_v31, %v899_v40 }
 0x11d   : > { %v523_v45 = vpop.f32.mrf.mxu0  ;;  %v684_v41 = vpop.f32.mrf.mxu1  ;;  %v802_v62 = vadd.f32 %v801_v42, %v519_v35  ;;  %v844_v53 = vadd.f32 %v843_v46, %v680_v36  ;;  %v971_v3 = vadd.f32 %v970_v50, %v901_v47 }
 0x11e   : > { %755 = vst [vmem:[%s1505_s29 + $0x180] sm:$0xff] %v523_v45  ;;  %757 = vst [vmem:[%s1505_s29 + $0x190] sm:$0xff] %v684_v41  ;;  %v903_v61 = vmul.f32 %v523_v45, %v523_v45  ;;  %v905_v63 = vmul.f32 %v684_v41, %v684_v41  ;;  %v950_v4 = vadd.f32 %v949_v51, %v900_v48 }
 0x11f   : > { %v525_v57 = vpop.f32.mrf.mxu0  ;;  %v686_v58 = vpop.f32.mrf.mxu1  ;;  %v992_v5 = vadd.f32 %v991_v59, %v902_v56  ;;  %v782_v6 = vadd.f32 %v781_v54, %v523_v45  ;;  %v824_v9 = vadd.f32 %v823_v52, %v684_v41 }
 0x120   : > { %756 = vst [vmem:[%s1505_s29 + $0x188] sm:$0xff] %v525_v57  ;;  %758 = vst [vmem:[%s1505_s29 + $0x198] sm:$0xff] %v686_v58  ;;  %v904_v0 = vmul.f32 %v525_v57, %v525_v57  ;;  %v906_v49 = vmul.f32 %v686_v58, %v686_v58  ;;  %v930_v12 = vadd.f32 %v929_v60, %v903_v61 }
 0x121   : > { %v529_v1 = vpop.f32.mrf.mxu0  ;;  %v690_v2 = vpop.f32.mrf.mxu1  ;;  %v803_v8 = vadd.f32 %v802_v62, %v525_v57  ;;  %v845_v13 = vadd.f32 %v844_v53, %v686_v58  ;;  %v972_v15 = vadd.f32 %v971_v3, %v905_v63 }
 0x122   : > { %759 = vst [vmem:[%s1505_s29 + $0x1a0] sm:$0xff] %v529_v1  ;;  %v907_v55 = vmul.f32 %v529_v1, %v529_v1  ;;  %761 = vst [vmem:[%s1505_s29 + $0x1b0] sm:$0xff] %v690_v2  ;;  %v909_v10 = vmul.f32 %v690_v2, %v690_v2  ;;  %v951_v16 = vadd.f32 %v950_v4, %v904_v0 }
 0x123   : > { %v531_v7 = vpop.f32.mrf.mxu0  ;;  %v692_v11 = vpop.f32.mrf.mxu1  ;;  %v783_v17 = vadd.f32 %v782_v6, %v529_v1  ;;  %v993_v25 = vadd.f32 %v992_v5, %v906_v49  ;;  %v825_v19 = vadd.f32 %v824_v9, %v690_v2 }
 0x124   : > { %760 = vst [vmem:[%s1505_s29 + $0x1a8] sm:$0xff] %v531_v7  ;;  %v908_v14 = vmul.f32 %v531_v7, %v531_v7  ;;  %762 = vst [vmem:[%s1505_s29 + $0x1b8] sm:$0xff] %v692_v11  ;;  %v910_v18 = vmul.f32 %v692_v11, %v692_v11  ;;  %v931_v26 = vadd.f32 %v930_v12, %v907_v55 }
 0x125   : > { %v535_v21 = vpop.f32.mrf.mxu0  ;;  %v696_v22 = vpop.f32.mrf.mxu1  ;;  %v973_v20 = vadd.f32 %v972_v15, %v909_v10  ;;  %v804_v23 = vadd.f32 %v803_v8, %v531_v7  ;;  %v846_v28 = vadd.f32 %v845_v13, %v692_v11 }
 0x126   : > { %763 = vst [vmem:[%s1505_s29 + $0x1c0] sm:$0xff] %v535_v21  ;;  %v911_v27 = vmul.f32 %v535_v21, %v535_v21  ;;  %765 = vst [vmem:[%s1505_s29 + $0x1d0] sm:$0xff] %v696_v22  ;;  %v913_v29 = vmul.f32 %v696_v22, %v696_v22  ;;  %v952_v33 = vadd.f32 %v951_v16, %v908_v14 }
 0x127   : > { %v537_v24 = vpop.f32.mrf.mxu0  ;;  %v698_v30 = vpop.f32.mrf.mxu1  ;;  %v784_v34 = vadd.f32 %v783_v17, %v535_v21  ;;  %v826_v35 = vadd.f32 %v825_v19, %v696_v22  ;;  %v994_v37 = vadd.f32 %v993_v25, %v910_v18  ;;  %v1159_v25 = vmov 1983009808  }
 0x128   : > { %764 = vst [vmem:[%s1505_s29 + $0x1c8] sm:$0xff] %v537_v24  ;;  %v912_v36 = vmul.f32 %v537_v24, %v537_v24  ;;  %766 = vst [vmem:[%s1505_s29 + $0x1d8] sm:$0xff] %v698_v30  ;;  %v932_v38 = vadd.f32 %v931_v26, %v911_v27  ;;  %v805_v39 = vadd.f32 %v804_v23, %v537_v24  ;;  %v1015_v26 = vunpack.c.l.s4 %v1159_v25 }
 0x129   : > { %v914_v40 = vmul.f32 %v698_v30, %v698_v30  ;;  %v541_v43 = vpop.f32.mrf.mxu0  ;;  %v702_v44 = vpop.f32.mrf.mxu1  ;;  %v847_v31 = vadd.f32 %v846_v28, %v698_v30  ;;  %v974_v42 = vadd.f32 %v973_v20, %v913_v29  ;;  %v1017_v19 = vlaneseq }
 0x12a   : > { %767 = vst [vmem:[%s1505_s29 + $0x1e0] sm:$0xff] %v541_v43  ;;  %v785_v32 = vadd.f32 %v784_v34, %v541_v43  ;;  %v915_v45 = vmul.f32 %v541_v43, %v541_v43  ;;  %769 = vst [vmem:[%s1505_s29 + $0x1f0] sm:$0xff] %v702_v44  ;;  %v827_v41 = vadd.f32 %v826_v35, %v702_v44 }
 0x12b   : > { %v953_v46 = vadd.f32 %v952_v33, %v912_v36  ;;  %v995_v47 = vadd.f32 %v994_v37, %v914_v40  ;;  %v917_v48 = vmul.f32 %v702_v44, %v702_v44  ;;  %v543_v50 = vpop.f32.mrf.mxu0  ;;  %v704_v51 = vpop.f32.mrf.mxu1 }
 0x12c   : > { %v786_v54 = vrot.slane %v785_v32, 4  ;;  %v933_v56 = vadd.f32 %v932_v38, %v915_v45  ;;  %v828_v57 = vrot.slane %v827_v41, 4  ;;  %768 = vst [vmem:[%s1505_s29 + $0x1e8] sm:$0xff] %v543_v50  ;;  %v806_v58 = vadd.f32 %v805_v39, %v543_v50  ;;  %770 = vst [vmem:[%s1505_s29 + $0x1f8] sm:$0xff] %v704_v51 }
 0x12d   : > { %v975_v59 = vadd.f32 %v974_v42, %v917_v48  ;;  %v916_v60 = vmul.f32 %v543_v50, %v543_v50  ;;  %v848_v52 = vadd.f32 %v847_v31, %v704_v51  ;;  %v918_v61 = vmul.f32 %v704_v51, %v704_v51 }
 0x12e   : > { %v787_v62 = vadd.f32 %v786_v54, %v785_v32  ;;  %v934_v53 = vrot.slane %v933_v56, 4  ;;  %v829_v63 = vadd.f32 %v828_v57, %v827_v41  ;;  %v807_v0 = vrot.slane %v806_v58, 4 }
 0x12f   : > { %v976_v1 = vrot.slane %v975_v59, 4  ;;  %v954_v2 = vadd.f32 %v953_v46, %v916_v60  ;;  %v849_v3 = vrot.slane %v848_v52, 4  ;;  %v996_v4 = vadd.f32 %v995_v47, %v918_v61 }
 0x130   : > { %v788_v49 = vrot.slane %v787_v62, 2  ;;  %v935_v55 = vadd.f32 %v934_v53, %v933_v56  ;;  %v830_v5 = vrot.slane %v829_v63, 2  ;;  %v808_v6 = vadd.f32 %v807_v0, %v806_v58 }
 0x131   : > { %v977_v9 = vadd.f32 %v976_v1, %v975_v59  ;;  %v955_v10 = vrot.slane %v954_v2, 4  ;;  %v850_v7 = vadd.f32 %v849_v3, %v848_v52  ;;  %v997_v11 = vrot.slane %v996_v4, 4 }
 0x132   : > { %v789_v12 = vadd.f32 %v788_v49, %v787_v62  ;;  %v936_v8 = vrot.slane %v935_v55, 2  ;;  %v831_v13 = vadd.f32 %v830_v5, %v829_v63  ;;  %v809_v14 = vrot.slane %v808_v6, 2 }
 0x133   : > { %v978_v15 = vrot.slane %v977_v9, 2  ;;  %v956_v16 = vadd.f32 %v955_v10, %v954_v2  ;;  %v851_v17 = vrot.slane %v850_v7, 2  ;;  %v998_v18 = vadd.f32 %v997_v11, %v996_v4 }
 0x134   : > { %v937_v21 = vadd.f32 %v936_v8, %v935_v55  ;;  %v810_v22 = vadd.f32 %v809_v14, %v808_v6  ;;  %v790_v29 = vrot.slane %v789_v12, 1  ;;  %v832_v30 = vrot.slane %v831_v13, 1 }
 0x135   : > { %v979_v27 = vadd.f32 %v978_v15, %v977_v9  ;;  %v957_v20 = vrot.slane %v956_v16, 2  ;;  %v852_v23 = vadd.f32 %v851_v17, %v850_v7  ;;  %v999_v28 = vrot.slane %v998_v18, 2 }
 0x136   : > { %v938_v24 = vrot.slane %v937_v21, 1  ;;  %v811_v33 = vrot.slane %v810_v22, 1  ;;  %v1016_v38 = vunpack.c.0.s8 %v1015_v26  ;;  %v1018_v39 = vshrl.u32 %v1017_v19, 7 }
 0x137   : > { %v980_v34 = vrot.slane %v979_v27, 1  ;;  %v958_v35 = vadd.f32 %v957_v20, %v956_v16  ;;  %v853_v36 = vrot.slane %v852_v23, 1  ;;  %v1000_v37 = vadd.f32 %v999_v28, %v998_v18 }
 0x138   : > { %v939_v40 = vadd.f32 %v938_v24, %v937_v21  ;;  %v791_v32 = vadd.f32 %v790_v29, %v789_v12  ;;  %v833_v45 = vadd.f32 %v832_v30, %v831_v13  ;;  %v812_v41 = vadd.f32 %v811_v33, %v810_v22 }
 0x139   : > { %v981_v43 = vadd.f32 %v980_v34, %v979_v27  ;;  %v959_v44 = vrot.slane %v958_v35, 1  ;;  %v1001_v31 = vrot.slane %v1000_v37, 1  ;;  %v854_v46 = vadd.f32 %v853_v36, %v852_v23 }
 0x13a   : > { %v1019_v48 = vsub.s32 %v1016_v38, %v1018_v39  ;;  %v1004_v50 = vsel %vm1003_vm0, %v791_v32, %v939_v40 }
 0x13b   : > { %v960_v42 = vadd.f32 %v959_v44, %v958_v35  ;;  %v1002_v47 = vadd.f32 %v1001_v31, %v1000_v37  ;;  %v1006_v51 = vsel %vm1003_vm0, %v833_v45, %v981_v43 }
 0x13d   : > { %v1005_v54 = vsel %vm1003_vm0, %v812_v41, %v960_v42  ;;  %v1007_v56 = vsel %vm1003_vm0, %v854_v46, %v1002_v47 }
 0x13e   : > { %v1012_v57 = vcombine.low %v1004_v50, %v1005_v54  ;;  %v1013_v58 = vcombine.low %v1006_v51, %v1007_v56 }
 0x140   : > { %v1020_v59 = vrot.slane %v1012_v57, %v1019_v48  ;;  %v1027_v60 = vrot.slane %v1013_v58, %v1019_v48 }
 0x142   : > { %v1028_v52 = vcombine.low %v1020_v59, %v1027_v60 }
 0x144   : > { %1030 = vst [vmem:[%s242_s7] sm:$0xff] %v1028_v52 }
 0x145 PF: > { %s16_s18 = sadd.s32 1, %s1156_s18  }
 0x146   : > { %p13_p5 = scmp.ge.s32.totalorder %s16_s18, 6  }
 0x148   :  { %15 = sbr.rel (!%p13_p5) target bundleno = 1 (0x1), region = 78 }

// kernel: bottleneck_forward.7
= control target key start
LH: loop header
LB: loop body
LE: loop exit
PB: predicated region body
PF: predicated region fallthrough
CT: control target
= control target key end

     0   :  { %s853_s15 = smov 0   ;;  %s1445_s0 = inlined_call_operand.vmem [shape: f32[512,512], index: 0, kind: input, shape index: {}, may-alias: {0,4}]   ;;  %s1446_s1 = inlined_call_operand.vmem [shape: f32[512,512], index: 1, kind: input, shape index: {}]   ;;  %s1447_s2 = inlined_call_operand.vmem [shape: f32[1,512], index: 2, kind: input, shape index: {}]   ;;  %s1448_s3 = inlined_call_operand.vmem [shape: f32[1,512], index: 3, kind: input, shape index: {}]   ;;  %s1449_s4 = inlined_call_operand.vmem [shape: f32[512,512], index: 4, kind: output, shape index: {}, may-alias: {0,4}]  }
   0x1 LB: > { %s793_s16 = sadd.s32 4294967295, %s826_s15   ;;  %p797_p0 = scmp.ge.s32.totalorder %s826_s15, 1  ;;  %s826_s15 = sphi %s853_s15, %s14_s15  }
   0x2   : > { %p176_p1 = scmp.lt.s32.totalorder %s826_s15, 5 }
   0x4   : > { %p177_p2 = pnand %p797_p0, %p176_p1 }
   0x6   : > { %180 = sbr.rel (%p177_p2) target bundleno = 113 (0x71), region = 36 }
   0xb   : > { %s798_s17 = sshll.u32 %s793_s16, 4  ;;  %v297_v0 = vlaneseq  ;;  %v867_v3 = vld [vmem:[%s1447_s2] sm:$0xf] }
   0xc   : > { %p211_p3 = scmp.lt.s32.totalorder %s798_s17, 63  ;;  %v881_v6 = vld [vmem:[%s1448_s3] sm:$0xf] }
   0xd   : > { %v861_v1 = vshrl.u32 %v297_v0, 7 }
   0xe   : > { %s1506_s17 = smov (!%p211_p3, %s798_s17), 63 }
   0xf   : > { %s809_s18 = sshll.u32 %s1506_s17, 5  ;;  %v299_v2 = vsub.s32 0, %v861_v1  ;;  %v1450_v12 = vsub.s32 1, %v861_v1 }
  0x10   : > { %s872_s23 = scalar_lea.vmem %s1446_s1, %s809_s18  ;;  %s890_s28 = scalar_lea.vmem %s1445_s0, %s809_s18 }
  0x11   : > { %v875_v4 = vrot.slane %v867_v3, %v299_v2  ;;  %v231_v5 = vld [vmem:[%s872_s23] sm:$0xff]  ;;  %v885_v8 = vrot.slane %v881_v6, %v299_v2  ;;  %v903_v16 = vrot.slane %v867_v3, %v1450_v12  ;;  %s908_s5 = scalar_lea.vmem %s1449_s4, %s809_s18  ;;  %v911_v17 = vld [vmem:[%s890_s28 + $0x8] sm:$0xff]  ;;  %v914_v18 = vld [vmem:[%s890_s28 + $0x10] sm:$0xff] }
  0x12   : > { %v467_v10 = vld [vmem:[%s890_s28] sm:$0xff]  ;;  %v917_v19 = vld [vmem:[%s890_s28 + $0x18] sm:$0xff]  ;;  %v923_v21 = vld [vmem:[%s890_s28 + $0x28] sm:$0xff] }
  0x13   : > { %v317_v7 = vmul.f32 %v875_v4, %v231_v5  ;;  %v920_v20 = vld [vmem:[%s890_s28 + $0x20] sm:$0xff]  ;;  %v926_v22 = vld [vmem:[%s890_s28 + $0x30] sm:$0xff]  ;;  %v929_v23 = vld [vmem:[%s890_s28 + $0x38] sm:$0xff] }
  0x14   : > { %v932_v24 = vld [vmem:[%s890_s28 + $0x40] sm:$0xff]  ;;  %v935_v25 = vld [vmem:[%s890_s28 + $0x48] sm:$0xff]  ;;  %v938_v26 = vld [vmem:[%s890_s28 + $0x50] sm:$0xff] }
  0x15   : > { %v403_v9 = vadd.f32 %v885_v8, %v317_v7  ;;  %v941_v27 = vld [vmem:[%s890_s28 + $0x58] sm:$0xff]  ;;  %v944_v28 = vld [vmem:[%s890_s28 + $0x60] sm:$0xff]  ;;  %v947_v29 = vld [vmem:[%s890_s28 + $0x68] sm:$0xff] }
  0x16   : > { %v950_v30 = vld [vmem:[%s890_s28 + $0x70] sm:$0xff]  ;;  %v953_v31 = vld [vmem:[%s890_s28 + $0x78] sm:$0xff]  ;;  %v956_v32 = vld [vmem:[%s890_s28 + $0x80] sm:$0xff] }
  0x17   : > { %v894_v11 = vadd.f32 %v467_v10, %v403_v9  ;;  %v959_v33 = vld [vmem:[%s890_s28 + $0x88] sm:$0xff]  ;;  %v962_v34 = vld [vmem:[%s890_s28 + $0x90] sm:$0xff]  ;;  %v965_v35 = vld [vmem:[%s890_s28 + $0x98] sm:$0xff] }
  0x18   : > { %v968_v36 = vld [vmem:[%s890_s28 + $0xa0] sm:$0xff]  ;;  %v971_v37 = vld [vmem:[%s890_s28 + $0xa8] sm:$0xff]  ;;  %v974_v38 = vld [vmem:[%s890_s28 + $0xb0] sm:$0xff] }
  0x19   : > { %v977_v39 = vld [vmem:[%s890_s28 + $0xb8] sm:$0xff]  ;;  %v980_v40 = vld [vmem:[%s890_s28 + $0xc0] sm:$0xff]  ;;  %v983_v41 = vld [vmem:[%s890_s28 + $0xc8] sm:$0xff] }
  0x1a   : > { %v986_v42 = vld [vmem:[%s890_s28 + $0xd0] sm:$0xff]  ;;  %v989_v43 = vld [vmem:[%s890_s28 + $0xd8] sm:$0xff]  ;;  %v992_v44 = vld [vmem:[%s890_s28 + $0xe0] sm:$0xff] }
  0x1b   : > { %v995_v45 = vld [vmem:[%s890_s28 + $0xe8] sm:$0xff]  ;;  %v998_v46 = vld [vmem:[%s890_s28 + $0xf0] sm:$0xff]  ;;  %v1001_v47 = vld [vmem:[%s890_s28 + $0xf8] sm:$0xff] }
  0x1c   : > { %v1004_v48 = vld [vmem:[%s890_s28 + $0x100] sm:$0xff]  ;;  %v1007_v49 = vld [vmem:[%s890_s28 + $0x108] sm:$0xff]  ;;  %v1010_v50 = vld [vmem:[%s890_s28 + $0x110] sm:$0xff] }
  0x1d   : > { %v1013_v51 = vld [vmem:[%s890_s28 + $0x118] sm:$0xff]  ;;  %v1016_v52 = vld [vmem:[%s890_s28 + $0x120] sm:$0xff]  ;;  %v1019_v53 = vld [vmem:[%s890_s28 + $0x128] sm:$0xff] }
  0x1e   : > { %v1022_v54 = vld [vmem:[%s890_s28 + $0x130] sm:$0xff]  ;;  %v1025_v55 = vld [vmem:[%s890_s28 + $0x138] sm:$0xff]  ;;  %v1028_v56 = vld [vmem:[%s890_s28 + $0x140] sm:$0xff] }
  0x1f   : > { %1451 = vst [vmem:[#allocation2_spill] sm:$0xff] %v1028_v56  ;;  %v1031_v57 = vld [vmem:[%s890_s28 + $0x148] sm:$0xff]  ;;  %v1034_v58 = vld [vmem:[%s890_s28 + $0x150] sm:$0xff]  ;;  %v1037_v59 = vld [vmem:[%s890_s28 + $0x158] sm:$0xff] }
  0x20   : > { %1452 = vst [vmem:[#allocation3_spill] sm:$0xff] %v1031_v57  ;;  %1453 = vst [vmem:[#allocation4_spill] sm:$0xff] %v1034_v58  ;;  %v1040_v60 = vld [vmem:[%s890_s28 + $0x160] sm:$0xff]  ;;  %v1043_v61 = vld [vmem:[%s890_s28 + $0x168] sm:$0xff] }
  0x21   : > { %1454 = vst [vmem:[#allocation5_spill] sm:$0xff] %v1037_v59  ;;  %1455 = vst [vmem:[#allocation6_spill] sm:$0xff] %v1040_v60  ;;  %v1046_v62 = vld [vmem:[%s890_s28 + $0x170] sm:$0xff]  ;;  %v1049_v63 = vld [vmem:[%s890_s28 + $0x178] sm:$0xff] }
  0x22   : > { %1456 = vst [vmem:[#allocation7_spill] sm:$0xff] %v1043_v61  ;;  %1457 = vst [vmem:[#allocation8_spill] sm:$0xff] %v1046_v62  ;;  %v1052_v0 = vld [vmem:[%s890_s28 + $0x180] sm:$0xff]  ;;  %v1055_v2 = vld [vmem:[%s890_s28 + $0x188] sm:$0xff] }
  0x23   : > { %1458 = vst [vmem:[#allocation9_spill] sm:$0xff] %v1049_v63  ;;  %1459 = vst [vmem:[#allocation10_spill] sm:$0xff] %v1052_v0  ;;  %v1058_v5 = vld [vmem:[%s890_s28 + $0x190] sm:$0xff]  ;;  %v1061_v7 = vld [vmem:[%s890_s28 + $0x198] sm:$0xff]  ;;  %v1480_v63 = vmax.f32 %v894_v11, 0.0 }
  0x24   : > { %1460 = vst [vmem:[#allocation11_spill] sm:$0xff] %v1055_v2  ;;  %1461 = vst [vmem:[#allocation12_spill] sm:$0xff] %v1058_v5  ;;  %v1064_v9 = vld [vmem:[%s890_s28 + $0x1a0] sm:$0xff]  ;;  %v1067_v10 = vld [vmem:[%s890_s28 + $0x1a8] sm:$0xff] }
  0x25   : > { %1462 = vst [vmem:[#allocation13_spill] sm:$0xff] %v1061_v7  ;;  %1463 = vst [vmem:[#allocation14_spill] sm:$0xff] %v1064_v9  ;;  %v1070_v15 = vld [vmem:[%s890_s28 + $0x1b0] sm:$0xff]  ;;  %v1073_v12 = vld [vmem:[%s890_s28 + $0x1b8] sm:$0xff]  ;;  %v1470_v7 = vsub.s32 2, %v861_v1 }
  0x26   : > { %1464 = vst [vmem:[#allocation15_spill] sm:$0xff] %v1067_v10  ;;  %1465 = vst [vmem:[#allocation16_spill] sm:$0xff] %v1070_v15  ;;  %v1076_v14 = vld [vmem:[%s890_s28 + $0x1c0] sm:$0xff]  ;;  %v1079_v13 = vld [vmem:[%s890_s28 + $0x1c8] sm:$0xff]  ;;  %v1471_v10 = vsub.s32 3, %v861_v1 }
  0x27   : > { %1466 = vst [vmem:[#allocation17_spill] sm:$0xff] %v1073_v12  ;;  %1467 = vst [vmem:[#allocation18_spill] sm:$0xff] %v1076_v14  ;;  %v1082_v5 = vld [vmem:[%s890_s28 + $0x1d0] sm:$0xff]  ;;  %v1087_v9 = vrot.slane %v867_v3, %v1470_v7  ;;  %v1095_v12 = vld [vmem:[%s890_s28 + $0x1d8] sm:$0xff] }
  0x28   : > { %1468 = vst [vmem:[#allocation19_spill] sm:$0xff] %v1079_v13  ;;  %1469 = vst [vmem:[#allocation20_spill] sm:$0xff] %v1082_v5  ;;  %v1092_v15 = vrot.slane %v867_v3, %v1471_v10  ;;  %v1098_v14 = vld [vmem:[%s890_s28 + $0x1e0] sm:$0xff]  ;;  %v1101_v13 = vld [vmem:[%s890_s28 + $0x1e8] sm:$0xff]  ;;  %v1475_v5 = vsub.s32 1, %v861_v1  ;;  %v1478_v10 = vsub.s32 2, %v861_v1 }
  0x29   : > { %1472 = vst [vmem:[#allocation21_spill] sm:$0xff] %v1095_v12  ;;  %1473 = vst [vmem:[#allocation22_spill] sm:$0xff] %v1098_v14  ;;  %v1109_v7 = vld [vmem:[%s890_s28 + $0x1f0] sm:$0xff]  ;;  %v1112_v0 = vld [vmem:[%s890_s28 + $0x1f8] sm:$0xff]  ;;  %v1479_v14 = vsub.s32 3, %v861_v1 }
  0x2a   : > { %1474 = vst [vmem:[#allocation23_spill] sm:$0xff] %v1101_v13  ;;  %v1106_v2 = vrot.slane %v881_v6, %v1475_v5  ;;  %1476 = vst [vmem:[#allocation24_spill] sm:$0xff] %v1109_v7  ;;  %v232_v3 = vld [vmem:[%s872_s23 + $0x8] sm:$0xff]  ;;  %v1118_v12 = vrot.slane %v881_v6, %v1478_v10  ;;  %v233_v7 = vld [vmem:[%s872_s23 + $0x10] sm:$0xff] }
  0x2b   : > { %1477 = vst [vmem:[#allocation25_spill] sm:$0xff] %v1112_v0  ;;  %v1123_v13 = vrot.slane %v881_v6, %v1479_v14  ;;  %659 = vst [vmem:[%s908_s5] sm:$0xff] %v1480_v63  ;;  %v318_v5 = vmul.f32 %v903_v16, %v232_v3  ;;  %v234_v62 = vld [vmem:[%s872_s23 + $0x18] sm:$0xff]  ;;  %v235_v0 = vld [vmem:[%s872_s23 + $0x20] sm:$0xff]  ;;  %v319_v61 = vmul.f32 %v1087_v9, %v233_v7 }
  0x2c   : > { %v320_v60 = vmul.f32 %v1092_v15, %v234_v62  ;;  %v321_v10 = vmul.f32 %v875_v4, %v235_v0  ;;  %v236_v59 = vld [vmem:[%s872_s23 + $0x28] sm:$0xff]  ;;  %v237_v1 = vld [vmem:[%s872_s23 + $0x30] sm:$0xff]  ;;  %v238_v58 = vld [vmem:[%s872_s23 + $0x38] sm:$0xff] }
  0x2d   : > { %v404_v6 = vadd.f32 %v1106_v2, %v318_v5  ;;  %v322_v11 = vmul.f32 %v903_v16, %v236_v59  ;;  %v323_v14 = vmul.f32 %v1087_v9, %v237_v1  ;;  %v324_v63 = vmul.f32 %v1092_v15, %v238_v58  ;;  %v239_v3 = vld [vmem:[%s872_s23 + $0x40] sm:$0xff] }
  0x2e   : > { %v405_v57 = vadd.f32 %v1118_v12, %v319_v61  ;;  %v406_v7 = vadd.f32 %v1123_v13, %v320_v60  ;;  %v407_v62 = vadd.f32 %v885_v8, %v321_v10  ;;  %v325_v0 = vmul.f32 %v875_v4, %v239_v3  ;;  %v240_v3 = vld [vmem:[%s872_s23 + $0x48] sm:$0xff] }
  0x2f   : > { %v532_v5 = vadd.f32 %v911_v17, %v404_v6  ;;  %v408_v59 = vadd.f32 %v1106_v2, %v322_v11  ;;  %v409_v1 = vadd.f32 %v1118_v12, %v323_v14  ;;  %v410_v58 = vadd.f32 %v1123_v13, %v324_v63 }
  0x30   : > { %v533_v56 = vadd.f32 %v914_v18, %v405_v57  ;;  %v534_v60 = vadd.f32 %v917_v19, %v406_v7  ;;  %v535_v61 = vadd.f32 %v920_v20, %v407_v62  ;;  %v411_v10 = vadd.f32 %v885_v8, %v325_v0  ;;  %v241_v18 = vld [vmem:[%s872_s23 + $0x50] sm:$0xff]  ;;  %v242_v57 = vld [vmem:[%s872_s23 + $0x58] sm:$0xff]  ;;  %v243_v19 = vld [vmem:[%s872_s23 + $0x60] sm:$0xff] }
  0x31   : > { %v596_v17 = vmax.f32 %v532_v5, 0.0  ;;  %v536_v6 = vadd.f32 %v923_v21, %v408_v59  ;;  %v537_v11 = vadd.f32 %v926_v22, %v409_v1  ;;  %v538_v14 = vadd.f32 %v929_v23, %v410_v58  ;;  %v244_v0 = vld [vmem:[%s872_s23 + $0x68] sm:$0xff]  ;;  %v245_v5 = vld [vmem:[%s872_s23 + $0x70] sm:$0xff]  ;;  %v246_v21 = vld [vmem:[%s872_s23 + $0x78] sm:$0xff] }
  0x32   : > { %v597_v20 = vmax.f32 %v533_v56, 0.0  ;;  %v598_v63 = vmax.f32 %v534_v60, 0.0  ;;  %v599_v7 = vmax.f32 %v535_v61, 0.0  ;;  %v539_v62 = vadd.f32 %v932_v24, %v411_v10  ;;  %v247_v58 = vld [vmem:[%s872_s23 + $0x80] sm:$0xff] }
  0x33   : > { %660 = vst [vmem:[%s908_s5 + $0x8] sm:$0xff] %v596_v17  ;;  %v600_v22 = vmax.f32 %v536_v6, 0.0  ;;  %v601_v23 = vmax.f32 %v537_v11, 0.0  ;;  %v602_v59 = vmax.f32 %v538_v14, 0.0  ;;  %v326_v1 = vmul.f32 %v903_v16, %v240_v3 }
  0x34   : > { %661 = vst [vmem:[%s908_s5 + $0x10] sm:$0xff] %v597_v20  ;;  %662 = vst [vmem:[%s908_s5 + $0x18] sm:$0xff] %v598_v63  ;;  %v603_v56 = vmax.f32 %v539_v62, 0.0  ;;  %v327_v24 = vmul.f32 %v1087_v9, %v241_v18  ;;  %v328_v60 = vmul.f32 %v1092_v15, %v242_v57  ;;  %v329_v61 = vmul.f32 %v875_v4, %v243_v19 }
  0x35   : > { %663 = vst [vmem:[%s908_s5 + $0x20] sm:$0xff] %v599_v7  ;;  %664 = vst [vmem:[%s908_s5 + $0x28] sm:$0xff] %v600_v22  ;;  %v412_v10 = vadd.f32 %v1106_v2, %v326_v1  ;;  %v330_v17 = vmul.f32 %v903_v16, %v244_v0  ;;  %v331_v3 = vmul.f32 %v1087_v9, %v245_v5  ;;  %v248_v22 = vld [vmem:[%s872_s23 + $0x88] sm:$0xff] }
  0x36   : > { %665 = vst [vmem:[%s908_s5 + $0x30] sm:$0xff] %v601_v23  ;;  %666 = vst [vmem:[%s908_s5 + $0x38] sm:$0xff] %v602_v59  ;;  %v332_v6 = vmul.f32 %v1092_v15, %v246_v21  ;;  %v413_v11 = vadd.f32 %v1118_v12, %v327_v24  ;;  %v414_v14 = vadd.f32 %v1123_v13, %v328_v60 }
  0x37   : > { %667 = vst [vmem:[%s908_s5 + $0x40] sm:$0xff] %v603_v56  ;;  %v415_v18 = vadd.f32 %v885_v8, %v329_v61  ;;  %v333_v57 = vmul.f32 %v875_v4, %v247_v58  ;;  %v540_v19 = vadd.f32 %v935_v25, %v412_v10  ;;  %v416_v20 = vadd.f32 %v1106_v2, %v330_v17  ;;  %v250_v58 = vld [vmem:[%s872_s23 + $0x98] sm:$0xff]  ;;  %v252_v61 = vld [vmem:[%s872_s23 + $0xa8] sm:$0xff]  ;;  %v253_v10 = vld [vmem:[%s872_s23 + $0xb0] sm:$0xff] }
  0x38   : > { %v417_v63 = vadd.f32 %v1118_v12, %v331_v3  ;;  %v418_v7 = vadd.f32 %v1123_v13, %v332_v6  ;;  %v541_v62 = vadd.f32 %v938_v26, %v413_v11  ;;  %v542_v0 = vadd.f32 %v941_v27, %v414_v14  ;;  %v249_v26 = vld [vmem:[%s872_s23 + $0x90] sm:$0xff]  ;;  %v251_v27 = vld [vmem:[%s872_s23 + $0xa0] sm:$0xff] }
  0x39   : > { %v543_v5 = vadd.f32 %v944_v28, %v415_v18  ;;  %v419_v21 = vadd.f32 %v885_v8, %v333_v57  ;;  %v604_v25 = vmax.f32 %v540_v19, 0.0  ;;  %v544_v23 = vadd.f32 %v947_v29, %v416_v20  ;;  %v254_v29 = vld [vmem:[%s872_s23 + $0xb8] sm:$0xff]  ;;  %v255_v6 = vld [vmem:[%s872_s23 + $0xc0] sm:$0xff] }
  0x3a   : > { %v545_v59 = vadd.f32 %v950_v30, %v417_v63  ;;  %v546_v1 = vadd.f32 %v953_v31, %v418_v7  ;;  %v605_v28 = vmax.f32 %v541_v62, 0.0  ;;  %v606_v56 = vmax.f32 %v542_v0, 0.0 }
  0x3b   : > { %v607_v24 = vmax.f32 %v543_v5, 0.0  ;;  %v547_v60 = vadd.f32 %v956_v32, %v419_v21  ;;  %668 = vst [vmem:[%s908_s5 + $0x48] sm:$0xff] %v604_v25  ;;  %v608_v30 = vmax.f32 %v544_v23, 0.0  ;;  %v334_v3 = vmul.f32 %v903_v16, %v248_v22 }
  0x3c   : > { %v609_v31 = vmax.f32 %v545_v59, 0.0  ;;  %v610_v17 = vmax.f32 %v546_v1, 0.0  ;;  %669 = vst [vmem:[%s908_s5 + $0x50] sm:$0xff] %v605_v28  ;;  %670 = vst [vmem:[%s908_s5 + $0x58] sm:$0xff] %v606_v56  ;;  %v335_v32 = vmul.f32 %v1087_v9, %v249_v26  ;;  %v336_v14 = vmul.f32 %v1092_v15, %v250_v58 }
  0x3d   : > { %671 = vst [vmem:[%s908_s5 + $0x60] sm:$0xff] %v607_v24  ;;  %v611_v11 = vmax.f32 %v547_v60, 0.0  ;;  %v337_v18 = vmul.f32 %v875_v4, %v251_v27  ;;  %672 = vst [vmem:[%s908_s5 + $0x68] sm:$0xff] %v608_v30  ;;  %v420_v57 = vadd.f32 %v1106_v2, %v334_v3  ;;  %v338_v19 = vmul.f32 %v903_v16, %v252_v61  ;;  %v256_v27 = vld [vmem:[%s872_s23 + $0xc8] sm:$0xff]  ;;  %v258_v60 = vld [vmem:[%s872_s23 + $0xd8] sm:$0xff] }
  0x3e   : > { %673 = vst [vmem:[%s908_s5 + $0x70] sm:$0xff] %v609_v31  ;;  %674 = vst [vmem:[%s908_s5 + $0x78] sm:$0xff] %v610_v17  ;;  %v339_v20 = vmul.f32 %v1087_v9, %v253_v10  ;;  %v340_v63 = vmul.f32 %v1092_v15, %v254_v29  ;;  %v421_v7 = vadd.f32 %v1118_v12, %v335_v32  ;;  %v260_v30 = vld [vmem:[%s872_s23 + $0xe8] sm:$0xff]  ;;  %v261_v31 = vld [vmem:[%s872_s23 + $0xf0] sm:$0xff] }
  0x3f   : > { %675 = vst [vmem:[%s908_s5 + $0x80] sm:$0xff] %v611_v11  ;;  %v422_v62 = vadd.f32 %v1123_v13, %v336_v14  ;;  %v423_v0 = vadd.f32 %v885_v8, %v337_v18  ;;  %v341_v5 = vmul.f32 %v875_v4, %v255_v6  ;;  %v548_v21 = vadd.f32 %v959_v33, %v420_v57  ;;  %v263_v6 = vld [vmem:[%s872_s23 + $0x100] sm:$0xff] }
  0x40   : > { %v424_v22 = vadd.f32 %v1106_v2, %v338_v19  ;;  %v425_v25 = vadd.f32 %v1118_v12, %v339_v20  ;;  %v426_v23 = vadd.f32 %v1123_v13, %v340_v63  ;;  %v549_v59 = vadd.f32 %v962_v34, %v421_v7  ;;  %v257_v34 = vld [vmem:[%s872_s23 + $0xd0] sm:$0xff] }
  0x41   : > { %v550_v1 = vadd.f32 %v965_v35, %v422_v62  ;;  %v551_v26 = vadd.f32 %v968_v36, %v423_v0  ;;  %v427_v58 = vadd.f32 %v885_v8, %v341_v5  ;;  %v612_v33 = vmax.f32 %v548_v21, 0.0  ;;  %v259_v35 = vld [vmem:[%s872_s23 + $0xe0] sm:$0xff] }
  0x42   : > { %v552_v28 = vadd.f32 %v971_v37, %v424_v22  ;;  %v553_v56 = vadd.f32 %v974_v38, %v425_v25  ;;  %v554_v24 = vadd.f32 %v977_v39, %v426_v23  ;;  %v613_v36 = vmax.f32 %v549_v59, 0.0  ;;  %v262_v37 = vld [vmem:[%s872_s23 + $0xf8] sm:$0xff] }
  0x43   : > { %v614_v61 = vmax.f32 %v550_v1, 0.0  ;;  %v615_v10 = vmax.f32 %v551_v26, 0.0  ;;  %v555_v29 = vadd.f32 %v980_v40, %v427_v58  ;;  %676 = vst [vmem:[%s908_s5 + $0x88] sm:$0xff] %v612_v33  ;;  %v342_v3 = vmul.f32 %v903_v16, %v256_v27  ;;  %v264_v58 = vld [vmem:[%s872_s23 + $0x108] sm:$0xff] }
  0x44   : > { %v616_v38 = vmax.f32 %v552_v28, 0.0  ;;  %v617_v39 = vmax.f32 %v553_v56, 0.0  ;;  %v618_v17 = vmax.f32 %v554_v24, 0.0  ;;  %677 = vst [vmem:[%s908_s5 + $0x90] sm:$0xff] %v613_v36  ;;  %v343_v40 = vmul.f32 %v1087_v9, %v257_v34  ;;  %v266_v56 = vld [vmem:[%s872_s23 + $0x118] sm:$0xff]  ;;  %v269_v36 = vld [vmem:[%s872_s23 + $0x130] sm:$0xff] }
  0x45   : > { %678 = vst [vmem:[%s908_s5 + $0x98] sm:$0xff] %v614_v61  ;;  %679 = vst [vmem:[%s908_s5 + $0xa0] sm:$0xff] %v615_v10  ;;  %v619_v11 = vmax.f32 %v555_v29, 0.0  ;;  %v344_v32 = vmul.f32 %v1092_v15, %v258_v60  ;;  %v345_v14 = vmul.f32 %v875_v4, %v259_v35  ;;  %v428_v18 = vadd.f32 %v1106_v2, %v342_v3  ;;  %v268_v35 = vld [vmem:[%s872_s23 + $0x128] sm:$0xff]  ;;  %v271_v29 = vld [vmem:[%s872_s23 + $0x140] sm:$0xff] }
  0x46   : > { %680 = vst [vmem:[%s908_s5 + $0xa8] sm:$0xff] %v616_v38  ;;  %681 = vst [vmem:[%s908_s5 + $0xb0] sm:$0xff] %v617_v39  ;;  %v346_v57 = vmul.f32 %v903_v16, %v260_v30  ;;  %v347_v19 = vmul.f32 %v1087_v9, %v261_v31  ;;  %v348_v20 = vmul.f32 %v1092_v15, %v262_v37 }
  0x47   : > { %682 = vst [vmem:[%s908_s5 + $0xb8] sm:$0xff] %v618_v17  ;;  %683 = vst [vmem:[%s908_s5 + $0xc0] sm:$0xff] %v619_v11  ;;  %v429_v63 = vadd.f32 %v1118_v12, %v343_v40  ;;  %v430_v7 = vadd.f32 %v1123_v13, %v344_v32  ;;  %v431_v62 = vadd.f32 %v885_v8, %v345_v14 }
  0x48   : > { %v349_v0 = vmul.f32 %v875_v4, %v263_v6  ;;  %v556_v5 = vadd.f32 %v983_v41, %v428_v18  ;;  %v432_v21 = vadd.f32 %v1106_v2, %v346_v57  ;;  %v433_v22 = vadd.f32 %v1118_v12, %v347_v19 }
  0x49   : > { %v434_v25 = vadd.f32 %v1123_v13, %v348_v20  ;;  %v557_v23 = vadd.f32 %v986_v42, %v429_v63  ;;  %v558_v59 = vadd.f32 %v989_v43, %v430_v7  ;;  %v559_v1 = vadd.f32 %v992_v44, %v431_v62  ;;  %v265_v42 = vld [vmem:[%s872_s23 + $0x110] sm:$0xff]  ;;  %v267_v43 = vld [vmem:[%s872_s23 + $0x120] sm:$0xff] }
  0x4a   : > { %v435_v26 = vadd.f32 %v885_v8, %v349_v0  ;;  %v620_v41 = vmax.f32 %v556_v5, 0.0  ;;  %v560_v27 = vadd.f32 %v995_v45, %v432_v21  ;;  %v561_v33 = vadd.f32 %v998_v46, %v433_v22  ;;  %v270_v45 = vld [vmem:[%s872_s23 + $0x138] sm:$0xff]  ;;  %v272_v0 = vld [vmem:[%s872_s23 + $0x148] sm:$0xff] }
  0x4b   : > { %v562_v28 = vadd.f32 %v1001_v47, %v434_v25  ;;  %v621_v44 = vmax.f32 %v557_v23, 0.0  ;;  %v622_v24 = vmax.f32 %v558_v59, 0.0  ;;  %v623_v34 = vmax.f32 %v559_v1, 0.0  ;;  %v274_v25 = vld [vmem:[%s872_s23 + $0x158] sm:$0xff]  ;;  %v1481_v1 = vld [vmem:[#allocation2_spill] sm:$0xff] }
  0x4c   : > { %v563_v60 = vadd.f32 %v1004_v48, %v435_v26  ;;  %684 = vst [vmem:[%s908_s5 + $0xc8] sm:$0xff] %v620_v41  ;;  %v624_v46 = vmax.f32 %v560_v27, 0.0  ;;  %v625_v47 = vmax.f32 %v561_v33, 0.0  ;;  %v350_v10 = vmul.f32 %v903_v16, %v264_v58  ;;  %v276_v58 = vld [vmem:[%s872_s23 + $0x168] sm:$0xff]  ;;  %v277_v41 = vld [vmem:[%s872_s23 + $0x170] sm:$0xff] }
  0x4d   : > { %v626_v61 = vmax.f32 %v562_v28, 0.0  ;;  %685 = vst [vmem:[%s908_s5 + $0xd0] sm:$0xff] %v621_v44  ;;  %686 = vst [vmem:[%s908_s5 + $0xd8] sm:$0xff] %v622_v24  ;;  %v351_v48 = vmul.f32 %v1087_v9, %v265_v42  ;;  %v352_v31 = vmul.f32 %v1092_v15, %v266_v56  ;;  %v353_v37 = vmul.f32 %v875_v4, %v267_v43  ;;  %v279_v28 = vld [vmem:[%s872_s23 + $0x180] sm:$0xff] }
  0x4e   : > { %687 = vst [vmem:[%s908_s5 + $0xe0] sm:$0xff] %v623_v34  ;;  %v627_v30 = vmax.f32 %v563_v60, 0.0  ;;  %688 = vst [vmem:[%s908_s5 + $0xe8] sm:$0xff] %v624_v46  ;;  %v436_v38 = vadd.f32 %v1106_v2, %v350_v10  ;;  %v354_v39 = vmul.f32 %v903_v16, %v268_v35  ;;  %v355_v17 = vmul.f32 %v1087_v9, %v269_v36 }
  0x4f   : > { %689 = vst [vmem:[%s908_s5 + $0xf0] sm:$0xff] %v625_v47  ;;  %690 = vst [vmem:[%s908_s5 + $0xf8] sm:$0xff] %v626_v61  ;;  %v356_v3 = vmul.f32 %v1092_v15, %v270_v45  ;;  %v437_v6 = vadd.f32 %v1118_v12, %v351_v48  ;;  %v438_v11 = vadd.f32 %v1123_v13, %v352_v31  ;;  %v1482_v61 = vld [vmem:[#allocation3_spill] sm:$0xff]  ;;  %v1483_v31 = vld [vmem:[#allocation4_spill] sm:$0xff] }
  0x50   : > { %691 = vst [vmem:[%s908_s5 + $0x100] sm:$0xff] %v627_v30  ;;  %v439_v40 = vadd.f32 %v885_v8, %v353_v37  ;;  %v357_v32 = vmul.f32 %v875_v4, %v271_v29  ;;  %v564_v14 = vadd.f32 %v1007_v49, %v436_v38  ;;  %v440_v18 = vadd.f32 %v1106_v2, %v354_v39  ;;  %v1484_v38 = vld [vmem:[#allocation5_spill] sm:$0xff] }
  0x51   : > { %v441_v57 = vadd.f32 %v1118_v12, %v355_v17  ;;  %v442_v19 = vadd.f32 %v1123_v13, %v356_v3  ;;  %v565_v20 = vadd.f32 %v1010_v50, %v437_v6  ;;  %v566_v63 = vadd.f32 %v1013_v51, %v438_v11  ;;  %v273_v50 = vld [vmem:[%s872_s23 + $0x150] sm:$0xff]  ;;  %v275_v51 = vld [vmem:[%s872_s23 + $0x160] sm:$0xff]  ;;  %v280_v11 = vld [vmem:[%s872_s23 + $0x188] sm:$0xff] }
  0x52   : > { %v567_v7 = vadd.f32 %v1016_v52, %v439_v40  ;;  %v443_v62 = vadd.f32 %v885_v8, %v357_v32  ;;  %v628_v49 = vmax.f32 %v564_v14, 0.0  ;;  %v568_v5 = vadd.f32 %v1019_v53, %v440_v18  ;;  %v278_v53 = vld [vmem:[%s872_s23 + $0x178] sm:$0xff]  ;;  %v1485_v17 = vld [vmem:[#allocation6_spill] sm:$0xff]  ;;  %v1486_v32 = vld [vmem:[#allocation7_spill] sm:$0xff] }
  0x53   : > { %v569_v21 = vadd.f32 %v1022_v54, %v441_v57  ;;  %v570_v22 = vadd.f32 %v1025_v55, %v442_v19  ;;  %v629_v52 = vmax.f32 %v565_v20, 0.0  ;;  %v630_v23 = vmax.f32 %v566_v63, 0.0  ;;  %v1487_v18 = vld [vmem:[#allocation8_spill] sm:$0xff]  ;;  %v1488_v19 = vld [vmem:[#allocation9_spill] sm:$0xff] }
  0x54   : > { %v631_v59 = vmax.f32 %v567_v7, 0.0  ;;  %v571_v26 = vadd.f32 %v1481_v1, %v443_v62  ;;  %692 = vst [vmem:[%s908_s5 + $0x108] sm:$0xff] %v628_v49  ;;  %v632_v54 = vmax.f32 %v568_v5, 0.0  ;;  %v358_v33 = vmul.f32 %v903_v16, %v272_v0  ;;  %v281_v63 = vld [vmem:[%s872_s23 + $0x190] sm:$0xff]  ;;  %v282_v7 = vld [vmem:[%s872_s23 + $0x198] sm:$0xff]  ;;  %v283_v62 = vld [vmem:[%s872_s23 + $0x1a0] sm:$0xff] }
  0x55   : > { %v633_v55 = vmax.f32 %v569_v21, 0.0  ;;  %v634_v27 = vmax.f32 %v570_v22, 0.0  ;;  %693 = vst [vmem:[%s908_s5 + $0x110] sm:$0xff] %v629_v52  ;;  %694 = vst [vmem:[%s908_s5 + $0x118] sm:$0xff] %v630_v23  ;;  %v359_v56 = vmul.f32 %v1087_v9, %v273_v50  ;;  %v360_v43 = vmul.f32 %v1092_v15, %v274_v25  ;;  %v1489_v21 = vld [vmem:[#allocation10_spill] sm:$0xff]  ;;  %v284_v50 = vld [vmem:[%s872_s23 + $0x1a8] sm:$0xff] }
  0x56   : > { %695 = vst [vmem:[%s908_s5 + $0x120] sm:$0xff] %v631_v59  ;;  %v635_v42 = vmax.f32 %v571_v26, 0.0  ;;  %v361_v44 = vmul.f32 %v875_v4, %v275_v51  ;;  %696 = vst [vmem:[%s908_s5 + $0x128] sm:$0xff] %v632_v54  ;;  %v444_v24 = vadd.f32 %v1106_v2, %v358_v33  ;;  %v362_v34 = vmul.f32 %v903_v16, %v276_v58  ;;  %v285_v25 = vld [vmem:[%s872_s23 + $0x1b0] sm:$0xff]  ;;  %v286_v51 = vld [vmem:[%s872_s23 + $0x1b8] sm:$0xff] }
  0x57   : > { %697 = vst [vmem:[%s908_s5 + $0x130] sm:$0xff] %v633_v55  ;;  %698 = vst [vmem:[%s908_s5 + $0x138] sm:$0xff] %v634_v27  ;;  %v363_v60 = vmul.f32 %v1087_v9, %v277_v41  ;;  %v364_v35 = vmul.f32 %v1092_v15, %v278_v53  ;;  %v445_v36 = vadd.f32 %v1118_v12, %v359_v56  ;;  %v287_v26 = vld [vmem:[%s872_s23 + $0x1c0] sm:$0xff] }
  0x58   : > { %699 = vst [vmem:[%s908_s5 + $0x140] sm:$0xff] %v635_v42  ;;  %v446_v45 = vadd.f32 %v1123_v13, %v360_v43  ;;  %v447_v46 = vadd.f32 %v885_v8, %v361_v44  ;;  %v365_v47 = vmul.f32 %v875_v4, %v279_v28  ;;  %v572_v10 = vadd.f32 %v1482_v61, %v444_v24  ;;  %v1490_v24 = vld [vmem:[#allocation11_spill] sm:$0xff] }
  0x59   : > { %v448_v29 = vadd.f32 %v1106_v2, %v362_v34  ;;  %v449_v30 = vadd.f32 %v1118_v12, %v363_v60  ;;  %v450_v48 = vadd.f32 %v1123_v13, %v364_v35  ;;  %v573_v37 = vadd.f32 %v1483_v31, %v445_v36 }
  0x5a   : > { %v574_v39 = vadd.f32 %v1484_v38, %v446_v45  ;;  %v575_v3 = vadd.f32 %v1485_v17, %v447_v46  ;;  %v451_v6 = vadd.f32 %v885_v8, %v365_v47  ;;  %v636_v40 = vmax.f32 %v572_v10, 0.0  ;;  %v1491_v45 = vld [vmem:[#allocation12_spill] sm:$0xff]  ;;  %v1492_v47 = vld [vmem:[#allocation13_spill] sm:$0xff]  ;;  %v1493_v10 = vld [vmem:[#allocation14_spill] sm:$0xff] }
  0x5b   : > { %v576_v14 = vadd.f32 %v1486_v32, %v448_v29  ;;  %v577_v57 = vadd.f32 %v1487_v18, %v449_v30  ;;  %v578_v20 = vadd.f32 %v1488_v19, %v450_v48  ;;  %v637_v0 = vmax.f32 %v573_v37, 0.0  ;;  %v288_v48 = vld [vmem:[%s872_s23 + $0x1c8] sm:$0xff]  ;;  %v291_v32 = vld [vmem:[%s872_s23 + $0x1e0] sm:$0xff] }
  0x5c   : > { %v638_v49 = vmax.f32 %v574_v39, 0.0  ;;  %v639_v5 = vmax.f32 %v575_v3, 0.0  ;;  %v579_v22 = vadd.f32 %v1489_v21, %v451_v6  ;;  %700 = vst [vmem:[%s908_s5 + $0x148] sm:$0xff] %v636_v40  ;;  %v366_v1 = vmul.f32 %v903_v16, %v280_v11  ;;  %v1494_v37 = vld [vmem:[#allocation15_spill] sm:$0xff]  ;;  %v1495_v39 = vld [vmem:[#allocation16_spill] sm:$0xff]  ;;  %v1496_v3 = vld [vmem:[#allocation17_spill] sm:$0xff] }
  0x5d   : > { %v640_v52 = vmax.f32 %v576_v14, 0.0  ;;  %v641_v23 = vmax.f32 %v577_v57, 0.0  ;;  %v642_v59 = vmax.f32 %v578_v20, 0.0  ;;  %701 = vst [vmem:[%s908_s5 + $0x150] sm:$0xff] %v637_v0  ;;  %v367_v41 = vmul.f32 %v1087_v9, %v281_v63  ;;  %v289_v11 = vld [vmem:[%s872_s23 + $0x1d0] sm:$0xff]  ;;  %v290_v40 = vld [vmem:[%s872_s23 + $0x1d8] sm:$0xff] }
  0x5e   : > { %702 = vst [vmem:[%s908_s5 + $0x158] sm:$0xff] %v638_v49  ;;  %703 = vst [vmem:[%s908_s5 + $0x160] sm:$0xff] %v639_v5  ;;  %v643_v58 = vmax.f32 %v579_v22, 0.0  ;;  %v368_v53 = vmul.f32 %v1092_v15, %v282_v7  ;;  %v369_v54 = vmul.f32 %v875_v4, %v283_v62  ;;  %v452_v55 = vadd.f32 %v1106_v2, %v366_v1  ;;  %v1497_v19 = vld [vmem:[#allocation18_spill] sm:$0xff]  ;;  %v292_v63 = vld [vmem:[%s872_s23 + $0x1e8] sm:$0xff] }
  0x5f   : > { %704 = vst [vmem:[%s908_s5 + $0x168] sm:$0xff] %v640_v52  ;;  %705 = vst [vmem:[%s908_s5 + $0x170] sm:$0xff] %v641_v23  ;;  %v370_v27 = vmul.f32 %v903_v16, %v284_v50  ;;  %v371_v33 = vmul.f32 %v1087_v9, %v285_v25  ;;  %v372_v28 = vmul.f32 %v1092_v15, %v286_v51  ;;  %v293_v7 = vld [vmem:[%s872_s23 + $0x1f0] sm:$0xff]  ;;  %v294_v62 = vld [vmem:[%s872_s23 + $0x1f8] sm:$0xff] }
  0x60   : > { %706 = vst [vmem:[%s908_s5 + $0x178] sm:$0xff] %v642_v59  ;;  %707 = vst [vmem:[%s908_s5 + $0x180] sm:$0xff] %v643_v58  ;;  %v453_v42 = vadd.f32 %v1118_v12, %v367_v41  ;;  %v454_v56 = vadd.f32 %v1123_v13, %v368_v53  ;;  %v455_v43 = vadd.f32 %v885_v8, %v369_v54 }
  0x61   : > { %v373_v44 = vmul.f32 %v875_v4, %v287_v26  ;;  %v580_v34 = vadd.f32 %v1490_v24, %v452_v55  ;;  %v456_v60 = vadd.f32 %v1106_v2, %v370_v27  ;;  %v457_v35 = vadd.f32 %v1118_v12, %v371_v33  ;;  %v1500_v27 = vld [vmem:[#allocation21_spill] sm:$0xff] }
  0x62   : > { %v458_v36 = vadd.f32 %v1123_v13, %v372_v28  ;;  %v581_v46 = vadd.f32 %v1491_v45, %v453_v42  ;;  %v582_v61 = vadd.f32 %v1492_v47, %v454_v56  ;;  %v583_v29 = vadd.f32 %v1493_v10, %v455_v43  ;;  %v1501_v28 = vld [vmem:[#allocation22_spill] sm:$0xff]  ;;  %v1502_v56 = vld [vmem:[#allocation23_spill] sm:$0xff] }
  0x63   : > { %v459_v30 = vadd.f32 %v885_v8, %v373_v44  ;;  %v644_v31 = vmax.f32 %v580_v34, 0.0  ;;  %v584_v38 = vadd.f32 %v1494_v37, %v456_v60  ;;  %v585_v17 = vadd.f32 %v1495_v39, %v457_v35 }
  0x64   : > { %v586_v6 = vadd.f32 %v1496_v3, %v458_v36  ;;  %v645_v14 = vmax.f32 %v581_v46, 0.0  ;;  %v646_v18 = vmax.f32 %v582_v61, 0.0  ;;  %v647_v57 = vmax.f32 %v583_v29, 0.0 }
  0x65   : > { %v587_v20 = vadd.f32 %v1497_v19, %v459_v30  ;;  %708 = vst [vmem:[%s908_s5 + $0x188] sm:$0xff] %v644_v31  ;;  %v648_v0 = vmax.f32 %v584_v38, 0.0  ;;  %v649_v49 = vmax.f32 %v585_v17, 0.0  ;;  %v374_v21 = vmul.f32 %v903_v16, %v288_v48 }
  0x66   : > { %v650_v5 = vmax.f32 %v586_v6, 0.0  ;;  %709 = vst [vmem:[%s908_s5 + $0x190] sm:$0xff] %v645_v14  ;;  %710 = vst [vmem:[%s908_s5 + $0x198] sm:$0xff] %v646_v18  ;;  %v375_v50 = vmul.f32 %v1087_v9, %v289_v11  ;;  %v376_v25 = vmul.f32 %v1092_v15, %v290_v40  ;;  %v377_v51 = vmul.f32 %v875_v4, %v291_v32  ;;  %v1498_v4 = vld [vmem:[#allocation19_spill] sm:$0xff] }
  0x67   : > { %711 = vst [vmem:[%s908_s5 + $0x1a0] sm:$0xff] %v647_v57  ;;  %v651_v22 = vmax.f32 %v587_v20, 0.0  ;;  %712 = vst [vmem:[%s908_s5 + $0x1a8] sm:$0xff] %v648_v0  ;;  %v460_v52 = vadd.f32 %v1106_v2, %v374_v21  ;;  %v378_v23 = vmul.f32 %v903_v16, %v292_v63  ;;  %v379_v59 = vmul.f32 %v1087_v9, %v293_v7  ;;  %v1499_v9 = vld [vmem:[#allocation20_spill] sm:$0xff] }
  0x68   : > { %713 = vst [vmem:[%s908_s5 + $0x1b0] sm:$0xff] %v649_v49  ;;  %714 = vst [vmem:[%s908_s5 + $0x1b8] sm:$0xff] %v650_v5  ;;  %v380_v1 = vmul.f32 %v1092_v15, %v294_v62  ;;  %v461_v26 = vadd.f32 %v1118_v12, %v375_v50  ;;  %v462_v58 = vadd.f32 %v1123_v13, %v376_v25 }
  0x69   : > { %715 = vst [vmem:[%s908_s5 + $0x1c0] sm:$0xff] %v651_v22  ;;  %v463_v41 = vadd.f32 %v885_v8, %v377_v51  ;;  %v588_v53 = vadd.f32 %v1498_v4, %v460_v52  ;;  %v464_v54 = vadd.f32 %v1106_v2, %v378_v23  ;;  %v465_v55 = vadd.f32 %v1118_v12, %v379_v59  ;;  %v1503_v2 = vld [vmem:[#allocation24_spill] sm:$0xff]  ;;  %v1504_v12 = vld [vmem:[#allocation25_spill] sm:$0xff] }
  0x6a   : > { %v466_v16 = vadd.f32 %v1123_v13, %v380_v1  ;;  %v589_v15 = vadd.f32 %v1499_v9, %v461_v26  ;;  %v590_v33 = vadd.f32 %v1500_v27, %v462_v58 }
  0x6b   : > { %v591_v42 = vadd.f32 %v1501_v28, %v463_v41  ;;  %v652_v8 = vmax.f32 %v588_v53, 0.0  ;;  %v592_v43 = vadd.f32 %v1502_v56, %v464_v54  ;;  %v593_v44 = vadd.f32 %v1503_v2, %v465_v55 }
  0x6c   : > { %v594_v24 = vadd.f32 %v1504_v12, %v466_v16  ;;  %v653_v34 = vmax.f32 %v589_v15, 0.0  ;;  %v654_v13 = vmax.f32 %v590_v33, 0.0 }
  0x6d   : > { %v655_v60 = vmax.f32 %v591_v42, 0.0  ;;  %716 = vst [vmem:[%s908_s5 + $0x1c8] sm:$0xff] %v652_v8  ;;  %v656_v35 = vmax.f32 %v592_v43, 0.0  ;;  %v657_v36 = vmax.f32 %v593_v44, 0.0 }
  0x6e   : > { %v658_v45 = vmax.f32 %v594_v24, 0.0  ;;  %717 = vst [vmem:[%s908_s5 + $0x1d0] sm:$0xff] %v653_v34  ;;  %718 = vst [vmem:[%s908_s5 + $0x1d8] sm:$0xff] %v654_v13 }
  0x6f   : > { %719 = vst [vmem:[%s908_s5 + $0x1e0] sm:$0xff] %v655_v60  ;;  %720 = vst [vmem:[%s908_s5 + $0x1e8] sm:$0xff] %v656_v35 }
  0x70   : > { %721 = vst [vmem:[%s908_s5 + $0x1f0] sm:$0xff] %v657_v36  ;;  %722 = vst [vmem:[%s908_s5 + $0x1f8] sm:$0xff] %v658_v45 }
  0x71 PF: > { %s14_s15 = sadd.s32 1, %s826_s15  }
  0x72   : > { %p11_p4 = scmp.ge.s32.totalorder %s14_s15, 6  }
  0x74   :  { %13 = sbr.rel (!%p11_p4) target bundleno = 1 (0x1), region = 69 }

// kernel: bottleneck_forward.5
= control target key start
LH: loop header
LB: loop body
LE: loop exit
PB: predicated region body
PF: predicated region fallthrough
CT: control target
= control target key end

     0   :  { %s3348_s21 = smov 0   ;;  %s5265_s0 = inlined_call_operand.vmem [shape: f32[512,128], index: 0, kind: input, shape index: {}]   ;;  %s5266_s1 = inlined_call_operand.vmem [shape: f32[1,128], index: 1, kind: input, shape index: {}]   ;;  %s5267_s2 = inlined_call_operand.vmem [shape: f32[1,128], index: 2, kind: input, shape index: {}]   ;;  %s5268_s3 = inlined_call_operand.vmem [shape: f32[256,2], index: 3, kind: input, shape index: {}]   ;;  %s5269_s4 = inlined_call_operand.vmem [shape: f32[3,384,128], index: 4, kind: input, shape index: {}]   ;;  %s5270_s5 = inlined_call_operand.vmem [shape: f32[512,128], index: 5, kind: output, shape index: {0}]   ;;  %s5271_s6 = inlined_call_operand.vmem [shape: f32[2,2,128], index: 6, kind: output, shape index: {1}]  }
   0x1 LB: > { %s3354_s22 = sadd.s32 4294967295, %s3308_s21   ;;  %p2762_p0 = scmp.ge.s32.totalorder %s3308_s21, 1  ;;  %s3308_s21 = sphi %s3348_s21, %s17_s21  }
   0x2   : > { %p216_p1 = scmp.lt.s32.totalorder %s3308_s21, 3 }
   0x4   : > { %p217_p2 = pnand %p2762_p0, %p216_p1 }
   0x6   : > { %220 = sbr.rel (%p217_p2) target bundleno = 602 (0x25a), region = 40 }
   0xb   : > { %v561_v0 = vld [vmem:[%s5269_s4 + $0x178] sm:$0xff]  ;;  %v560_v2 = vld [vmem:[%s5269_s4 + $0x170] sm:$0xff]  ;;  %s2763_s29 = sshll.u32 %s3354_s22, 5  ;;  %v3310_v3 = vmov 0.0   ;;  %v559_v5 = vld [vmem:[%s5269_s4 + $0x168] sm:$0xff]  ;;  %p262_p4 = scmp.lt.s32.totalorder %s3354_s22, 1 }
   0xc   : > { %v529_v1 = vld [vmem:[%s5269_s4 + $0x78] sm:$0xff]  ;;  %562 = vmatprep.subr.mxu0 %v3310_v3  ;;  %408 = vst [vmem:[#allocation2] sm:$0xff] %v3310_v3  ;;  %409 = vst [vmem:[#allocation2 + $0x8] sm:$0xff] %v3310_v3  ;;  %3012 = vmatprep.subr.mxu1 %v561_v0  ;;  %v528_v4 = vld [vmem:[%s5269_s4 + $0x70] sm:$0xff]  ;;  %p251_p3 = scmp.lt.s32.totalorder %s2763_s29, 63  ;;  %vm2668_vm0 = vcmask 1040384  }
   0xd   : > { %410 = vst [vmem:[#allocation2 + $0x10] sm:$0xff] %v3310_v3  ;;  %411 = vst [vmem:[#allocation2 + $0x118] sm:$0xff] %v3310_v3  ;;  %563 = vmatpush1.msra.mxu0 %v529_v1  ;;  %3013 = vmatpush3.msra.mxu1 %v561_v0  ;;  %v527_v6 = vld [vmem:[%s5269_s4 + $0x68] sm:$0xff]  ;;  %v558_v7 = vld [vmem:[%s5269_s4 + $0x160] sm:$0xff]  ;;  %s5406_s22 = smov (!%p262_p4, %s3354_s22), 1 }
   0xe   : > { %412 = vst [vmem:[#allocation2 + $0x120] sm:$0xff] %v3310_v3  ;;  %413 = vst [vmem:[#allocation2 + $0x128] sm:$0xff] %v3310_v3  ;;  %564 = vmatprep.subr.mxu0 %v3310_v3  ;;  %3014 = vmatprep.subr.mxu1 %v560_v2  ;;  %s5404_s29 = smov (!%p251_p3, %s2763_s29), 63  ;;  %v526_v8 = vld [vmem:[%s5269_s4 + $0x60] sm:$0xff]  ;;  %v557_v9 = vld [vmem:[%s5269_s4 + $0x158] sm:$0xff] }
   0xf   : > { %565 = vmatpush1.msra.mxu0 %v528_v4  ;;  %3015 = vmatpush3.msra.mxu1 %v560_v2  ;;  %s2764_s16 = sshll.u32 %s5404_s29, 3  ;;  %v525_v10 = vld [vmem:[%s5269_s4 + $0x58] sm:$0xff]  ;;  %v556_v11 = vld [vmem:[%s5269_s4 + $0x150] sm:$0xff]  ;;  %v555_v13 = vld [vmem:[%s5269_s4 + $0x148] sm:$0xff]  ;;  %s2767_s29 = sshll.u32 %s5406_s22, 1 }
  0x10   : > { %566 = vmatprep.subr.mxu0 %v3310_v3  ;;  %3016 = vmatprep.subr.mxu1 %v559_v5  ;;  %s3407_s25 = scalar_lea.vmem %s5265_s0, %s2764_s16  ;;  %v524_v12 = vld [vmem:[%s5269_s4 + $0x50] sm:$0xff]  ;;  %v523_v14 = vld [vmem:[%s5269_s4 + $0x48] sm:$0xff]  ;;  %v3428_v17 = vld [vmem:[%s5266_s1] ss:$0 sm:$0xff]  ;;  %s5155_s27 = scalar_lea.vmem %s5270_s5, %s2764_s16 }
  0x11   : > { %567 = vmatpush1.msra.mxu0 %v527_v6  ;;  %3017 = vmatpush3.msra.mxu1 %v559_v5  ;;  %v267_v15 = vld [vmem:[%s3407_s25 + $0x8] sm:$0xff]  ;;  %v268_v16 = vld [vmem:[%s3407_s25 + $0x10] sm:$0xff]  ;;  %v3433_v18 = vld [vmem:[%s5267_s2] ss:$0 sm:$0xff]  ;;  %s265_s30 = scalar_lea.vmem %s5271_s6, %s2767_s29 }
  0x12   : > { %568 = vmatprep.subr.mxu0 %v3310_v3  ;;  %3018 = vmatprep.subr.mxu1 %v558_v7  ;;  %v554_v19 = vld [vmem:[%s5269_s4 + $0x140] sm:$0xff]  ;;  %v306_v20 = vmul.f32 %v3428_v17, %v267_v15  ;;  %v307_v21 = vmul.f32 %v3428_v17, %v268_v16  ;;  %v269_v22 = vld [vmem:[%s3407_s25 + $0x18] sm:$0xff]  ;;  %v271_v30 = vld [vmem:[%s3407_s25 + $0x28] sm:$0xff] }
  0x13   : > { %569 = vmatpush1.msra.mxu0 %v526_v8  ;;  %3019 = vmatpush3.msra.mxu1 %v558_v7  ;;  %v522_v23 = vld [vmem:[%s5269_s4 + $0x40] sm:$0xff]  ;;  %v308_v24 = vmul.f32 %v3428_v17, %v269_v22  ;;  %v553_v26 = vld [vmem:[%s5269_s4 + $0x138] sm:$0xff]  ;;  %v310_v33 = vmul.f32 %v3428_v17, %v271_v30  ;;  %v272_v34 = vld [vmem:[%s3407_s25 + $0x30] sm:$0xff] }
  0x14   : > { %570 = vmatprep.subr.mxu0 %v3310_v3  ;;  %3020 = vmatprep.subr.mxu1 %v557_v9  ;;  %v270_v25 = vld [vmem:[%s3407_s25 + $0x20] sm:$0xff]  ;;  %v345_v27 = vadd.f32 %v3433_v18, %v306_v20  ;;  %v346_v28 = vadd.f32 %v3433_v18, %v307_v21  ;;  %v521_v31 = vld [vmem:[%s5269_s4 + $0x38] sm:$0xff]  ;;  %v552_v35 = vld [vmem:[%s5269_s4 + $0x130] sm:$0xff]  ;;  %v311_v39 = vmul.f32 %v3428_v17, %v272_v34 }
  0x15   : > { %571 = vmatpush1.msra.mxu0 %v525_v10  ;;  %3021 = vmatpush3.msra.mxu1 %v557_v9  ;;  %v309_v29 = vmul.f32 %v3428_v17, %v270_v25  ;;  %v347_v32 = vadd.f32 %v3433_v18, %v308_v24  ;;  %v273_v40 = vld [vmem:[%s3407_s25 + $0x38] sm:$0xff]  ;;  %v520_v41 = vld [vmem:[%s5269_s4 + $0x30] sm:$0xff]  ;;  %v349_v43 = vadd.f32 %v3433_v18, %v310_v33  ;;  %v274_v45 = vld [vmem:[%s3407_s25 + $0x40] sm:$0xff] }
  0x16   : > { %572 = vmatprep.subr.mxu0 %v3310_v3  ;;  %3022 = vmatprep.subr.mxu1 %v556_v11  ;;  %v3464_v36 = vmax.f32 %v345_v27, 0.0  ;;  %v3466_v37 = vmax.f32 %v346_v28, 0.0  ;;  %v312_v44 = vmul.f32 %v3428_v17, %v273_v40  ;;  %v551_v46 = vld [vmem:[%s5269_s4 + $0x128] sm:$0xff]  ;;  %v350_v48 = vadd.f32 %v3433_v18, %v311_v39  ;;  %v276_v55 = vld [vmem:[%s3407_s25 + $0x50] sm:$0xff]  ;;  %v550_v56 = vld [vmem:[%s5269_s4 + $0x120] sm:$0xff] }
  0x17   : > { %573 = vmatpush1.msra.mxu0 %v524_v12  ;;  %3023 = vmatpush3.msra.mxu1 %v556_v11  ;;  %v348_v38 = vadd.f32 %v3433_v18, %v309_v29  ;;  %v3475_v42 = vmax.f32 %v347_v32, 0.0  ;;  %v313_v49 = vmul.f32 %v3428_v17, %v274_v45  ;;  %v275_v50 = vld [vmem:[%s3407_s25 + $0x48] sm:$0xff]  ;;  %v3495_v52 = vmax.f32 %v349_v43, 0.0  ;;  %v277_v60 = vld [vmem:[%s3407_s25 + $0x58] sm:$0xff]  ;;  %v518_v61 = vld [vmem:[%s5269_s4 + $0x20] sm:$0xff] }
  0x18   : > { %574 = vmatprep.subr.mxu0 %v3310_v3  ;;  %3024 = vmatprep.subr.mxu1 %v555_v13  ;;  %415 = vst [vmem:[#allocation2 + $0x20] sm:$0xff] %v3464_v36  ;;  %416 = vst [vmem:[#allocation2 + $0x28] sm:$0xff] %v3466_v37  ;;  %v519_v51 = vld [vmem:[%s5269_s4 + $0x28] sm:$0xff]  ;;  %v351_v53 = vadd.f32 %v3433_v18, %v312_v44  ;;  %v314_v54 = vmul.f32 %v3428_v17, %v275_v50  ;;  %v3504_v57 = vmax.f32 %v350_v48, 0.0  ;;  %v278_v1 = vld [vmem:[%s3407_s25 + $0x60] sm:$0xff] }
  0x19   : > { %575 = vmatpush1.msra.mxu0 %v523_v14  ;;  %3025 = vmatpush3.msra.mxu1 %v555_v13  ;;  %v3485_v47 = vmax.f32 %v348_v38, 0.0  ;;  %417 = vst [vmem:[#allocation2 + $0x30] sm:$0xff] %v3475_v42  ;;  %v352_v58 = vadd.f32 %v3433_v18, %v313_v49  ;;  %v315_v59 = vmul.f32 %v3428_v17, %v276_v55  ;;  %419 = vst [vmem:[#allocation2 + $0x40] sm:$0xff] %v3495_v52  ;;  %v549_v2 = vld [vmem:[%s5269_s4 + $0x118] sm:$0xff]  ;;  %v279_v7 = vld [vmem:[%s3407_s25 + $0x68] sm:$0xff] }
  0x1a   : > { %576 = vmatprep.subr.mxu0 %v3310_v3  ;;  %3026 = vmatprep.subr.mxu1 %v554_v19  ;;  %v3514_v62 = vmax.f32 %v351_v53, 0.0  ;;  %v353_v63 = vadd.f32 %v3433_v18, %v314_v54  ;;  %v316_v0 = vmul.f32 %v3428_v17, %v277_v60  ;;  %420 = vst [vmem:[#allocation2 + $0x48] sm:$0xff] %v3504_v57  ;;  %v517_v8 = vld [vmem:[%s5269_s4 + $0x18] sm:$0xff]  ;;  %v280_v12 = vld [vmem:[%s3407_s25 + $0x70] sm:$0xff]  ;;  %v282_v24 = vld [vmem:[%s3407_s25 + $0x80] sm:$0xff] }
  0x1b   : > { %577 = vmatpush1.msra.mxu0 %v522_v23  ;;  %3027 = vmatpush3.msra.mxu1 %v554_v19  ;;  %418 = vst [vmem:[#allocation2 + $0x38] sm:$0xff] %v3485_v47  ;;  %v3523_v4 = vmax.f32 %v352_v58, 0.0  ;;  %v354_v5 = vadd.f32 %v3433_v18, %v315_v59  ;;  %v317_v6 = vmul.f32 %v3428_v17, %v278_v1  ;;  %v548_v13 = vld [vmem:[%s5269_s4 + $0x110] sm:$0xff]  ;;  %v281_v19 = vld [vmem:[%s3407_s25 + $0x78] sm:$0xff]  ;;  %v547_v25 = vld [vmem:[%s5269_s4 + $0x108] sm:$0xff] }
  0x1c   : > { %578 = vmatprep.subr.mxu0 %v3310_v3  ;;  %3028 = vmatprep.subr.mxu1 %v553_v26  ;;  %421 = vst [vmem:[#allocation2 + $0x50] sm:$0xff] %v3514_v62  ;;  %v3533_v9 = vmax.f32 %v353_v63, 0.0  ;;  %v355_v10 = vadd.f32 %v3433_v18, %v316_v0  ;;  %v318_v11 = vmul.f32 %v3428_v17, %v279_v7  ;;  %v516_v20 = vld [vmem:[%s5269_s4 + $0x10] sm:$0xff]  ;;  %v283_v29 = vld [vmem:[%s3407_s25 + $0x88] sm:$0xff]  ;;  %v546_v34 = vld [vmem:[%s5269_s4 + $0x100] sm:$0xff] }
  0x1d   : > { %579 = vmatpush1.msra.mxu0 %v521_v31  ;;  %3029 = vmatpush3.msra.mxu1 %v553_v26  ;;  %422 = vst [vmem:[#allocation2 + $0x58] sm:$0xff] %v3523_v4  ;;  %v3542_v14 = vmax.f32 %v354_v5, 0.0  ;;  %v356_v15 = vadd.f32 %v3433_v18, %v317_v6  ;;  %v319_v16 = vmul.f32 %v3428_v17, %v280_v12  ;;  %v515_v30 = vld [vmem:[%s5269_s4 + $0x8] sm:$0xff]  ;;  %v266_v39 = vld [vmem:[%s3407_s25] sm:$0xff]  ;;  %v284_v45 = vld [vmem:[%s3407_s25 + $0x90] sm:$0xff] }
  0x1e   : > { %580 = vmatprep.subr.mxu0 %v3310_v3  ;;  %3030 = vmatprep.subr.mxu1 %v552_v35  ;;  %423 = vst [vmem:[#allocation2 + $0x60] sm:$0xff] %v3533_v9  ;;  %v3552_v21 = vmax.f32 %v355_v10, 0.0  ;;  %v357_v22 = vadd.f32 %v3433_v18, %v318_v11  ;;  %v320_v23 = vmul.f32 %v3428_v17, %v281_v19  ;;  %v514_v40 = vld [vmem:[%s5269_s4] sm:$0xff]  ;;  %v285_v50 = vld [vmem:[%s3407_s25 + $0x98] sm:$0xff]  ;;  %v287_v1 = vld [vmem:[%s3407_s25 + $0xa8] sm:$0xff] }
  0x1f   : > { %581 = vmatpush1.msra.mxu0 %v520_v41  ;;  %3031 = vmatpush3.msra.mxu1 %v552_v35  ;;  %424 = vst [vmem:[#allocation2 + $0x68] sm:$0xff] %v3542_v14  ;;  %v3561_v26 = vmax.f32 %v356_v15, 0.0  ;;  %v358_v27 = vadd.f32 %v3433_v18, %v319_v16  ;;  %v321_v28 = vmul.f32 %v3428_v17, %v282_v24  ;;  %v545_v58 = vld [vmem:[%s5269_s4 + $0xf8] sm:$0xff]  ;;  %v288_v10 = vld [vmem:[%s3407_s25 + $0xb0] sm:$0xff]  ;;  %v543_v24 = vld [vmem:[%s5269_s4 + $0xe8] sm:$0xff] }
  0x20   : > { %582 = vmatprep.subr.mxu0 %v3310_v3  ;;  %3032 = vmatprep.subr.mxu1 %v551_v46  ;;  %425 = vst [vmem:[#allocation2 + $0x70] sm:$0xff] %v3552_v21  ;;  %v3571_v31 = vmax.f32 %v357_v22, 0.0  ;;  %v359_v32 = vadd.f32 %v3433_v18, %v320_v23  ;;  %v322_v33 = vmul.f32 %v3428_v17, %v283_v29  ;;  %v2785_v59 = vld [vmem:[%s5269_s4 + $0x1f8] sm:$0xff]  ;;  %v2784_v11 = vld [vmem:[%s5269_s4 + $0x1f0] sm:$0xff]  ;;  %v290_v23 = vld [vmem:[%s3407_s25 + $0xc0] sm:$0xff] }
  0x21   : > { %583 = vmatpush1.msra.mxu0 %v519_v51  ;;  %3033 = vmatpush3.msra.mxu1 %v551_v46  ;;  %426 = vst [vmem:[#allocation2 + $0x78] sm:$0xff] %v3561_v26  ;;  %v3579_v35 = vmax.f32 %v358_v27, 0.0  ;;  %v360_v38 = vadd.f32 %v3433_v18, %v321_v28  ;;  %v305_v44 = vmul.f32 %v3428_v17, %v266_v39  ;;  %v3593_v46 = vld [vmem:[#allocation2 + $0x27] sm:$0xff]  ;;  %v3601_v51 = vld [vmem:[#allocation2 + $0x2f] sm:$0xff]  ;;  %v289_v15 = vld [vmem:[%s3407_s25 + $0xb8] sm:$0xff] }
  0x22   : > { %584 = vmatprep.subr.mxu0 %v3310_v3  ;;  %3034 = vmatprep.subr.mxu1 %v550_v56  ;;  %427 = vst [vmem:[#allocation2 + $0x80] sm:$0xff] %v3571_v31  ;;  %v3588_v41 = vmax.f32 %v359_v32, 0.0  ;;  %v361_v43 = vadd.f32 %v3433_v18, %v322_v33  ;;  %v323_v49 = vmul.f32 %v3428_v17, %v284_v45  ;;  %v3630_v5 = vld [vmem:[#allocation2 + $0x37] sm:$0xff]  ;;  %v3647_v16 = vld [vmem:[#allocation2 + $0x3f] sm:$0xff]  ;;  %v291_v29 = vld [vmem:[%s3407_s25 + $0xc8] sm:$0xff] }
  0x23   : > { %585 = vmatpush1.msra.mxu0 %v518_v61  ;;  %3035 = vmatpush3.msra.mxu1 %v550_v56  ;;  %428 = vst [vmem:[#allocation2 + $0x88] sm:$0xff] %v3579_v35  ;;  %v3596_v48 = vmax.f32 %v360_v38, 0.0  ;;  %v344_v54 = vadd.f32 %v3433_v18, %v305_v44  ;;  %v324_v55 = vmul.f32 %v3428_v17, %v285_v50  ;;  %v286_v56 = vld [vmem:[%s3407_s25 + $0xa0] sm:$0xff]  ;;  %v293_v45 = vld [vmem:[%s3407_s25 + $0xd8] sm:$0xff] }
  0x24   : > { %586 = vmatprep.subr.mxu0 %v3310_v3  ;;  %3036 = vmatprep.subr.mxu1 %v549_v2  ;;  %429 = vst [vmem:[#allocation2 + $0x90] sm:$0xff] %v3588_v41  ;;  %v3604_v53 = vmax.f32 %v361_v43, 0.0  ;;  %v362_v60 = vadd.f32 %v3433_v18, %v323_v49  ;;  %v325_v61 = vmul.f32 %v3428_v17, %v286_v56  ;;  %v542_v38 = vld [vmem:[%s5269_s4 + $0xe0] sm:$0xff] }
  0x25   : > { %587 = vmatpush1.msra.mxu0 %v517_v8  ;;  %3037 = vmatpush3.msra.mxu1 %v549_v2  ;;  %430 = vst [vmem:[#allocation2 + $0x98] sm:$0xff] %v3596_v48  ;;  %v3621_v63 = vmax.f32 %v344_v54, 0.0  ;;  %v363_v0 = vadd.f32 %v3433_v18, %v324_v55  ;;  %v544_v2 = vld [vmem:[%s5269_s4 + $0xf0] sm:$0xff]  ;;  %v326_v8 = vmul.f32 %v3428_v17, %v287_v1  ;;  %v3678_v39 = vld [vmem:[#allocation2 + $0x47] sm:$0xff] }
  0x26   : > { %588 = vmatprep.subr.mxu0 %v3310_v3  ;;  %3038 = vmatprep.subr.mxu1 %v548_v13  ;;  %431 = vst [vmem:[#allocation2 + $0xa0] sm:$0xff] %v3604_v53  ;;  %v3632_v6 = vmax.f32 %v362_v60, 0.0  ;;  %v364_v7 = vadd.f32 %v3433_v18, %v325_v61  ;;  %v328_v22 = vmul.f32 %v3428_v17, %v289_v15  ;;  %v2782_v49 = vld [vmem:[%s5269_s4 + $0x1e0] sm:$0xff]  ;;  %v296_v1 = vld [vmem:[%s3407_s25 + $0xf0] sm:$0xff] }
  0x27   : > { %589 = vmatpush1.msra.mxu0 %v516_v20  ;;  %3039 = vmatpush3.msra.mxu1 %v548_v13  ;;  %414 = vst [vmem:[#allocation2 + $0x18] sm:$0xff] %v3621_v63  ;;  %v3641_v12 = vmax.f32 %v363_v0, 0.0  ;;  %v327_v13 = vmul.f32 %v3428_v17, %v288_v10  ;;  %v365_v20 = vadd.f32 %v3433_v18, %v326_v8  ;;  %v294_v56 = vld [vmem:[%s3407_s25 + $0xe0] sm:$0xff]  ;;  %v295_v0 = vld [vmem:[%s3407_s25 + $0xe8] sm:$0xff] }
  0x28   : > { %590 = vmatprep.subr.mxu0 %v3310_v3  ;;  %3040 = vmatprep.subr.mxu1 %v547_v25  ;;  %432 = vst [vmem:[#allocation2 + $0xa8] sm:$0xff] %v3632_v6  ;;  %v3650_v19 = vmax.f32 %v364_v7, 0.0  ;;  %v329_v28 = vmul.f32 %v3428_v17, %v290_v23  ;;  %v367_v32 = vadd.f32 %v3433_v18, %v328_v22  ;;  %v2781_v7 = vld [vmem:[%s5269_s4 + $0x1d8] sm:$0xff]  ;;  %v540_v23 = vld [vmem:[%s5269_s4 + $0xd0] sm:$0xff] }
  0x29   : > { %591 = vmatpush1.msra.mxu0 %v515_v30  ;;  %3041 = vmatpush3.msra.mxu1 %v547_v25  ;;  %v2783_v25 = vld [vmem:[%s5269_s4 + $0x1e8] sm:$0xff]  ;;  %433 = vst [vmem:[#allocation2 + $0xb0] sm:$0xff] %v3641_v12  ;;  %v366_v27 = vadd.f32 %v3433_v18, %v327_v13  ;;  %v3668_v30 = vmax.f32 %v365_v20, 0.0  ;;  %v330_v33 = vmul.f32 %v3428_v17, %v291_v29  ;;  %v297_v22 = vld [vmem:[%s3407_s25 + $0xf8] sm:$0xff] }
  0x2a   : > { %592 = vmatprep.subr.mxu0 %v3310_v3  ;;  %3042 = vmatprep.subr.mxu1 %v546_v34  ;;  %434 = vst [vmem:[#allocation2 + $0xb8] sm:$0xff] %v3650_v19  ;;  %v368_v43 = vadd.f32 %v3433_v18, %v329_v28  ;;  %v3689_v50 = vmax.f32 %v367_v32, 0.0  ;;  %v332_v55 = vmul.f32 %v3428_v17, %v293_v45  ;;  %v2780_v32 = vld [vmem:[%s5269_s4 + $0x1d0] sm:$0xff]  ;;  %v2779_v45 = vld [vmem:[%s5269_s4 + $0x1c8] sm:$0xff] }
  0x2b   : > { %593 = vmatpush1.msra.mxu0 %v514_v40  ;;  %3043 = vmatpush3.msra.mxu1 %v546_v34  ;;  %v292_v34 = vld [vmem:[%s3407_s25 + $0xd0] sm:$0xff]  ;;  %v3680_v40 = vmax.f32 %v366_v27, 0.0  ;;  %435 = vst [vmem:[#allocation2 + $0xc0] sm:$0xff] %v3668_v30  ;;  %v369_v54 = vadd.f32 %v3433_v18, %v330_v33  ;;  %v333_v61 = vmul.f32 %v3428_v17, %v294_v56 }
  0x2c   : > { %3044 = vmatprep.mubr.f32.mxu1 %v3593_v46  ;;  %594 = vmatprep.subr.mxu0 %v3310_v3  ;;  %v331_v44 = vmul.f32 %v3428_v17, %v292_v34  ;;  %437 = vst [vmem:[#allocation2 + $0xd0] sm:$0xff] %v3689_v50  ;;  %v3718_v10 = vadd.f32 %v3433_v18, %v332_v55  ;;  %v3753_v34 = vld [vmem:[#allocation2 + $0x5f] sm:$0xff]  ;;  %v3791_v56 = vld [vmem:[#allocation2 + $0x6f] sm:$0xff] }
  0x2d   : > { %3045 = vmatmul.mubr.f32.vlgmr.msra.gmra.mxu1 %v3601_v51  ;;  %1321 = vmatprep.subr.mxu1 %v3310_v3  ;;  %436 = vst [vmem:[#allocation2 + $0xc8] sm:$0xff] %v3680_v40  ;;  %v3715_v8 = vmax.f32 %v369_v54, 0.0  ;;  %v335_v13 = vmul.f32 %v3428_v17, %v296_v1  ;;  %v3726_v20 = vadd.f32 %v3433_v18, %v333_v61  ;;  %v3782_v54 = vld [vmem:[#allocation2 + $0x67] sm:$0xff]  ;;  %v537_v61 = vld [vmem:[%s5269_s4 + $0xb8] sm:$0xff]  ;;  %v536_v1 = vld [vmem:[%s5269_s4 + $0xb0] sm:$0xff] }
  0x2e   : > { %595 = vmatpush2.msra.mxu0 %v545_v58  ;;  %1322 = vmatpush1.msra.mxu1 %v2785_v59  ;;  %v3696_v58 = vld [vmem:[#allocation2 + $0x4f] sm:$0xff]  ;;  %v3699_v59 = vmax.f32 %v368_v43, 0.0  ;;  %v3702_v60 = vadd.f32 %v3433_v18, %v331_v44  ;;  %v336_v29 = vmul.f32 %v3428_v17, %v297_v22  ;;  %v2778_v55 = vld [vmem:[%s5269_s4 + $0x1c0] sm:$0xff] }
  0x2f   : > { %596 = vmatprep.subr.mxu0 %v3310_v3  ;;  %1323 = vmatprep.subr.mxu1 %v3310_v3  ;;  %439 = vst [vmem:[#allocation2 + $0xe0] sm:$0xff] %v3715_v8  ;;  %v3742_v28 = vadd.f32 %v3433_v18, %v335_v13  ;;  %v5275_v33 = vmax.f32 %v3726_v20, 0.0  ;;  %v539_v44 = vld [vmem:[%s5269_s4 + $0xc8] sm:$0xff] }
  0x30   : > { %597 = vmatpush2.msra.mxu0 %v544_v2  ;;  %3047 = vmatprep.mubr.f32.mxu1 %v3630_v5  ;;  %v541_v2 = vld [vmem:[%s5269_s4 + $0xd8] sm:$0xff]  ;;  %438 = vst [vmem:[#allocation2 + $0xd8] sm:$0xff] %v3699_v59  ;;  %v5277_v15 = vmax.f32 %v3702_v60, 0.0  ;;  %v3760_v43 = vadd.f32 %v3433_v18, %v336_v29  ;;  %v535_v13 = vld [vmem:[%s5269_s4 + $0xa8] sm:$0xff] }
  0x31   : > { %1324 = vmatpush1.msra.mxu1 %v2784_v11  ;;  %598 = vmatprep.subr.mxu0 %v3310_v3  ;;  %v334_v11 = vmul.f32 %v3428_v17, %v295_v0  ;;  %5282 = vst [vmem:[#allocation4_spill] sm:$0xff] %v3742_v28  ;;  %442 = vst [vmem:[#allocation2 + $0xf8] sm:$0xff] %v5275_v33  ;;  %v2777_v0 = vld [vmem:[%s5269_s4 + $0x1b8] sm:$0xff]  ;;  %v2775_v22 = vld [vmem:[%s5269_s4 + $0x1a8] sm:$0xff] }
  0x32   : > { %3048 = vmatmul.mubr.f32.gmra.mxu1 %v3647_v16  ;;  %1325 = vmatprep.subr.mxu1 %v3310_v3  ;;  %440 = vst [vmem:[#allocation2 + $0xe8] sm:$0xff] %v5277_v15  ;;  %5283 = vst [vmem:[#allocation5_spill] sm:$0xff] %v3760_v43  ;;  %v3828_v29 = vld [vmem:[#allocation2 + $0x87] sm:$0xff] }
  0x33   : > { %599 = vmatpush2.msra.mxu0 %v543_v24  ;;  %1326 = vmatpush1.msra.mxu1 %v2783_v25  ;;  %v3734_v24 = vld [vmem:[#allocation2 + $0x57] sm:$0xff]  ;;  %v5276_v25 = vmax.f32 %v3718_v10, 0.0  ;;  %v3739_v27 = vadd.f32 %v3433_v18, %v334_v11  ;;  %v5272_v18 = vmax.f32 %v3760_v43, 0.0  ;;  %v3813_v11 = vld [vmem:[#allocation2 + $0x7f] sm:$0xff] }
  0x34   : > { %600 = vmatprep.subr.mxu0 %v3310_v3  ;;  %1327 = vmatprep.subr.mxu1 %v3310_v3  ;;  %v3913_v33 = vld [vmem:[#allocation2 + $0xcf] sm:$0xff] }
  0x35   : > { %601 = vmatpush2.msra.mxu0 %v542_v38  ;;  %3050 = vmatprep.mubr.f32.mxu1 %v3678_v39  ;;  %5281 = vst [vmem:[#allocation3_spill] sm:$0xff] %v3739_v27  ;;  %441 = vst [vmem:[#allocation2 + $0xf0] sm:$0xff] %v5276_v25  ;;  %v5274_v17 = vmax.f32 %v3739_v27, 0.0  ;;  %v5273_v38 = vmax.f32 %v3742_v28, 0.0  ;;  %v513_v27 = vld [vmem:[#allocation2 + $0x11f] sm:$0xff] }
  0x36   : > { %1328 = vmatpush1.msra.mxu1 %v2782_v49  ;;  %602 = vmatprep.subr.mxu0 %v3310_v3  ;;  %v538_v49 = vld [vmem:[%s5269_s4 + $0xc0] sm:$0xff]  ;;  %445 = vst [vmem:[#allocation2 + $0x110] sm:$0xff] %v5272_v18  ;;  %v3891_v18 = vld [vmem:[%s5269_s4 + $0x2f8] sm:$0xff] }
  0x37   : > { %3051 = vmatmul.mubr.f32.gmra.mxu1 %v3696_v58  ;;  %1329 = vmatprep.subr.mxu1 %v3310_v3  ;;  %443 = vst [vmem:[#allocation2 + $0x100] sm:$0xff] %v5274_v17  ;;  %444 = vst [vmem:[#allocation2 + $0x108] sm:$0xff] %v5273_v38  ;;  %v3898_v38 = vld [vmem:[#allocation2 + $0xbf] sm:$0xff]  ;;  %v3905_v17 = vld [vmem:[#allocation2 + $0xc7] sm:$0xff] }
  0x38   : > { %603 = vmatpush2.msra.mxu0 %v541_v2  ;;  %1330 = vmatpush1.msra.mxu1 %v2781_v7  ;;  %v3806_v2 = vld [vmem:[#allocation2 + $0x77] sm:$0xff]  ;;  %v3928_v25 = vld [vmem:[#allocation2 + $0xdf] sm:$0xff] }
  0x39   : > { %604 = vmatprep.subr.mxu0 %v3310_v3  ;;  %1331 = vmatprep.subr.mxu1 %v3310_v3  ;;  %v2776_v7 = vld [vmem:[%s5269_s4 + $0x1b0] sm:$0xff] }
  0x3a   : > { %605 = vmatpush2.msra.mxu0 %v540_v23  ;;  %3053 = vmatprep.mubr.f32.mxu1 %v3734_v24  ;;  %v534_v23 = vld [vmem:[%s5269_s4 + $0xa0] sm:$0xff] }
  0x3b   : > { %1332 = vmatpush1.msra.mxu1 %v2780_v32  ;;  %606 = vmatprep.subr.mxu0 %v3310_v3  ;;  %v2774_v32 = vld [vmem:[%s5269_s4 + $0x1a0] sm:$0xff] }
  0x3c   : > { %3054 = vmatmul.mubr.f32.gmra.mxu1 %v3753_v34  ;;  %1333 = vmatprep.subr.mxu1 %v3310_v3  ;;  %v3943_v15 = vld [vmem:[#allocation2 + $0xef] sm:$0xff] }
  0x3d   : > { %607 = vmatpush2.msra.mxu0 %v539_v44  ;;  %1334 = vmatpush1.msra.mxu1 %v2779_v45  ;;  %v3835_v44 = vld [vmem:[#allocation2 + $0x8f] sm:$0xff]  ;;  %v533_v45 = vld [vmem:[%s5269_s4 + $0x98] sm:$0xff] }
  0x3e   : > { %608 = vmatprep.subr.mxu0 %v3310_v3  ;;  %1335 = vmatprep.subr.mxu1 %v3310_v3  ;;  %v3959_v43 = vld [vmem:[#allocation2 + $0xff] sm:$0xff]  ;;  %v3975_v28 = vld [vmem:[#allocation2 + $0x10f] sm:$0xff] }
  0x3f   : > { %609 = vmatpush2.msra.mxu0 %v538_v49  ;;  %3056 = vmatprep.mubr.f32.mxu1 %v3782_v54  ;;  %v2773_v49 = vld [vmem:[%s5269_s4 + $0x198] sm:$0xff] }
  0x40   : > { %1336 = vmatpush1.msra.mxu1 %v2778_v55  ;;  %610 = vmatprep.subr.mxu0 %v3310_v3  ;;  %v532_v55 = vld [vmem:[%s5269_s4 + $0x90] sm:$0xff] }
  0x41   : > { %3057 = vmatmul.mubr.f32.gmra.mxu1 %v3791_v56  ;;  %1337 = vmatprep.subr.mxu1 %v3310_v3 }
  0x42   : > { %611 = vmatpush2.msra.mxu0 %v537_v61  ;;  %1338 = vmatpush1.msra.mxu1 %v2777_v0  ;;  %v3850_v61 = vld [vmem:[#allocation2 + $0x97] sm:$0xff] }
  0x43   : > { %612 = vmatprep.subr.mxu0 %v3310_v3  ;;  %1339 = vmatprep.subr.mxu1 %v3310_v3  ;;  %v2772_v0 = vld [vmem:[%s5269_s4 + $0x190] sm:$0xff] }
  0x44   : > { %613 = vmatpush2.msra.mxu0 %v536_v1  ;;  %3059 = vmatprep.mubr.f32.mxu1 %v3806_v2  ;;  %v3857_v1 = vld [vmem:[#allocation2 + $0x9f] sm:$0xff] }
  0x45   : > { %1340 = vmatpush1.msra.mxu1 %v2776_v7  ;;  %614 = vmatprep.subr.mxu0 %v3310_v3  ;;  %v531_v7 = vld [vmem:[%s5269_s4 + $0x88] sm:$0xff] }
  0x46   : > { %3060 = vmatmul.mubr.f32.gmra.mxu1 %v3813_v11  ;;  %1341 = vmatprep.subr.mxu1 %v3310_v3 }
  0x47   : > { %615 = vmatpush2.msra.mxu0 %v535_v13  ;;  %1342 = vmatpush1.msra.mxu1 %v2775_v22  ;;  %v2771_v13 = vld [vmem:[%s5269_s4 + $0x188] sm:$0xff]  ;;  %v530_v22 = vld [vmem:[%s5269_s4 + $0x80] sm:$0xff] }
  0x48   : > { %616 = vmatprep.subr.mxu0 %v3310_v3  ;;  %1343 = vmatprep.subr.mxu1 %v3310_v3 }
  0x49   : > { %617 = vmatpush2.msra.mxu0 %v534_v23  ;;  %3062 = vmatprep.mubr.f32.mxu1 %v3828_v29  ;;  %v480_v23 = vld [vmem:[#allocation2 + $0x17] sm:$0xff] }
  0x4a   : > { %1344 = vmatpush1.msra.mxu1 %v2774_v32  ;;  %618 = vmatprep.subr.mxu0 %v3310_v3  ;;  %v3872_v32 = vld [vmem:[#allocation2 + $0xa7] sm:$0xff] }
  0x4b   : > { %3063 = vmatmul.mubr.f32.gmra.mxu1 %v3835_v44  ;;  %1345 = vmatprep.subr.mxu1 %v3310_v3 }
  0x4c   : > { %619 = vmatpush2.msra.mxu0 %v533_v45  ;;  %1346 = vmatpush1.msra.mxu1 %v2773_v49  ;;  %v2770_v45 = vld [vmem:[%s5269_s4 + $0x180] sm:$0xff] }
  0x4d   : > { %620 = vmatprep.subr.mxu0 %v3310_v3  ;;  %1347 = vmatprep.subr.mxu1 %v3310_v3  ;;  %v478_v49 = vld [vmem:[#allocation2 + $0x7] sm:$0xff] }
  0x4e   : > { %621 = vmatpush2.msra.mxu0 %v532_v55  ;;  %3065 = vmatprep.mubr.f32.mxu1 %v3850_v61  ;;  %v3879_v55 = vld [vmem:[#allocation2 + $0xaf] sm:$0xff] }
  0x4f   : > { %1348 = vmatpush1.msra.mxu1 %v2772_v0  ;;  %622 = vmatprep.subr.mxu0 %v3310_v3  ;;  %v481_v0 = vld [vmem:[#allocation2 + $0x1f] sm:$0xff] }
  0x50   : > { %3066 = vmatmul.mubr.f32.gmra.mxu1 %v3857_v1  ;;  %1349 = vmatprep.subr.mxu1 %v3310_v3 }
  0x51   : > { %623 = vmatpush2.msra.mxu0 %v531_v7  ;;  %1350 = vmatpush1.msra.mxu1 %v2771_v13  ;;  %v2801_v7 = vld [vmem:[%s5269_s4 + $0x278] sm:$0xff] }
  0x52   : > { %624 = vmatprep.subr.mxu0 %v3310_v3  ;;  %1351 = vmatprep.subr.mxu1 %v3310_v3  ;;  %v3885_v13 = vld [vmem:[#allocation2 + $0xb7] sm:$0xff] }
  0x53   : > { %625 = vmatpush2.msra.mxu0 %v530_v22  ;;  %626 = vmatprep.mubr.f32.mxu0 %v480_v23  ;;  %v2800_v22 = vld [vmem:[%s5269_s4 + $0x270] sm:$0xff] }
  0x54   : > { %3068 = vmatprep.mubr.f32.mxu1 %v3872_v32  ;;  %1352 = vmatpush1.msra.mxu1 %v2770_v45  ;;  %v479_v45 = vld [vmem:[#allocation2 + $0xf] sm:$0xff] }
  0x55   : > { %627 = vmatmul.mubr.f32.vlgmr.msra.gmra.mxu0 %v478_v49  ;;  %3069 = vmatmul.mubr.f32.gmra.mxu1 %v3879_v55  ;;  %v2799_v49 = vld [vmem:[%s5269_s4 + $0x268] sm:$0xff] }
  0x56   : > { %1353 = vmatprep.subr.mxu1 %v3310_v3  ;;  %631 = vmatprep.mubr.f32.mxu0 %v481_v0 }
  0x57   : > { %1354 = vmatpush2.msra.mxu1 %v2801_v7  ;;  %3071 = vmatprep.mubr.f32.mxu1 %v3885_v13  ;;  %v2798_v7 = vld [vmem:[%s5269_s4 + $0x260] sm:$0xff] }
  0x58   : > { %1355 = vmatprep.subr.mxu1 %v3310_v3  ;;  %3092 = vmatprep.subr.mxu0 %v3891_v18 }
  0x59   : > { %1356 = vmatpush2.msra.mxu1 %v2800_v22  ;;  %632 = vmatmul.mubr.f32.gmra.mxu0 %v479_v45  ;;  %v2797_v22 = vld [vmem:[%s5269_s4 + $0x258] sm:$0xff] }
  0x5a   : > { %3072 = vmatmul.mubr.f32.gmra.mxu1 %v3898_v38  ;;  %1357 = vmatprep.subr.mxu1 %v3310_v3  ;;  %v3920_v45 = vld [vmem:[#allocation2 + $0xd7] sm:$0xff] }
  0x5b   : > { %1358 = vmatpush2.msra.mxu1 %v2799_v49  ;;  %636 = vmatprep.mubr.f32.mxu0 %v3593_v46  ;;  %v2796_v49 = vld [vmem:[%s5269_s4 + $0x250] sm:$0xff] }
  0x5c   : > { %1359 = vmatprep.subr.mxu1 %v3310_v3  ;;  %3074 = vmatprep.mubr.f32.mxu1 %v3905_v17 }
  0x5d   : > { %1360 = vmatpush2.msra.mxu1 %v2798_v7  ;;  %637 = vmatmul.mubr.f32.gmra.mxu0 %v480_v23  ;;  %v2795_v23 = vld [vmem:[%s5269_s4 + $0x248] sm:$0xff] }
  0x5e   : > { %3075 = vmatmul.mubr.f32.gmra.mxu1 %v3913_v33  ;;  %1361 = vmatprep.subr.mxu1 %v3310_v3  ;;  %v3935_v7 = vld [vmem:[#allocation2 + $0xe7] sm:$0xff] }
  0x5f   : > { %1362 = vmatpush2.msra.mxu1 %v2797_v22  ;;  %641 = vmatprep.mubr.f32.mxu0 %v3601_v51  ;;  %v2794_v22 = vld [vmem:[%s5269_s4 + $0x240] sm:$0xff] }
  0x60   : > { %1363 = vmatprep.subr.mxu1 %v3310_v3  ;;  %3077 = vmatprep.mubr.f32.mxu1 %v3920_v45 }
  0x61   : > { %1364 = vmatpush2.msra.mxu1 %v2796_v49  ;;  %642 = vmatmul.mubr.f32.gmra.mxu0 %v481_v0  ;;  %v2793_v0 = vld [vmem:[%s5269_s4 + $0x238] sm:$0xff] }
  0x62   : > { %3078 = vmatmul.mubr.f32.gmra.mxu1 %v3928_v25  ;;  %1365 = vmatprep.subr.mxu1 %v3310_v3  ;;  %v3951_v49 = vld [vmem:[#allocation2 + $0xf7] sm:$0xff] }
  0x63   : > { %1366 = vmatpush2.msra.mxu1 %v2795_v23  ;;  %646 = vmatprep.mubr.f32.mxu0 %v3630_v5  ;;  %v2792_v23 = vld [vmem:[%s5269_s4 + $0x230] sm:$0xff] }
  0x64   : > { %1367 = vmatprep.subr.mxu1 %v3310_v3  ;;  %3080 = vmatprep.mubr.f32.mxu1 %v3935_v7 }
  0x65   : > { %1368 = vmatpush2.msra.mxu1 %v2794_v22  ;;  %647 = vmatmul.mubr.f32.gmra.mxu0 %v3593_v46  ;;  %v2791_v46 = vld [vmem:[%s5269_s4 + $0x228] sm:$0xff] }
  0x66   : > { %3081 = vmatmul.mubr.f32.gmra.mxu1 %v3943_v15  ;;  %1369 = vmatprep.subr.mxu1 %v3310_v3  ;;  %v3967_v22 = vld [vmem:[#allocation2 + $0x107] sm:$0xff] }
  0x67   : > { %1370 = vmatpush2.msra.mxu1 %v2793_v0  ;;  %651 = vmatprep.mubr.f32.mxu0 %v3647_v16  ;;  %v2790_v0 = vld [vmem:[%s5269_s4 + $0x220] sm:$0xff] }
  0x68   : > { %1371 = vmatprep.subr.mxu1 %v3310_v3  ;;  %3083 = vmatprep.mubr.f32.mxu1 %v3951_v49 }
  0x69   : > { %1372 = vmatpush2.msra.mxu1 %v2792_v23  ;;  %652 = vmatmul.mubr.f32.gmra.mxu0 %v3601_v51  ;;  %v2789_v51 = vld [vmem:[%s5269_s4 + $0x218] sm:$0xff] }
  0x6a   : > { %3084 = vmatmul.mubr.f32.gmra.mxu1 %v3959_v43  ;;  %1373 = vmatprep.subr.mxu1 %v3310_v3  ;;  %v512_v23 = vld [vmem:[#allocation2 + $0x117] sm:$0xff] }
  0x6b   : > { %1374 = vmatpush2.msra.mxu1 %v2791_v46  ;;  %656 = vmatprep.mubr.f32.mxu0 %v3678_v39  ;;  %v2788_v46 = vld [vmem:[%s5269_s4 + $0x210] sm:$0xff] }
  0x6c   : > { %1375 = vmatprep.subr.mxu1 %v3310_v3  ;;  %3086 = vmatprep.mubr.f32.mxu1 %v3967_v22 }
  0x6d   : > { %1376 = vmatpush2.msra.mxu1 %v2790_v0  ;;  %657 = vmatmul.mubr.f32.gmra.mxu0 %v3630_v5  ;;  %v2787_v5 = vld [vmem:[%s5269_s4 + $0x208] sm:$0xff]  ;;  %v2786_v0 = vld [vmem:[%s5269_s4 + $0x200] sm:$0xff] }
  0x6e   : > { %3087 = vmatmul.mubr.f32.gmra.mxu1 %v3975_v28  ;;  %1377 = vmatprep.subr.mxu1 %v3310_v3 }
  0x6f   : > { %1378 = vmatpush2.msra.mxu1 %v2789_v51  ;;  %661 = vmatprep.mubr.f32.mxu0 %v3696_v58  ;;  %v2831_v51 = vld [vmem:[%s5269_s4 + $0x368] sm:$0xff] }
  0x70   : > { %1379 = vmatprep.subr.mxu1 %v3310_v3  ;;  %3089 = vmatprep.mubr.f32.mxu1 %v512_v23  ;;  %v4027_v23 = vld [vmem:[#allocation2] sm:$0xff] }
  0x71   : > { %1380 = vmatpush2.msra.mxu1 %v2788_v46  ;;  %662 = vmatmul.mubr.f32.gmra.mxu0 %v3647_v16  ;;  %v2833_v16 = vld [vmem:[%s5269_s4 + $0x378] sm:$0xff]  ;;  %v4114_v46 = vld [vmem:[%s5268_s3 + $0x8] sm:$0xff] }
  0x72   : > { %3090 = vmatmul.mubr.f32.gmra.mxu1 %v513_v27  ;;  %1381 = vmatprep.subr.mxu1 %v3310_v3  ;;  %v2816_v27 = vld [vmem:[%s5269_s4 + $0x2f0] sm:$0xff] }
  0x73   : > { %1382 = vmatpush2.msra.mxu1 %v2787_v5  ;;  %3093 = vmatpush3.msra.mxu0 %v3891_v18  ;;  %v2832_v18 = vld [vmem:[%s5269_s4 + $0x370] sm:$0xff]  ;;  %v4132_v5 = vld [vmem:[%s5268_s3 + $0x28] sm:$0xff] }
  0x74   : > { %1383 = vmatprep.subr.mxu1 %v3310_v3  ;;  %666 = vmatprep.mubr.f32.mxu0 %v3734_v24 }
  0x75   : > { %1384 = vmatpush2.msra.mxu1 %v2786_v0  ;;  %1385 = vmatprep.mubr.f32.mxu1 %v3621_v63  ;;  %v4163_v0 = vld [vmem:[%s5268_s3 + $0x48] sm:$0xff] }
  0x76   : > { %667 = vmatmul.mubr.f32.gmra.mxu0 %v3678_v39  ;;  %1386 = vmatmul.mubr.f32.vlgmr.msra.gmra.mxu1 %v3310_v3  ;;  %v2815_v39 = vld [vmem:[%s5269_s4 + $0x2e8] sm:$0xff] }
  0x77   : > { %1888 = vmatprep.subr.mxu1 %v3310_v3  ;;  %671 = vmatprep.mubr.f32.mxu0 %v3753_v34 }
  0x78   : > { %1889 = vmatpush1.msra.mxu1 %v2833_v16  ;;  %1390 = vmatprep.mubr.f32.mxu1 %v3464_v36  ;;  %v2819_v16 = vld [vmem:[%s5269_s4 + $0x308] sm:$0xff] }
  0x79   : > { %3094 = vmatprep.subr.mxu0 %v2816_v27  ;;  %1890 = vmatprep.subr.mxu1 %v3310_v3 }
  0x7a   : > { %672 = vmatmul.mubr.f32.gmra.mxu0 %v3696_v58  ;;  %1391 = vmatmul.mubr.f32.gmra.mxu1 %v3310_v3  ;;  %v2830_v3 = vld [vmem:[%s5269_s4 + $0x360] sm:$0xff] }
  0x7b   : > { %3095 = vmatpush3.msra.mxu0 %v2816_v27  ;;  %1891 = vmatpush1.msra.mxu1 %v2832_v18  ;;  %v2814_v58 = vld [vmem:[%s5269_s4 + $0x2e0] sm:$0xff]  ;;  %v4238_v18 = vld [vmem:[%s5268_s3 + $0x50] sm:$0xff] }
  0x7c   : > { %676 = vmatprep.mubr.f32.mxu0 %v3782_v54  ;;  %1395 = vmatprep.mubr.f32.mxu1 %v3466_v37  ;;  %v4216_v27 = vld [vmem:[%s5268_s3 + $0x40] sm:$0xff] }
  0x7d   : > { %1892 = vmatprep.subr.mxu1 %v4027_v23  ;;  %3096 = vmatprep.subr.mxu0 %v2815_v39 }
  0x7e   : > { %677 = vmatmul.mubr.f32.gmra.mxu0 %v3734_v24  ;;  %1396 = vmatmul.mubr.f32.gmra.mxu1 %v3621_v63  ;;  %v2829_v63 = vld [vmem:[%s5269_s4 + $0x358] sm:$0xff] }
  0x7f   : > { %1893 = vmatpush1.msra.mxu1 %v2831_v51  ;;  %681 = vmatprep.mubr.f32.mxu0 %v3791_v56  ;;  %v2813_v24 = vld [vmem:[%s5269_s4 + $0x2d8] sm:$0xff] }
  0x80   : > { %1400 = vmatprep.mubr.f32.mxu1 %v3475_v42  ;;  %1894 = vmatprep.subr.mxu1 %v4027_v23  ;;  %v4274_v51 = vld [vmem:[%s5268_s3 + $0x98] sm:$0xff] }
  0x81   : > { %3097 = vmatpush3.msra.mxu0 %v2815_v39  ;;  %1895 = vmatpush1.msra.mxu1 %v2830_v3  ;;  %v4256_v39 = vld [vmem:[%s5268_s3 + $0x88] sm:$0xff] }
  0x82   : > { %682 = vmatmul.mubr.f32.gmra.mxu0 %v3753_v34  ;;  %1401 = vmatmul.mubr.f32.gmra.mxu1 %v3464_v36  ;;  %v2828_v36 = vld [vmem:[%s5269_s4 + $0x350] sm:$0xff]  ;;  %v2807_v3 = vld [vmem:[%s5269_s4 + $0x2a8] sm:$0xff] }
  0x83   : > { %686 = vmatprep.mubr.f32.mxu0 %v3806_v2  ;;  %1405 = vmatprep.mubr.f32.mxu1 %v3485_v47  ;;  %v2812_v34 = vld [vmem:[%s5269_s4 + $0x2d0] sm:$0xff] }
  0x84   : > { %1896 = vmatprep.subr.mxu1 %v4027_v23  ;;  %3098 = vmatprep.subr.mxu0 %v2814_v58 }
  0x85   : > { %1897 = vmatpush1.msra.mxu1 %v2829_v63  ;;  %3099 = vmatpush3.msra.mxu0 %v2814_v58  ;;  %v2846_v58 = vld [vmem:[%s5269_s4 + $0x3e0] sm:$0xff]  ;;  %v4317_v63 = vld [vmem:[%s5268_s3 + $0xb8] sm:$0xff] }
  0x86   : > { %687 = vmatmul.mubr.f32.gmra.mxu0 %v3782_v54  ;;  %1406 = vmatmul.mubr.f32.gmra.mxu1 %v3466_v37  ;;  %v2827_v37 = vld [vmem:[%s5269_s4 + $0x348] sm:$0xff]  ;;  %v3311_v54 = vmov 0  }
  0x87   : > { %691 = vmatprep.mubr.f32.mxu0 %v3813_v11  ;;  %1410 = vmatprep.mubr.f32.mxu1 %v3495_v52 }
  0x88   : > { %1898 = vmatprep.subr.mxu1 %v4027_v23  ;;  %3100 = vmatprep.subr.mxu0 %v2813_v24 }
  0x89   : > { %1899 = vmatpush1.msra.mxu1 %v2828_v36  ;;  %3101 = vmatpush3.msra.mxu0 %v2813_v24  ;;  %v2806_v24 = vld [vmem:[%s5269_s4 + $0x2a0] sm:$0xff]  ;;  %v2844_v36 = vld [vmem:[%s5269_s4 + $0x3d0] sm:$0xff] }
  0x8a   : > { %692 = vmatmul.mubr.f32.gmra.mxu0 %v3791_v56  ;;  %1411 = vmatmul.mubr.f32.gmra.mxu1 %v3475_v42  ;;  %v4075_v42 = vld [vmem:[%s5268_s3 + $0x10] sm:$0xff]  ;;  %v2826_v56 = vld [vmem:[%s5269_s4 + $0x340] sm:$0xff] }
  0x8b   : > { %696 = vmatprep.mubr.f32.mxu0 %v3828_v29  ;;  %1415 = vmatprep.mubr.f32.mxu1 %v3504_v57 }
  0x8c   : > { %1900 = vmatprep.subr.mxu1 %v4027_v23  ;;  %3264 = vset.pattern.permute.xlu1 %v3311_v54 }
  0x8d   : > { %1901 = vmatpush1.msra.mxu1 %v2827_v37  ;;  %3102 = vmatprep.subr.mxu0 %v2812_v34  ;;  %v2805_v37 = vld [vmem:[%s5269_s4 + $0x298] sm:$0xff] }
  0x8e   : > { %697 = vmatmul.mubr.f32.gmra.mxu0 %v3806_v2  ;;  %1416 = vmatmul.mubr.f32.gmra.mxu1 %v3485_v47  ;;  %v2825_v47 = vld [vmem:[%s5269_s4 + $0x338] sm:$0xff]  ;;  %v4094_v2 = vld [vmem:[%s5268_s3] sm:$0xff] }
  0x8f   : > { %701 = vmatprep.mubr.f32.mxu0 %v3835_v44  ;;  %1420 = vmatprep.mubr.f32.mxu1 %v3514_v62 }
  0x90   : > { %1902 = vmatprep.subr.mxu1 %v4027_v23  ;;  %1024 = vperm.xlu1 %3264, %v4075_v42  }
  0x91   : > { %1903 = vmatpush1.msra.mxu1 %v2826_v56  ;;  %3103 = vmatpush3.msra.mxu0 %v2812_v34  ;;  %v2804_v34 = vld [vmem:[%s5269_s4 + $0x290] sm:$0xff]  ;;  %v2802_v56 = vld [vmem:[%s5269_s4 + $0x280] sm:$0xff] }
  0x92   : > { %702 = vmatmul.mubr.f32.gmra.mxu0 %v3813_v11  ;;  %1421 = vmatmul.mubr.f32.gmra.mxu1 %v3495_v52  ;;  %v4104_v52 = vld [vmem:[%s5268_s3 + $0x18] sm:$0xff]  ;;  %v2824_v11 = vld [vmem:[%s5269_s4 + $0x330] sm:$0xff] }
  0x93   : > { %706 = vmatprep.mubr.f32.mxu0 %v3850_v61  ;;  %1425 = vmatprep.mubr.f32.mxu1 %v3523_v4 }
  0x94   : > { %1904 = vmatprep.subr.mxu1 %v4027_v23  ;;  %3263 = vset.pattern.permute.xlu0 %v3311_v54 }
  0x95   : > { %1905 = vmatpush1.msra.mxu1 %v2825_v47  ;;  %1014 = vperm.xlu0 %3263, %v4094_v2   ;;  %v3312_v47 = vmov 1  }
  0x96   : > { %707 = vmatmul.mubr.f32.gmra.mxu0 %v3828_v29  ;;  %1426 = vmatmul.mubr.f32.gmra.mxu1 %v3504_v57  ;;  %v2811_v57 = vld [vmem:[%s5269_s4 + $0x2c8] sm:$0xff] }
  0x97   : > { %711 = vmatprep.mubr.f32.mxu0 %v3857_v1  ;;  %1430 = vmatprep.mubr.f32.mxu1 %v3533_v9  ;;  %v2823_v29 = vld [vmem:[%s5269_s4 + $0x328] sm:$0xff] }
  0x98   : > { %1906 = vmatprep.subr.mxu1 %v4027_v23  ;;  %1029 = vperm.xlu1 %3264, %v4104_v52  }
  0x99   : > { %1907 = vmatpush1.msra.mxu1 %v2824_v11  ;;  %1019 = vperm.xlu0 %3263, %v4114_v46   ;;  %v3272_v11 = vld [vmem:[#allocation2 + $0x28] sm:$0xff] }
  0x9a   : > { %712 = vmatmul.mubr.f32.gmra.mxu0 %v3835_v44  ;;  %1431 = vmatmul.mubr.f32.gmra.mxu1 %v3514_v62  ;;  %v2822_v62 = vld [vmem:[%s5269_s4 + $0x320] sm:$0xff]  ;;  %v4146_v44 = vld [vmem:[%s5268_s3 + $0x38] sm:$0xff] }
  0x9b   : > { %716 = vmatprep.mubr.f32.mxu0 %v3872_v32  ;;  %1435 = vmatprep.mubr.f32.mxu1 %v3542_v14 }
  0x9c   : > { %1908 = vmatprep.subr.mxu1 %v4027_v23  ;;  %3104 = vmatprep.subr.mxu0 %v2811_v57 }
  0x9d   : > { %1909 = vmatpush1.msra.mxu1 %v2823_v29  ;;  %1039 = vperm.xlu1 %3264, %v4132_v5   ;;  %v3274_v29 = vld [vmem:[#allocation2 + $0x38] sm:$0xff] }
  0x9e   : > { %717 = vmatmul.mubr.f32.gmra.mxu0 %v3850_v61  ;;  %1436 = vmatmul.mubr.f32.gmra.mxu1 %v3523_v4  ;;  %v2810_v4 = vld [vmem:[%s5269_s4 + $0x2c0] sm:$0xff]  ;;  %v2821_v61 = vld [vmem:[%s5269_s4 + $0x318] sm:$0xff] }
  0x9f   : > { %721 = vmatprep.mubr.f32.mxu0 %v3879_v55  ;;  %1440 = vmatprep.mubr.f32.mxu1 %v3552_v21 }
  0xa0   : > { %1910 = vmatprep.subr.mxu1 %v4027_v23  ;;  %3105 = vmatpush3.msra.mxu0 %v2811_v57  ;;  %v3273_v57 = vld [vmem:[#allocation2 + $0x30] sm:$0xff] }
  0xa1   : > { %1911 = vmatpush1.msra.mxu1 %v2822_v62  ;;  %1049 = vperm.xlu1 %3264, %v4146_v44   ;;  %v3275_v62 = vld [vmem:[#allocation2 + $0x40] sm:$0xff] }
  0xa2   : > { %722 = vmatmul.mubr.f32.gmra.mxu0 %v3857_v1  ;;  %1441 = vmatmul.mubr.f32.gmra.mxu1 %v3533_v9  ;;  %v4172_v9 = vld [vmem:[%s5268_s3 + $0x20] sm:$0xff]  ;;  %v2820_v1 = vld [vmem:[%s5269_s4 + $0x310] sm:$0xff] }
  0xa3   : > { %726 = vmatprep.mubr.f32.mxu0 %v3885_v13  ;;  %1445 = vmatprep.mubr.f32.mxu1 %v3561_v26 }
  0xa4   : > { %1912 = vmatprep.subr.mxu1 %v4027_v23  ;;  %3106 = vmatprep.subr.mxu0 %v2810_v4 }
  0xa5   : > { %1913 = vmatpush1.msra.mxu1 %v2821_v61  ;;  %1059 = vperm.xlu1 %3264, %v4163_v0   ;;  %v3276_v61 = vld [vmem:[#allocation2 + $0x48] sm:$0xff] }
  0xa6   : > { %727 = vmatmul.mubr.f32.gmra.mxu0 %v3872_v32  ;;  %1446 = vmatmul.mubr.f32.gmra.mxu1 %v3542_v14  ;;  %v4186_v32 = vld [vmem:[%s5268_s3 + $0x58] sm:$0xff]  ;;  %v4193_v14 = vld [vmem:[%s5268_s3 + $0x30] sm:$0xff] }
  0xa7   : > { %731 = vmatprep.mubr.f32.mxu0 %v3898_v38  ;;  %1450 = vmatprep.mubr.f32.mxu1 %v3571_v31 }
  0xa8   : > { %1914 = vmatprep.subr.mxu1 %v4027_v23  ;;  %1034 = vperm.xlu0 %3263, %v4172_v9  }
  0xa9   : > { %3107 = vmatpush3.msra.mxu0 %v2810_v4  ;;  %1915 = vmatpush1.msra.mxu1 %v2820_v1  ;;  %v2839_v4 = vld [vmem:[%s5269_s4 + $0x3a8] sm:$0xff]  ;;  %v3279_v1 = vld [vmem:[#allocation2 + $0x60] sm:$0xff] }
  0xaa   : > { %732 = vmatmul.mubr.f32.gmra.mxu0 %v3879_v55  ;;  %1451 = vmatmul.mubr.f32.gmra.mxu1 %v3552_v21  ;;  %v2809_v21 = vld [vmem:[%s5269_s4 + $0x2b8] sm:$0xff]  ;;  %v4211_v55 = vld [vmem:[%s5268_s3 + $0x68] sm:$0xff] }
  0xab   : > { %736 = vmatprep.mubr.f32.mxu0 %v3905_v17  ;;  %1455 = vmatprep.mubr.f32.mxu1 %v3579_v35 }
  0xac   : > { %1916 = vmatprep.subr.mxu1 %v4027_v23  ;;  %1069 = vperm.xlu1 %3264, %v4186_v32  }
  0xad   : > { %1044 = vperm.xlu0 %3263, %v4193_v14   ;;  %1917 = vmatpush1.msra.mxu1 %v2819_v16  ;;  %v5286_v16 = vmax.f32 %v3726_v20, 0.0  ;;  %v5287_v20 = vld [vmem:[#allocation3_spill] sm:$0xff] }
  0xae   : > { %737 = vmatmul.mubr.f32.gmra.mxu0 %v3885_v13  ;;  %1456 = vmatmul.mubr.f32.gmra.mxu1 %v3561_v26  ;;  %v2818_v26 = vld [vmem:[%s5269_s4 + $0x300] sm:$0xff]  ;;  %v4231_v13 = vld [vmem:[%s5268_s3 + $0x78] sm:$0xff] }
  0xaf   : > { %741 = vmatprep.mubr.f32.mxu0 %v3913_v33  ;;  %1460 = vmatprep.mubr.f32.mxu1 %v3588_v41 }
  0xb0   : > { %3108 = vmatprep.subr.mxu0 %v2809_v21  ;;  %1918 = vmatprep.subr.mxu1 %v4027_v23 }
  0xb1   : > { %1079 = vperm.xlu1 %3264, %v4211_v55   ;;  %1054 = vperm.xlu0 %3263, %v4216_v27  }
  0xb2   : > { %742 = vmatmul.mubr.f32.gmra.mxu0 %v3898_v38  ;;  %1461 = vmatmul.mubr.f32.gmra.mxu1 %v3571_v31  ;;  %v2849_v31 = vld [vmem:[%s5269_s4 + $0x3f8] sm:$0xff]  ;;  %v2808_v38 = vld [vmem:[%s5269_s4 + $0x2b0] sm:$0xff] }
  0xb3   : > { %3109 = vmatpush3.msra.mxu0 %v2809_v21  ;;  %1919 = vmatpush1.msra.mxu1 %v2818_v26  ;;  %v3283_v26 = vld [vmem:[#allocation2 + $0x78] sm:$0xff] }
  0xb4   : > { %746 = vmatprep.mubr.f32.mxu0 %v3920_v45  ;;  %1465 = vmatprep.mubr.f32.mxu1 %v3596_v48 }
  0xb5   : > { %1920 = vmatprep.subr.mxu1 %v4027_v23  ;;  %1089 = vperm.xlu1 %3264, %v4231_v13  }
  0xb6   : > { %747 = vmatmul.mubr.f32.gmra.mxu0 %v3905_v17  ;;  %1466 = vmatmul.mubr.f32.gmra.mxu1 %v3579_v35  ;;  %v4261_v35 = vld [vmem:[%s5268_s3 + $0x60] sm:$0xff]  ;;  %v2848_v17 = vld [vmem:[%s5269_s4 + $0x3f0] sm:$0xff] }
  0xb7   : > { %1064 = vperm.xlu0 %3263, %v4238_v18   ;;  %1921 = vmatpush2.msra.mxu1 %v2849_v31  ;;  %v2836_v31 = vld [vmem:[%s5269_s4 + $0x390] sm:$0xff] }
  0xb8   : > { %751 = vmatprep.mubr.f32.mxu0 %v3928_v25  ;;  %1470 = vmatprep.mubr.f32.mxu1 %v3604_v53 }
  0xb9   : > { %3110 = vmatprep.subr.mxu0 %v2808_v38  ;;  %1922 = vmatprep.subr.mxu1 %v4027_v23 }
  0xba   : > { %752 = vmatmul.mubr.f32.gmra.mxu0 %v3913_v33  ;;  %1471 = vmatmul.mubr.f32.gmra.mxu1 %v3588_v41  ;;  %v4281_v33 = vld [vmem:[%s5268_s3 + $0x70] sm:$0xff]  ;;  %v2847_v41 = vld [vmem:[%s5269_s4 + $0x3e8] sm:$0xff] }
  0xbb   : > { %1099 = vperm.xlu1 %3264, %v4256_v39   ;;  %1074 = vperm.xlu0 %3263, %v4261_v35  }
  0xbc   : > { %3111 = vmatpush3.msra.mxu0 %v2808_v38  ;;  %1923 = vmatpush2.msra.mxu1 %v2848_v17  ;;  %v4470_v38 = vld [vmem:[#allocation2 + $0xf0] sm:$0xff]  ;;  %v3285_v17 = vld [vmem:[#allocation2 + $0x80] sm:$0xff] }
  0xbd   : > { %756 = vmatprep.mubr.f32.mxu0 %v3935_v7  ;;  %1475 = vmatprep.mubr.f32.mxu1 %v3632_v6 }
  0xbe   : > { %757 = vmatmul.mubr.f32.gmra.mxu0 %v3920_v45  ;;  %1476 = vmatmul.mubr.f32.gmra.mxu1 %v3596_v48  ;;  %v4299_v45 = vld [vmem:[%s5268_s3 + $0xa8] sm:$0xff]  ;;  %v4304_v48 = vld [vmem:[%s5268_s3 + $0x80] sm:$0xff] }
  0xbf   : > { %1924 = vmatprep.subr.mxu1 %v4027_v23  ;;  %1109 = vperm.xlu1 %3264, %v4274_v51  }
  0xc0   : > { %1084 = vperm.xlu0 %3263, %v4281_v33   ;;  %1925 = vmatpush2.msra.mxu1 %v2847_v41  ;;  %v5289_v41 = vld [vmem:[#allocation4_spill] sm:$0xff] }
  0xc1   : > { %761 = vmatprep.mubr.f32.mxu0 %v3943_v15  ;;  %1480 = vmatprep.mubr.f32.mxu1 %v3641_v12 }
  0xc2   : > { %762 = vmatmul.mubr.f32.gmra.mxu0 %v3928_v25  ;;  %1481 = vmatmul.mubr.f32.gmra.mxu1 %v3604_v53  ;;  %v4324_v53 = vld [vmem:[%s5268_s3 + $0x90] sm:$0xff]  ;;  %v2845_v25 = vld [vmem:[%s5269_s4 + $0x3d8] sm:$0xff] }
  0xc3   : > { %3112 = vmatprep.subr.mxu0 %v2807_v3  ;;  %1926 = vmatprep.subr.mxu1 %v4027_v23 }
  0xc4   : > { %1119 = vperm.xlu1 %3264, %v4299_v45   ;;  %1094 = vperm.xlu0 %3263, %v4304_v48  }
  0xc5   : > { %3113 = vmatpush3.msra.mxu0 %v2807_v3  ;;  %1927 = vmatpush2.msra.mxu1 %v2846_v58  ;;  %v2835_v58 = vld [vmem:[%s5269_s4 + $0x388] sm:$0xff] }
  0xc6   : > { %766 = vmatprep.mubr.f32.mxu0 %v3951_v49  ;;  %1485 = vmatprep.mubr.f32.mxu1 %v3650_v19 }
  0xc7   : > { %767 = vmatmul.mubr.f32.gmra.mxu0 %v3935_v7  ;;  %1486 = vmatmul.mubr.f32.gmra.mxu1 %v3632_v6  ;;  %v4342_v7 = vld [vmem:[%s5268_s3 + $0xc8] sm:$0xff]  ;;  %v4347_v6 = vld [vmem:[%s5268_s3 + $0xa0] sm:$0xff] }
  0xc8   : > { %1928 = vmatprep.subr.mxu1 %v4027_v23  ;;  %1129 = vperm.xlu1 %3264, %v4317_v63  }
  0xc9   : > { %1104 = vperm.xlu0 %3263, %v4324_v53   ;;  %1929 = vmatpush2.msra.mxu1 %v2845_v25 }
  0xca   : > { %771 = vmatprep.mubr.f32.mxu0 %v3959_v43  ;;  %1490 = vmatprep.mubr.f32.mxu1 %v3668_v30 }
  0xcb   : > { %772 = vmatmul.mubr.f32.gmra.mxu0 %v3943_v15  ;;  %1491 = vmatmul.mubr.f32.gmra.mxu1 %v3641_v12  ;;  %v4365_v12 = vld [vmem:[%s5268_s3 + $0xd8] sm:$0xff]  ;;  %v4370_v15 = vld [vmem:[%s5268_s3 + $0xb0] sm:$0xff] }
  0xcc   : > { %3114 = vmatprep.subr.mxu0 %v2806_v24  ;;  %1930 = vmatprep.subr.mxu1 %v4027_v23 }
  0xcd   : > { %1139 = vperm.xlu1 %3264, %v4342_v7   ;;  %1114 = vperm.xlu0 %3263, %v4347_v6  }
  0xce   : > { %3115 = vmatpush3.msra.mxu0 %v2806_v24  ;;  %1931 = vmatpush2.msra.mxu1 %v2844_v36  ;;  %v4485_v24 = vld [vmem:[#allocation2 + $0xf8] sm:$0xff]  ;;  %v3288_v36 = vld [vmem:[#allocation2 + $0x90] sm:$0xff] }
  0xcf   : > { %776 = vmatprep.mubr.f32.mxu0 %v3967_v22  ;;  %1495 = vmatprep.mubr.f32.mxu1 %v3680_v40  ;;  %v2843_v22 = vld [vmem:[%s5269_s4 + $0x3c8] sm:$0xff] }
  0xd0   : > { %777 = vmatmul.mubr.f32.gmra.mxu0 %v3951_v49  ;;  %1496 = vmatmul.mubr.f32.gmra.mxu1 %v3650_v19  ;;  %v2803_v19 = vld [vmem:[%s5269_s4 + $0x288] sm:$0xff]  ;;  %v4391_v49 = vld [vmem:[%s5268_s3 + $0xc0] sm:$0xff] }
  0xd1   : > { %3116 = vmatprep.subr.mxu0 %v2805_v37  ;;  %1932 = vmatprep.subr.mxu1 %v4027_v23 }
  0xd2   : > { %1149 = vperm.xlu1 %3264, %v4365_v12   ;;  %1124 = vperm.xlu0 %3263, %v4370_v15  }
  0xd3   : > { %3117 = vmatpush3.msra.mxu0 %v2805_v37  ;;  %1933 = vmatpush2.msra.mxu1 %v2843_v22  ;;  %v5291_v37 = vld [vmem:[#allocation5_spill] sm:$0xff] }
  0xd4   : > { %3118 = vmatprep.subr.mxu0 %v2804_v34  ;;  %781 = vmatprep.mubr.f32.mxu0 %v3975_v28  ;;  %v2842_v28 = vld [vmem:[%s5269_s4 + $0x3c0] sm:$0xff] }
  0xd5   : > { %1500 = vmatprep.mubr.f32.mxu1 %v3689_v50  ;;  %3119 = vmatpush3.msra.mxu0 %v2804_v34  ;;  %v3289_v34 = vld [vmem:[#allocation2 + $0x98] sm:$0xff] }
  0xd6   : > { %782 = vmatmul.mubr.f32.gmra.mxu0 %v3959_v43  ;;  %1501 = vmatmul.mubr.f32.gmra.mxu1 %v3668_v30  ;;  %v4409_v30 = vld [vmem:[%s5268_s3 + $0xd0] sm:$0xff]  ;;  %v2841_v43 = vld [vmem:[%s5269_s4 + $0x3b8] sm:$0xff] }
  0xd7   : > { %3120 = vmatprep.subr.mxu0 %v2803_v19  ;;  %1934 = vmatprep.subr.mxu1 %v4027_v23 }
  0xd8   : > { %3265 = vset.pattern.permute.xlu1 %v3312_v47  ;;  %1134 = vperm.xlu0 %3263, %v4391_v49  }
  0xd9   : > { %3121 = vmatpush3.msra.mxu0 %v2803_v19  ;;  %1935 = vmatpush2.msra.mxu1 %v2842_v28  ;;  %v2834_v19 = vld [vmem:[%s5269_s4 + $0x380] sm:$0xff] }
  0xda   : > { %2343 = vperm.xlu1 %3265, %v4114_v46   ;;  %3122 = vmatprep.subr.mxu0 %v2802_v56  ;;  %v4422_v46 = vld [vmem:[%s5268_s3 + $0xe0] sm:$0xff] }
  0xdb   : > { %1505 = vmatprep.mubr.f32.mxu1 %v3699_v59  ;;  %3123 = vmatpush3.msra.mxu0 %v2802_v56  ;;  %v4501_v28 = vld [vmem:[#allocation2 + $0x100] sm:$0xff] }
  0xdc   : > { %3124 = vmatprep.mubr.f32.mxu0 %v3272_v11  ;;  %1506 = vmatmul.mubr.f32.gmra.mxu1 %v3680_v40  ;;  %v2840_v40 = vld [vmem:[%s5269_s4 + $0x3b0] sm:$0xff]  ;;  %v3291_v56 = vld [vmem:[#allocation2 + $0xa0] sm:$0xff] }
  0xdd   : > { %3125 = vmatmul.mubr.f32.vlgmr.msra.gmra.mxu0 %v3273_v57  ;;  %1936 = vmatprep.subr.mxu1 %v4027_v23  ;;  %v2864_v11 = vld [vmem:[%s5269_s4 + $0x470] sm:$0xff] }
  0xde   : > { %1144 = vperm.xlu0 %3263, %v4409_v30   ;;  %1937 = vmatpush2.msra.mxu1 %v2841_v43  ;;  %v1805_v43 = vld [vmem:[#allocation2 + $0x19] sm:$0xff] }
  0xdf   : > { %2347 = vperm.xlu1 %3265, %v4075_v42   ;;  %1510 = vmatprep.mubr.f32.mxu1 %v3715_v8  ;;  %v5284_v42 = vmax.f32 %v3702_v60, 0.0  ;;  %v5285_v60 = vmax.f32 %v3718_v10, 0.0  ;;  %v3280_v10 = vld [vmem:[#allocation2 + $0x68] sm:$0xff] }
  0xe0   : > { %3127 = vmatprep.mubr.f32.mxu0 %v3274_v29  ;;  %1511 = vmatmul.mubr.f32.gmra.mxu1 %v3689_v50  ;;  %v3277_v50 = vld [vmem:[#allocation2 + $0x50] sm:$0xff] }
  0xe1   : > { %3128 = vmatmul.mubr.f32.gmra.mxu0 %v3275_v62  ;;  %1938 = vmatprep.subr.mxu1 %v4027_v23  ;;  %v3293_v29 = vld [vmem:[#allocation2 + $0xb0] sm:$0xff]  ;;  %v1806_v62 = vld [vmem:[#allocation2 + $0x21] sm:$0xff] }
  0xe2   : > { %1154 = vperm.xlu0 %3263, %v4422_v46   ;;  %1939 = vmatpush2.msra.mxu1 %v2840_v40  ;;  %v3292_v40 = vld [vmem:[#allocation2 + $0xa8] sm:$0xff] }
  0xe3   : > { %2355 = vperm.xlu1 %3265, %v4172_v9   ;;  %1515 = vmatprep.mubr.f32.mxu1 %v5284_v42  ;;  %v3278_v9 = vld [vmem:[#allocation2 + $0x58] sm:$0xff] }
  0xe4   : > { %3130 = vmatprep.mubr.f32.mxu0 %v3276_v61  ;;  %1516 = vmatmul.mubr.f32.gmra.mxu1 %v3699_v59  ;;  %v2838_v59 = vld [vmem:[%s5269_s4 + $0x3a0] sm:$0xff] }
  0xe5   : > { %3131 = vmatmul.mubr.f32.gmra.mxu0 %v3277_v50  ;;  %1940 = vmatprep.subr.mxu1 %v4027_v23  ;;  %v3295_v50 = vld [vmem:[#allocation2 + $0xc0] sm:$0xff] }
  0xe6   : > { %3266 = vset.pattern.permute.xlu0 %v3312_v47  ;;  %1941 = vmatpush2.msra.mxu1 %v2839_v4  ;;  %v3294_v4 = vld [vmem:[#allocation2 + $0xb8] sm:$0xff] }
  0xe7   : > { %2363 = vperm.xlu1 %3265, %v4193_v14   ;;  %2339 = vperm.xlu0 %3266, %v4094_v2   ;;  %v2837_v2 = vld [vmem:[%s5269_s4 + $0x398] sm:$0xff]  ;;  %v4455_v14 = vld [vmem:[#allocation2 + $0xe8] sm:$0xff] }
  0xe8   : > { %1520 = vmatprep.mubr.f32.mxu1 %v5285_v60  ;;  %3133 = vmatprep.mubr.f32.mxu0 %v3278_v9  ;;  %v2862_v60 = vld [vmem:[%s5269_s4 + $0x460] sm:$0xff]  ;;  %v3296_v9 = vld [vmem:[#allocation2 + $0xc8] sm:$0xff] }
  0xe9   : > { %1521 = vmatmul.mubr.f32.gmra.mxu1 %v3715_v8  ;;  %3134 = vmatmul.mubr.f32.gmra.mxu0 %v3279_v1  ;;  %v3282_v8 = vld [vmem:[#allocation2 + $0x70] sm:$0xff] }
  0xea   : > { %1942 = vmatprep.subr.mxu1 %v4027_v23  ;;  %1525 = vmatprep.mubr.f32.mxu1 %v5286_v16  ;;  %v3297_v16 = vld [vmem:[#allocation2 + $0xd0] sm:$0xff] }
  0xeb   : > { %1943 = vmatpush2.msra.mxu1 %v2838_v59  ;;  %2371 = vperm.xlu1 %3265, %v4216_v27   ;;  %v5288_v27 = vmax.f32 %v5287_v20, 0.0 }
  0xec   : > { %2351 = vperm.xlu0 %3266, %v4104_v52   ;;  %3136 = vmatprep.mubr.f32.mxu0 %v3280_v10  ;;  %v2860_v10 = vld [vmem:[%s5269_s4 + $0x450] sm:$0xff] }
  0xed   : > { %1526 = vmatmul.mubr.f32.gmra.mxu1 %v4455_v14  ;;  %3137 = vmatmul.mubr.f32.gmra.mxu0 %v3282_v8  ;;  %v4458_v21 = vpop.f32.mrf.mxu1  ;;  %v2859_v8 = vld [vmem:[%s5269_s4 + $0x448] sm:$0xff] }
  0xee   : > { %1944 = vmatprep.subr.mxu1 %v4027_v23  ;;  %1530 = vmatprep.mubr.f32.mxu1 %v5288_v27  ;;  %v2858_v27 = vld [vmem:[%s5269_s4 + $0x440] sm:$0xff] }
  0xef   : > { %1945 = vmatpush2.msra.mxu1 %v2837_v2  ;;  %2379 = vperm.xlu1 %3265, %v4238_v18   ;;  %v4464_v52 = vpop.f32.mrf.mxu1  ;;  %v5290_v18 = vmax.f32 %v5289_v41, 0.0  ;;  %v3298_v2 = vld [vmem:[#allocation2 + $0xd8] sm:$0xff] }
  0xf0   : > { %2359 = vperm.xlu0 %3266, %v4132_v5   ;;  %3139 = vmatprep.mubr.f32.mxu0 %v3283_v26  ;;  %v3286_v5 = vld [vmem:[#allocation2 + $0x88] sm:$0xff] }
  0xf1   : > { %1531 = vmatmul.mubr.f32.gmra.mxu1 %v4470_v38  ;;  %3140 = vmatmul.mubr.f32.gmra.mxu0 %v3285_v17 }
  0xf2   : > { %1946 = vmatprep.subr.mxu1 %v4027_v23  ;;  %1535 = vmatprep.mubr.f32.mxu1 %v5290_v18  ;;  %v4476_v3 = vpop.f32.mrf.mxu1 }
  0xf3   : > { %1947 = vmatpush2.msra.mxu1 %v2836_v31  ;;  %2387 = vperm.xlu1 %3265, %v4261_v35   ;;  %v5292_v35 = vmax.f32 %v5291_v37, 0.0  ;;  %v2857_v31 = vld [vmem:[%s5269_s4 + $0x438] sm:$0xff] }
  0xf4   : > { %2367 = vperm.xlu0 %3266, %v4146_v44   ;;  %3142 = vmatprep.mubr.f32.mxu0 %v3286_v5  ;;  %v4483_v25 = vpop.f32.mrf.mxu1  ;;  %v2865_v44 = vld [vmem:[%s5269_s4 + $0x478] sm:$0xff]  ;;  %v4596_v5 = vld [vmem:[#allocation2 + $0x49] sm:$0xff] }
  0xf5   : > { %1536 = vmatmul.mubr.f32.gmra.mxu1 %v4485_v24  ;;  %3143 = vmatmul.mubr.f32.gmra.mxu0 %v3288_v36  ;;  %v3300_v36 = vld [vmem:[#allocation2 + $0x108] sm:$0xff]  ;;  %v2853_v37 = vld [vmem:[%s5269_s4 + $0x418] sm:$0xff] }
  0xf6   : > { %1948 = vmatprep.subr.mxu1 %v4027_v23  ;;  %1540 = vmatprep.mubr.f32.mxu1 %v5292_v35 }
  0xf7   : > { %1949 = vmatpush2.msra.mxu1 %v2835_v58  ;;  %2395 = vperm.xlu1 %3265, %v4281_v33   ;;  %v4495_v22 = vpop.f32.mrf.mxu1 }
  0xf8   : > { %2375 = vperm.xlu0 %3266, %v4163_v0   ;;  %3145 = vmatprep.mubr.f32.mxu0 %v3289_v34  ;;  %v1803_v0 = vld [vmem:[#allocation2 + $0x9] sm:$0xff] }
  0xf9   : > { %1541 = vmatmul.mubr.f32.gmra.mxu1 %v4501_v28  ;;  %3146 = vmatmul.mubr.f32.gmra.mxu0 %v3291_v56  ;;  %v4504_v33 = vpop.f32.mrf.mxu1  ;;  %v475_v34 = vld [vmem:[%s5268_s3 + $0xe8] sm:$0xff] }
  0xfa   : > { %1950 = vmatprep.subr.mxu1 %v4027_v23  ;;  %3172 = vmatprep.subr.mxu0 %v2865_v44 }
  0xfb   : > { %1951 = vmatpush2.msra.mxu1 %v2834_v19  ;;  %3173 = vmatpush3.msra.mxu0 %v2865_v44  ;;  %v3301_v44 = vld [vmem:[#allocation2 + $0x110] sm:$0xff] }
  0xfc   : > { %2403 = vperm.xlu1 %3265, %v4304_v48   ;;  %2383 = vperm.xlu0 %3266, %v4186_v32   ;;  %v4512_v57 = vpop.f32.mrf.mxu1  ;;  %v1804_v48 = vld [vmem:[#allocation2 + $0x11] sm:$0xff]  ;;  %v2863_v32 = vld [vmem:[%s5269_s4 + $0x468] sm:$0xff] }
  0xfd   : > { %3148 = vmatprep.mubr.f32.mxu0 %v3292_v40  ;;  %1952 = vmatprep.mubr.f32.mxu1 %v1805_v43 }
  0xfe   : > { %3149 = vmatmul.mubr.f32.gmra.mxu0 %v3293_v29  ;;  %1953 = vmatmul.mubr.f32.vlgmr.msra.gmra.mxu1 %v1803_v0  ;;  %v4514_v42 = vpop.f32.mrf.mxu1  ;;  %v476_v29 = vld [vmem:[%s5268_s3 + $0xf0] sm:$0xff] }
  0xff   : > { %3174 = vmatprep.subr.mxu0 %v2864_v11  ;;  %3151 = vmatprep.mubr.f32.mxu0 %v3294_v4 }
 0x100   : > { %3175 = vmatpush3.msra.mxu0 %v2864_v11  ;;  %2411 = vperm.xlu1 %3265, %v4324_v53   ;;  %v4526_v53 = vld [vmem:[#allocation2 + $0x29] sm:$0xff] }
 0x101   : > { %2391 = vperm.xlu0 %3266, %v4211_v55   ;;  %1957 = vmatprep.mubr.f32.mxu1 %v1806_v62  ;;  %v4521_v61 = vpop.f32.mrf.mxu1  ;;  %v2861_v55 = vld [vmem:[%s5269_s4 + $0x458] sm:$0xff] }
 0x102   : > { %3152 = vmatmul.mubr.f32.gmra.mxu0 %v3295_v50  ;;  %1958 = vmatmul.mubr.f32.gmra.mxu1 %v1804_v48 }
 0x103   : > { %3176 = vmatprep.subr.mxu0 %v2863_v32  ;;  %3154 = vmatprep.mubr.f32.mxu0 %v3296_v9  ;;  %v4528_v59 = vpop.f32.mrf.mxu1  ;;  %v1814_v9 = vld [vmem:[#allocation2 + $0x61] sm:$0xff] }
 0x104   : > { %3177 = vmatpush3.msra.mxu0 %v2863_v32  ;;  %2419 = vperm.xlu1 %3265, %v4347_v6  }
 0x105   : > { %2399 = vperm.xlu0 %3266, %v4231_v13   ;;  %3178 = vmatprep.subr.mxu0 %v2862_v60  ;;  %v4542_v13 = vld [vmem:[#allocation2 + $0x31] sm:$0xff] }
 0x106   : > { %1962 = vmatprep.mubr.f32.mxu1 %v4526_v53  ;;  %3179 = vmatpush3.msra.mxu0 %v2862_v60  ;;  %v4536_v1 = vpop.f32.mrf.mxu1 }
 0x107   : > { %3155 = vmatmul.mubr.f32.gmra.mxu0 %v3297_v16  ;;  %1963 = vmatmul.mubr.f32.gmra.mxu1 %v1805_v43  ;;  %v2851_v43 = vld [vmem:[%s5269_s4 + $0x408] sm:$0xff] }
 0x108   : > { %3180 = vmatprep.subr.mxu0 %v2861_v55  ;;  %2427 = vperm.xlu1 %3265, %v4370_v15   ;;  %v4544_v6 = vpop.f32.mrf.mxu1  ;;  %v3299_v15 = vld [vmem:[#allocation2 + $0xe0] sm:$0xff] }
 0x109   : > { %3181 = vmatpush3.msra.mxu0 %v2861_v55  ;;  %2407 = vperm.xlu0 %3266, %v4256_v39   ;;  %v4557_v39 = vld [vmem:[#allocation2 + $0x39] sm:$0xff] }
 0x10a   : > { %3182 = vmatprep.subr.mxu0 %v2860_v10  ;;  %3157 = vmatprep.mubr.f32.mxu0 %v3298_v2 }
 0x10b   : > { %1967 = vmatprep.mubr.f32.mxu1 %v4542_v13  ;;  %3183 = vmatpush3.msra.mxu0 %v2860_v10  ;;  %v4551_v20 = vpop.f32.mrf.mxu1  ;;  %v4649_v50 = vpop.permute.xlu1 %1024  ;;  %v1815_v10 = vld [vmem:[#allocation2 + $0x69] sm:$0xff] }
 0x10c   : > { %3158 = vmatmul.mubr.f32.gmra.mxu0 %v3299_v15  ;;  %1968 = vmatmul.mubr.f32.gmra.mxu1 %v1806_v62  ;;  %v1813_v62 = vld [vmem:[#allocation2 + $0x59] sm:$0xff]  ;;  %v1816_v15 = vld [vmem:[#allocation2 + $0x71] sm:$0xff] }
 0x10d   : > { %3184 = vmatprep.subr.mxu0 %v2859_v8  ;;  %2435 = vperm.xlu1 %3265, %v4391_v49   ;;  %v4559_v26 = vpop.f32.mrf.mxu1  ;;  %v4575_v49 = vld [vmem:[#allocation2 + $0x41] sm:$0xff] }
 0x10e   : > { %3185 = vmatpush3.msra.mxu0 %v2859_v8  ;;  %2415 = vperm.xlu0 %3266, %v4274_v51   ;;  %v2856_v51 = vld [vmem:[%s5269_s4 + $0x430] sm:$0xff] }
 0x10f   : > { %3186 = vmatprep.subr.mxu0 %v2858_v27  ;;  %3160 = vmatprep.mubr.f32.mxu0 %v4455_v14 }
 0x110   : > { %1972 = vmatprep.mubr.f32.mxu1 %v4557_v39  ;;  %3187 = vmatpush3.msra.mxu0 %v2858_v27  ;;  %v4567_v17 = vpop.f32.mrf.mxu1 }
 0x111   : > { %5293 = vst [vmem:[#allocation3_spill] sm:$0xff] %v4567_v17  ;;  %3161 = vmatmul.mubr.f32.gmra.mxu0 %v4470_v38  ;;  %1973 = vmatmul.mubr.f32.gmra.mxu1 %v4526_v53  ;;  %v2855_v38 = vld [vmem:[%s5269_s4 + $0x428] sm:$0xff] }
 0x112   : > { %3188 = vmatprep.subr.mxu0 %v2857_v31  ;;  %2443 = vperm.xlu1 %3265, %v4409_v30   ;;  %v4577_v14 = vpop.f32.mrf.mxu1  ;;  %v4799_v17 = vld [vmem:[#allocation2 + $0x109] sm:$0xff] }
 0x113   : > { %3189 = vmatpush3.msra.mxu0 %v2857_v31  ;;  %2423 = vperm.xlu0 %3266, %v4299_v45   ;;  %v2854_v45 = vld [vmem:[%s5269_s4 + $0x420] sm:$0xff]  ;;  %v4682_v31 = vpop.permute.xlu0 %1014 }
 0x114   : > { %3190 = vmatprep.subr.mxu0 %v2856_v51  ;;  %3163 = vmatprep.mubr.f32.mxu0 %v4485_v24 }
 0x115   : > { %1977 = vmatprep.mubr.f32.mxu1 %v4575_v49  ;;  %3191 = vmatpush3.msra.mxu0 %v2856_v51  ;;  %v628_v41 = vpop.f32.mrf.mxu0  ;;  %v4585_v18 = vpop.f32.mrf.mxu1 }
 0x116   : > { %5294 = vst [vmem:[#allocation4_spill] sm:$0xff] %v4585_v18  ;;  %3164 = vmatmul.mubr.f32.gmra.mxu0 %v4501_v28  ;;  %1978 = vmatmul.mubr.f32.gmra.mxu1 %v4542_v13  ;;  %v4593_v30 = vadd.f32 %v4464_v52, %v628_v41  ;;  %v1817_v41 = vld [vmem:[#allocation2 + $0x79] sm:$0xff] }
 0x117   : > { %3192 = vmatprep.subr.mxu0 %v2855_v38  ;;  %2447 = vperm.xlu1 %3265, %v4365_v12   ;;  %v630_v58 = vpop.f32.mrf.mxu0  ;;  %v4598_v24 = vpop.f32.mrf.mxu1 }
 0x118   : > { %3193 = vmatpush3.msra.mxu0 %v2855_v38  ;;  %2431 = vperm.xlu0 %3266, %v4317_v63   ;;  %v2852_v63 = vld [vmem:[%s5269_s4 + $0x410] sm:$0xff] }
 0x119   : > { %3194 = vmatprep.subr.mxu0 %v2854_v45  ;;  %3166 = vmatprep.mubr.f32.mxu0 %v3300_v36  ;;  %v633_v52 = vpop.f32.mrf.mxu0 }
 0x11a   : > { %1982 = vmatprep.mubr.f32.mxu1 %v4596_v5  ;;  %3195 = vmatpush3.msra.mxu0 %v2854_v45  ;;  %v4606_v12 = vadd.f32 %v4458_v21, %v633_v52  ;;  %v4608_v35 = vpop.f32.mrf.mxu1  ;;  %v4618_v21 = vld [vmem:[#allocation2 + $0x51] sm:$0xff] }
 0x11b   : > { %5295 = vst [vmem:[#allocation5_spill] sm:$0xff] %v4608_v35  ;;  %3167 = vmatmul.mubr.f32.gmra.mxu0 %v3301_v44  ;;  %1983 = vmatmul.mubr.f32.gmra.mxu1 %v4557_v39  ;;  %v635_v19 = vpop.f32.mrf.mxu0  ;;  %v4770_v35 = vld [vmem:[#allocation2 + $0xe9] sm:$0xff] }
 0x11c   : > { %3196 = vmatprep.subr.mxu0 %v2853_v37  ;;  %3267 = vset.pattern.permute.xlu1 %v3311_v54  ;;  %v4620_v28 = vpop.f32.mrf.mxu1 }
 0x11d   : > { %5296 = vst [vmem:[#allocation6_spill] sm:$0xff] %v4620_v28  ;;  %3197 = vmatpush3.msra.mxu0 %v2853_v37  ;;  %2439 = vperm.xlu0 %3266, %v4342_v7   ;;  %v638_v56 = vpop.f32.mrf.mxu0  ;;  %v2850_v7 = vld [vmem:[%s5269_s4 + $0x400] sm:$0xff] }
 0x11e   : > { %3198 = vmatprep.subr.mxu0 %v2852_v63  ;;  %1159 = vperm.xlu1 %3267, %v475_v34   ;;  %v4627_v0 = vadd.f32 %v4483_v25, %v638_v56  ;;  %v4629_v11 = vpop.f32.mrf.mxu1  ;;  %v1818_v37 = vld [vmem:[#allocation2 + $0x81] sm:$0xff] }
 0x11f   : > { %3169 = vmatprep.mubr.f32.mxu0 %v4027_v23  ;;  %1987 = vmatprep.mubr.f32.mxu1 %v4618_v21  ;;  %v640_v40 = vpop.f32.mrf.mxu0 }
 0x120   : > { %3199 = vmatpush3.msra.mxu0 %v2852_v63  ;;  %1988 = vmatmul.mubr.f32.gmra.mxu1 %v4575_v49  ;;  %v4640_v25 = vpop.f32.mrf.mxu1 }
 0x121   : > { %3170 = vmatmul.mubr.f32.gmra.mxu0 %v4027_v23  ;;  %3200 = vmatprep.subr.mxu0 %v2851_v43  ;;  %v643_v4 = vpop.f32.mrf.mxu0  ;;  %v477_v23 = vld [vmem:[%s5268_s3 + $0xf8] sm:$0xff] }
 0x122   : > { %3201 = vmatpush3.msra.mxu0 %v2851_v43  ;;  %2451 = vperm.xlu0 %3266, %v4422_v46   ;;  %v4645_v48 = vadd.f32 %v4476_v3, %v643_v4  ;;  %v4647_v32 = vpop.f32.mrf.mxu1  ;;  %v1820_v4 = vld [vmem:[#allocation2 + $0x91] sm:$0xff] }
 0x123   : > { %3202 = vmatprep.subr.mxu0 %v2850_v7  ;;  %1164 = vperm.xlu1 %3267, %v476_v29   ;;  %v645_v60 = vpop.f32.mrf.mxu0 }
 0x124   : > { %1992 = vmatprep.mubr.f32.mxu1 %v1813_v62  ;;  %3203 = vmatpush3.msra.mxu0 %v2850_v7  ;;  %v4654_v55 = vpop.f32.mrf.mxu1 }
 0x125   : > { %3204 = vmatprep.mubr.f32.mxu0 %v4526_v53  ;;  %1993 = vmatmul.mubr.f32.gmra.mxu1 %v4596_v5  ;;  %v648_v46 = vpop.f32.mrf.mxu0  ;;  %v4670_v53 = vpop.permute.xlu1 %1029 }
 0x126   : > { %3205 = vmatmul.mubr.f32.vlgmr.msra.gmra.mxu0 %v4542_v13  ;;  %3269 = vset.pattern.permute.xlu0 %v3311_v54  ;;  %v4661_v3 = vadd.f32 %v4504_v33, %v648_v46  ;;  %v4663_v16 = vpop.f32.mrf.mxu1 }
 0x127   : > { %1169 = vperm.xlu0 %3269, %v477_v23   ;;  %1997 = vmatprep.mubr.f32.mxu1 %v1814_v9  ;;  %v650_v2 = vpop.f32.mrf.mxu0 }
 0x128   : > { %3207 = vmatprep.mubr.f32.mxu0 %v4557_v39  ;;  %v4666_v8 = vpop.f32.mrf.mxu1  ;;  %3268 = vset.pattern.permute.xlu1 %v3312_v47 }
 0x129   : > { %1998 = vmatmul.mubr.f32.gmra.mxu1 %v4618_v21  ;;  %v653_v54 = vpop.f32.mrf.mxu0  ;;  %2455 = vperm.xlu1 %3268, %v475_v34   ;;  %v4690_v38 = vpop.permute.xlu1 %1039 }
 0x12a   : > { %3208 = vmatmul.mubr.f32.gmra.mxu0 %v4575_v49  ;;  %2002 = vmatprep.mubr.f32.mxu1 %v1815_v10  ;;  %v4674_v33 = vadd.f32 %v4495_v22, %v653_v54  ;;  %v4676_v13 = vpop.f32.mrf.mxu1  ;;  %v1822_v54 = vld [vmem:[#allocation2 + $0xa1] sm:$0xff] }
 0x12b   : > { %3210 = vmatprep.mubr.f32.mxu0 %v4596_v5  ;;  %v655_v27 = vpop.f32.mrf.mxu0  ;;  %3270 = vset.pattern.permute.xlu0 %v3312_v47 }
 0x12c   : > { %v4680_v39 = vpop.f32.mrf.mxu1  ;;  %v1823_v27 = vld [vmem:[#allocation2 + $0xa9] sm:$0xff] }
 0x12d   : > { %2003 = vmatmul.mubr.f32.gmra.mxu1 %v1813_v62  ;;  %v658_v51 = vpop.f32.mrf.mxu0  ;;  %2459 = vperm.xlu1 %3268, %v476_v29   ;;  %v4703_v63 = vpop.permute.xlu1 %1049 }
 0x12e   : > { %3211 = vmatmul.mubr.f32.gmra.mxu0 %v4618_v21  ;;  %2007 = vmatprep.mubr.f32.mxu1 %v1816_v15  ;;  %v4686_v22 = vadd.f32 %v4514_v42, %v658_v51  ;;  %v4688_v49 = vpop.f32.mrf.mxu1  ;;  %v4699_v42 = vpop.permute.xlu0 %1019 }
 0x12f   : > { %5297 = vst [vmem:[#allocation7_spill] sm:$0xff] %v4688_v49  ;;  %3213 = vmatprep.mubr.f32.mxu0 %v1813_v62  ;;  %v660_v47 = vpop.f32.mrf.mxu0 }
 0x130   : > { %v4692_v45 = vpop.f32.mrf.mxu1 }
 0x131   : > { %2008 = vmatmul.mubr.f32.gmra.mxu1 %v1814_v9  ;;  %v663_v5 = vpop.f32.mrf.mxu0  ;;  %2463 = vperm.xlu1 %3268, %v477_v23   ;;  %v4714_v62 = vpop.permute.xlu1 %1059  ;;  %v1821_v23 = vld [vmem:[#allocation2 + $0x99] sm:$0xff] }
 0x132   : > { %3214 = vmatmul.mubr.f32.gmra.mxu0 %v1814_v9  ;;  %2012 = vmatprep.mubr.f32.mxu1 %v1817_v41  ;;  %v4695_v58 = vadd.f32 %v4512_v57, %v663_v5  ;;  %v4697_v36 = vpop.f32.mrf.mxu1  ;;  %v4707_v21 = vpop.permute.xlu0 %1034  ;;  %v1819_v57 = vld [vmem:[#allocation2 + $0x89] sm:$0xff] }
 0x133   : > { %5298 = vst [vmem:[#allocation8_spill] sm:$0xff] %v4697_v36  ;;  %3216 = vmatprep.mubr.f32.mxu0 %v1815_v10  ;;  %v665_v52 = vpop.f32.mrf.mxu0  ;;  %v4766_v36 = vld [vmem:[#allocation2 + $0xe1] sm:$0xff] }
 0x134   : > { %v4701_v44 = vpop.f32.mrf.mxu1  ;;  %v1824_v52 = vld [vmem:[#allocation2 + $0xb1] sm:$0xff] }
 0x135   : > { %5299 = vst [vmem:[#allocation9_spill] sm:$0xff] %v4701_v44  ;;  %2013 = vmatmul.mubr.f32.gmra.mxu1 %v1815_v10  ;;  %v4726_v47 = vpop.permute.xlu1 %1069  ;;  %v4760_v44 = vld [vmem:[#allocation2 + $0xd9] sm:$0xff] }
 0x136   : > { %3217 = vmatmul.mubr.f32.gmra.mxu0 %v1816_v15  ;;  %2017 = vmatprep.mubr.f32.mxu1 %v1818_v37  ;;  %v668_v34 = vpop.f32.mrf.mxu0  ;;  %v4705_v19 = vpop.f32.mrf.mxu1  ;;  %5301 = vst [vmem:[#allocation11_spill] sm:$0xff] %v4726_v47 }
 0x137   : > { %3219 = vmatprep.mubr.f32.mxu0 %v1817_v41  ;;  %v4710_v56 = vadd.f32 %v4528_v59, %v668_v34  ;;  %v4719_v59 = vpop.permute.xlu0 %1044 }
 0x138   : > { %v670_v43 = vpop.f32.mrf.mxu0  ;;  %v1389_v40 = vpop.f32.mrf.mxu1 }
 0x139   : > { %2018 = vmatmul.mubr.f32.gmra.mxu1 %v1816_v15 }
 0x13a   : > { %3220 = vmatmul.mubr.f32.gmra.mxu0 %v1818_v37  ;;  %2022 = vmatprep.mubr.f32.mxu1 %v1819_v57  ;;  %v673_v7 = vpop.f32.mrf.mxu0  ;;  %v4712_v29 = vpop.f32.mrf.mxu1 }
 0x13b   : > { %3222 = vmatprep.mubr.f32.mxu0 %v1819_v57  ;;  %v4717_v60 = vadd.f32 %v4521_v61, %v673_v7  ;;  %v4733_v43 = vpop.permute.xlu0 %1054 }
 0x13c   : > { %v675_v9 = vpop.f32.mrf.mxu0  ;;  %v1394_v46 = vpop.f32.mrf.mxu1 }
 0x13d   : > { %2023 = vmatmul.mubr.f32.gmra.mxu1 %v1817_v41  ;;  %v4738_v9 = vld [vmem:[#allocation2 + $0xc1] sm:$0xff] }
 0x13e   : > { %3223 = vmatmul.mubr.f32.gmra.mxu0 %v1820_v4  ;;  %2027 = vmatprep.mubr.f32.mxu1 %v1820_v4  ;;  %v678_v10 = vpop.f32.mrf.mxu0  ;;  %v4721_v2 = vpop.f32.mrf.mxu1 }
 0x13f   : > { %3225 = vmatprep.mubr.f32.mxu0 %v1821_v23  ;;  %v4724_v15 = vadd.f32 %v4544_v6, %v678_v10  ;;  %v4735_v6 = vld [vmem:[#allocation2 + $0xb9] sm:$0xff] }
 0x140   : > { %v680_v51 = vpop.f32.mrf.mxu0  ;;  %v1399_v61 = vpop.f32.mrf.mxu1 }
 0x141   : > { %5300 = vst [vmem:[#allocation10_spill] sm:$0xff] %v4724_v15  ;;  %2028 = vmatmul.mubr.f32.gmra.mxu1 %v1818_v37  ;;  %v4747_v51 = vld [vmem:[#allocation2 + $0xc9] sm:$0xff] }
 0x142   : > { %3226 = vmatmul.mubr.f32.gmra.mxu0 %v1822_v54  ;;  %2032 = vmatprep.mubr.f32.mxu1 %v1821_v23  ;;  %v683_v5 = vpop.f32.mrf.mxu0  ;;  %v4728_v41 = vpop.f32.mrf.mxu1 }
 0x143   : > { %3228 = vmatprep.mubr.f32.mxu0 %v1823_v27  ;;  %v4731_v34 = vadd.f32 %v4536_v1, %v683_v5  ;;  %v4745_v1 = vpop.permute.xlu1 %1079  ;;  %v4749_v5 = vpop.permute.xlu0 %1064 }
 0x144   : > { %v685_v40 = vpop.f32.mrf.mxu0  ;;  %v1404_v7 = vpop.f32.mrf.mxu1  ;;  %5303 = vst [vmem:[#allocation13_spill] sm:$0xff] %v4745_v1  ;;  %5304 = vst [vmem:[#allocation14_spill] sm:$0xff] %v4749_v5  ;;  %v1837_v1 = vld [vmem:[#allocation2 + $0x119] sm:$0xff] }
 0x145   : > { %2033 = vmatmul.mubr.f32.gmra.mxu1 %v1819_v57  ;;  %v4753_v40 = vld [vmem:[#allocation2 + $0xd1] sm:$0xff] }
 0x146   : > { %3229 = vmatmul.mubr.f32.gmra.mxu0 %v1824_v52  ;;  %2037 = vmatprep.mubr.f32.mxu1 %v1822_v54  ;;  %v688_v37 = vpop.f32.mrf.mxu0  ;;  %v4743_v10 = vpop.f32.mrf.mxu1 }
 0x147   : > { %3231 = vmatprep.mubr.f32.mxu0 %v4735_v6  ;;  %v4741_v46 = vadd.f32 %v4559_v26, %v688_v37 }
 0x148   : > { %v690_v61 = vpop.f32.mrf.mxu0  ;;  %v1409_v57 = vpop.f32.mrf.mxu1 }
 0x149   : > { %5302 = vst [vmem:[#allocation12_spill] sm:$0xff] %v4741_v46  ;;  %2038 = vmatmul.mubr.f32.gmra.mxu1 %v1820_v4  ;;  %v4763_v57 = vpop.permute.xlu1 %1089  ;;  %v4786_v46 = vld [vmem:[#allocation2 + $0xf9] sm:$0xff] }
 0x14a   : > { %3232 = vmatmul.mubr.f32.gmra.mxu0 %v4738_v9  ;;  %2042 = vmatprep.mubr.f32.mxu1 %v1823_v27  ;;  %v693_v26 = vpop.f32.mrf.mxu0  ;;  %v4755_v7 = vpop.f32.mrf.mxu1  ;;  %5306 = vst [vmem:[#allocation16_spill] sm:$0xff] %v4763_v57 }
 0x14b   : > { %3234 = vmatprep.mubr.f32.mxu0 %v4747_v51  ;;  %v4758_v37 = vadd.f32 %v4551_v20, %v693_v26  ;;  %v4772_v20 = vpop.permute.xlu0 %1074 }
 0x14c   : > { %v695_v4 = vpop.f32.mrf.mxu0  ;;  %v1414_v61 = vpop.f32.mrf.mxu1  ;;  %5307 = vst [vmem:[#allocation17_spill] sm:$0xff] %v4772_v20 }
 0x14d   : > { %5305 = vst [vmem:[#allocation15_spill] sm:$0xff] %v4758_v37  ;;  %2043 = vmatmul.mubr.f32.gmra.mxu1 %v1821_v23  ;;  %v4780_v61 = vld [vmem:[#allocation2 + $0xf1] sm:$0xff] }
 0x14e   : > { %2047 = vmatprep.mubr.f32.mxu1 %v1824_v52  ;;  %3235 = vmatmul.mubr.f32.gmra.mxu0 %v4753_v40  ;;  %v698_v49 = vpop.f32.mrf.mxu0  ;;  %v4768_v28 = vpop.f32.mrf.mxu1 }
 0x14f   : > { %3237 = vmatprep.mubr.f32.mxu0 %v4760_v44  ;;  %v4775_v23 = vadd.f32 %v4577_v14, %v698_v49 }
 0x150   : > { %v700_v26 = vpop.f32.mrf.mxu0  ;;  %v1419_v4 = vpop.f32.mrf.mxu1 }
 0x151   : > { %2048 = vmatmul.mubr.f32.gmra.mxu1 %v1822_v54  ;;  %5308 = vst [vmem:[#allocation18_spill] sm:$0xff] %v4775_v23  ;;  %v4788_v54 = vpop.permute.xlu1 %1099  ;;  %v4792_v26 = vpop.permute.xlu0 %1084  ;;  %v4795_v4 = vld [vmem:[#allocation2 + $0x101] sm:$0xff] }
 0x152   : > { %2052 = vmatprep.mubr.f32.mxu1 %v4735_v6  ;;  %3238 = vmatmul.mubr.f32.gmra.mxu0 %v4766_v36  ;;  %v4782_v18 = vpop.f32.mrf.mxu0  ;;  %v4784_v57 = vpop.f32.mrf.mxu1  ;;  %5310 = vst [vmem:[#allocation20_spill] sm:$0xff] %v4788_v54  ;;  %5311 = vst [vmem:[#allocation21_spill] sm:$0xff] %v4792_v26  ;;  %v4807_v54 = vld [vmem:[#allocation2 + $0x111] sm:$0xff] }
 0x153   : > { %3240 = vmatprep.mubr.f32.mxu0 %v4770_v35  ;;  %5309 = vst [vmem:[#allocation19_spill] sm:$0xff] %v4782_v18 }
 0x154   : > { %v705_v14 = vpop.f32.mrf.mxu0  ;;  %v1424_v49 = vpop.f32.mrf.mxu1 }
 0x155   : > { %2053 = vmatmul.mubr.f32.gmra.mxu1 %v1823_v27  ;;  %v4809_v26 = vpop.permute.xlu1 %1109 }
 0x156   : > { %2057 = vmatprep.mubr.f32.mxu1 %v4738_v9  ;;  %3241 = vmatmul.mubr.f32.gmra.mxu0 %v4780_v61  ;;  %v708_v23 = vpop.f32.mrf.mxu0  ;;  %v4797_v20 = vpop.f32.mrf.mxu1  ;;  %5313 = vst [vmem:[#allocation23_spill] sm:$0xff] %v4809_v26 }
 0x157   : > { %3243 = vmatprep.mubr.f32.mxu0 %v4786_v46  ;;  %v4802_v27 = vadd.f32 %v4598_v24, %v708_v23  ;;  %v4816_v24 = vpop.permute.xlu0 %1094 }
 0x158   : > { %v710_v14 = vpop.f32.mrf.mxu0  ;;  %v1429_v49 = vpop.f32.mrf.mxu1  ;;  %5315 = vst [vmem:[#allocation25_spill] sm:$0xff] %v4816_v24 }
 0x159   : > { %2058 = vmatmul.mubr.f32.gmra.mxu1 %v1824_v52  ;;  %5312 = vst [vmem:[#allocation22_spill] sm:$0xff] %v4802_v27  ;;  %v1838_v49 = vld [vmem:[#allocation2 + $0x121] sm:$0xff] }
 0x15a   : > { %2062 = vmatprep.mubr.f32.mxu1 %v4747_v51  ;;  %3244 = vmatmul.mubr.f32.gmra.mxu0 %v4795_v4  ;;  %v4811_v18 = vpop.f32.mrf.mxu0  ;;  %v4814_v52 = vpop.f32.mrf.mxu1 }
 0x15b   : > { %3246 = vmatprep.mubr.f32.mxu0 %v4799_v17  ;;  %5314 = vst [vmem:[#allocation24_spill] sm:$0xff] %v4811_v18  ;;  %v1120_v18 = vpop.permute.xlu1 %1119  ;;  %v4826_v37 = vpop.permute.xlu0 %1104 }
 0x15c   : > { %v715_v23 = vpop.f32.mrf.mxu0  ;;  %v1434_v14 = vpop.f32.mrf.mxu1  ;;  %5318 = vst [vmem:[#allocation28_spill] sm:$0xff] %v4826_v37 }
 0x15d   : > { %2063 = vmatmul.mubr.f32.gmra.mxu1 %v4735_v6 }
 0x15e   : > { %2067 = vmatprep.mubr.f32.mxu1 %v4753_v40  ;;  %3247 = vmatmul.mubr.f32.gmra.mxu0 %v4807_v54  ;;  %v4820_v27 = vpop.f32.mrf.mxu0  ;;  %v4823_v26 = vpop.f32.mrf.mxu1 }
 0x15f   : > { %3249 = vmatprep.mubr.f32.mxu0 %v1837_v1  ;;  %5316 = vst [vmem:[#allocation26_spill] sm:$0xff] %v4820_v27  ;;  %5317 = vst [vmem:[#allocation27_spill] sm:$0xff] %v4823_v26  ;;  %v1130_v27 = vpop.permute.xlu1 %1129  ;;  %v1115_v5 = vpop.permute.xlu0 %1114 }
 0x160   : > { %v720_v6 = vpop.f32.mrf.mxu0  ;;  %v1439_v24 = vpop.f32.mrf.mxu1 }
 0x161   : > { %2068 = vmatmul.mubr.f32.gmra.mxu1 %v4738_v9 }
 0x162   : > { %2072 = vmatprep.mubr.f32.mxu1 %v4760_v44  ;;  %3250 = vmatmul.mubr.f32.gmra.mxu0 %v1838_v49  ;;  %v4829_v23 = vpop.f32.mrf.mxu0  ;;  %v4831_v1 = vpop.f32.mrf.mxu1 }
 0x163   : > { %5319 = vst [vmem:[#allocation29_spill] sm:$0xff] %v4829_v23  ;;  %5320 = vst [vmem:[#allocation30_spill] sm:$0xff] %v4831_v1  ;;  %v1125_v1 = vpop.permute.xlu0 %1124 }
 0x164   : > { %v725_v14 = vpop.f32.mrf.mxu0  ;;  %v1444_v9 = vpop.f32.mrf.mxu1 }
 0x165   : > { %2073 = vmatmul.mubr.f32.gmra.mxu1 %v4747_v51  ;;  %v1140_v9 = vpop.permute.xlu1 %1139 }
 0x166   : > { %2077 = vmatprep.mubr.f32.mxu1 %v4766_v36  ;;  %v728_v26 = vpop.f32.mrf.mxu0  ;;  %v4837_v49 = vpop.f32.mrf.mxu1 }
 0x167   : > { %v954_v24 = vadd.f32 %v4640_v25, %v728_v26 }
 0x168   : > { %v730_v51 = vpop.f32.mrf.mxu0  ;;  %v1449_v37 = vpop.f32.mrf.mxu1 }
 0x169   : > { %2078 = vmatmul.mubr.f32.gmra.mxu1 %v4753_v40  ;;  %v4839_v6 = vmul.f32 %v1115_v5, %v954_v24 }
 0x16a   : > { %2082 = vmatprep.mubr.f32.mxu1 %v4770_v35  ;;  %v733_v23 = vpop.f32.mrf.mxu0  ;;  %v4844_v40 = vpop.f32.mrf.mxu1 }
 0x16b   : > { %v959_v14 = vadd.f32 %v4629_v11, %v733_v23  ;;  %v1150_v23 = vpop.permute.xlu1 %1149 }
 0x16c   : > { %v735_v15 = vpop.f32.mrf.mxu0  ;;  %v1454_v25 = vpop.f32.mrf.mxu1 }
 0x16d   : > { %2083 = vmatmul.mubr.f32.gmra.mxu1 %v4760_v44  ;;  %v4846_v47 = vmul.f32 %v1120_v18, %v959_v14  ;;  %v1135_v18 = vpop.permute.xlu0 %1134 }
 0x16e   : > { %2087 = vmatprep.mubr.f32.mxu1 %v4780_v61  ;;  %v738_v5 = vpop.f32.mrf.mxu0  ;;  %v4851_v37 = vpop.f32.mrf.mxu1 }
 0x16f   : > { %v964_v44 = vadd.f32 %v4654_v55, %v738_v5 }
 0x170   : > { %v740_v26 = vpop.f32.mrf.mxu0  ;;  %v1459_v11 = vpop.f32.mrf.mxu1 }
 0x171   : > { %2088 = vmatmul.mubr.f32.gmra.mxu1 %v4766_v36  ;;  %v4853_v24 = vmul.f32 %v1125_v1, %v964_v44  ;;  %v1145_v26 = vpop.permute.xlu0 %1144 }
 0x172   : > { %2092 = vmatprep.mubr.f32.mxu1 %v4786_v46  ;;  %v743_v15 = vpop.f32.mrf.mxu0  ;;  %v4858_v51 = vpop.f32.mrf.mxu1 }
 0x173   : > { %v969_v36 = vadd.f32 %v4647_v32, %v743_v15 }
 0x174   : > { %v745_v55 = vpop.f32.mrf.mxu0  ;;  %v1464_v25 = vpop.f32.mrf.mxu1 }
 0x175   : > { %2093 = vmatmul.mubr.f32.gmra.mxu1 %v4770_v35  ;;  %v4860_v14 = vmul.f32 %v1130_v27, %v969_v36  ;;  %v4866_v35 = vpop.permute.xlu1 %2343 }
 0x176   : > { %2097 = vmatprep.mubr.f32.mxu1 %v4795_v4  ;;  %v748_v1 = vpop.f32.mrf.mxu0  ;;  %v4864_v5 = vpop.f32.mrf.mxu1  ;;  %5321 = vst [vmem:[#allocation31_spill] sm:$0xff] %v4866_v35 }
 0x177   : > { %v974_v44 = vadd.f32 %v4666_v8, %v748_v1  ;;  %v1155_v1 = vpop.permute.xlu0 %1154 }
 0x178   : > { %v750_v11 = vpop.f32.mrf.mxu0  ;;  %v1469_v27 = vpop.f32.mrf.mxu1 }
 0x179   : > { %2098 = vmatmul.mubr.f32.gmra.mxu1 %v4780_v61  ;;  %v4870_v32 = vmul.f32 %v1135_v18, %v974_v44  ;;  %v4876_v55 = vpop.permute.xlu1 %2347 }
 0x17a   : > { %2102 = vmatprep.mubr.f32.mxu1 %v4799_v17  ;;  %v753_v15 = vpop.f32.mrf.mxu0  ;;  %v4874_v17 = vpop.f32.mrf.mxu1  ;;  %5322 = vst [vmem:[#allocation32_spill] sm:$0xff] %v4876_v55 }
 0x17b   : > { %v979_v61 = vadd.f32 %v4663_v16, %v753_v15 }
 0x17c   : > { %v755_v36 = vpop.f32.mrf.mxu0  ;;  %v1474_v25 = vpop.f32.mrf.mxu1 }
 0x17d   : > { %2103 = vmatmul.mubr.f32.gmra.mxu1 %v4786_v46  ;;  %v4879_v8 = vmul.f32 %v1140_v9, %v979_v61  ;;  %v4886_v15 = vpop.permute.xlu1 %2355 }
 0x17e   : > { %2107 = vmatprep.mubr.f32.mxu1 %v4807_v54  ;;  %v758_v46 = vpop.f32.mrf.mxu0  ;;  %v4882_v44 = vpop.f32.mrf.mxu1  ;;  %5324 = vst [vmem:[#allocation34_spill] sm:$0xff] %v4886_v15 }
 0x17f   : > { %v984_v18 = vadd.f32 %v4680_v39, %v758_v46 }
 0x180   : > { %v760_v54 = vpop.f32.mrf.mxu0  ;;  %v1479_v16 = vpop.f32.mrf.mxu1 }
 0x181   : > { %2108 = vmatmul.mubr.f32.gmra.mxu1 %v4795_v4  ;;  %v4884_v11 = vmul.f32 %v1145_v26, %v984_v18  ;;  %v4891_v4 = vpop.permute.xlu0 %2339  ;;  %v4898_v18 = vpop.permute.xlu1 %2363 }
 0x182   : > { %v763_v27 = vpop.f32.mrf.mxu0  ;;  %v4889_v55 = vpop.f32.mrf.mxu1  ;;  %5325 = vst [vmem:[#allocation35_spill] sm:$0xff] %v4891_v4  ;;  %5326 = vst [vmem:[#allocation36_spill] sm:$0xff] %v4898_v18 }
 0x183   : > { %5323 = vst [vmem:[#allocation33_spill] sm:$0xff] %v4884_v11  ;;  %v989_v36 = vadd.f32 %v4676_v13, %v763_v27 }
 0x184   : > { %v765_v9 = vpop.f32.mrf.mxu0  ;;  %v1484_v25 = vpop.f32.mrf.mxu1 }
 0x185   : > { %v4893_v61 = vmul.f32 %v1150_v23, %v989_v36  ;;  %v4902_v13 = vpop.permute.xlu0 %2351  ;;  %v4910_v25 = vpop.permute.xlu1 %2371 }
 0x186   : > { %5328 = vst [vmem:[#allocation38_spill] sm:$0xff] %v4902_v13  ;;  %5330 = vst [vmem:[#allocation40_spill] sm:$0xff] %v4910_v25  ;;  %v1173_v25 = vmul.f32 %v4699_v42, %v4606_v12  ;;  %v1175_v12 = vmul.f32 %v4670_v53, %v4645_v48  ;;  %v1177_v48 = vmul.f32 %v4690_v38, %v4674_v33 }
 0x187   : > { %v768_v39 = vpop.f32.mrf.mxu0  ;;  %v4896_v54 = vpop.f32.mrf.mxu1  ;;  %v1179_v33 = vmul.f32 %v4703_v63, %v4695_v58  ;;  %v1181_v63 = vmul.f32 %v4714_v62, %v4717_v60 }
 0x188   : > { %v994_v46 = vadd.f32 %v4692_v45, %v768_v39 }
 0x189   : > { %v770_v26 = vpop.f32.mrf.mxu0  ;;  %v1489_v15 = vpop.f32.mrf.mxu1 }
 0x18a   : > { %v4900_v16 = vmul.f32 %v1155_v1, %v994_v46  ;;  %v4914_v39 = vpop.permute.xlu0 %2359  ;;  %v4920_v13 = vpop.permute.xlu1 %2379 }
 0x18b   : > { %v4904_v27 = vpop.f32.mrf.mxu0  ;;  %v4906_v4 = vpop.f32.mrf.mxu1  ;;  %5331 = vst [vmem:[#allocation41_spill] sm:$0xff] %v4914_v39  ;;  %5333 = vst [vmem:[#allocation43_spill] sm:$0xff] %v4920_v13 }
 0x18c   : > { %5327 = vst [vmem:[#allocation37_spill] sm:$0xff] %v4900_v16 }
 0x18d   : > { %v775_v23 = vpop.f32.mrf.mxu0  ;;  %v1494_v36 = vpop.f32.mrf.mxu1 }
 0x18e   : > { %v4922_v23 = vpop.permute.xlu0 %2367 }
 0x18f   : > { %5334 = vst [vmem:[#allocation44_spill] sm:$0xff] %v4922_v23 }
 0x190   : > { %v4908_v9 = vpop.f32.mrf.mxu0  ;;  %v4912_v45 = vpop.f32.mrf.mxu1 }
 0x191   : > { %5329 = vst [vmem:[#allocation39_spill] sm:$0xff] %v4908_v9 }
 0x192   : > { %v780_v26 = vpop.f32.mrf.mxu0  ;;  %v1499_v1 = vpop.f32.mrf.mxu1 }
 0x193   : > { %v4929_v1 = vpop.permute.xlu1 %2387 }
 0x196   : > { %v4916_v46 = vpop.f32.mrf.mxu0  ;;  %v4918_v15 = vpop.f32.mrf.mxu1 }
 0x197   : > { %5332 = vst [vmem:[#allocation42_spill] sm:$0xff] %v4916_v46  ;;  %v4933_v46 = vpop.permute.xlu0 %2375 }
 0x198   : > { %v785_v18 = vpop.f32.mrf.mxu0  ;;  %v1504_v35 = vpop.f32.mrf.mxu1 }
 0x199   : > { %v1172_v18 = vmul.f32 %v4682_v31, %v4593_v30  ;;  %v1174_v30 = vmul.f32 %v4649_v50, %v4627_v0  ;;  %v1176_v50 = vmul.f32 %v4707_v21, %v4661_v3 }
 0x19b   : > { %v4956_v53 = vpop.permute.xlu0 %2383 }
 0x19c   : > { %v4924_v36 = vpop.f32.mrf.mxu1 }
 0x19d   : > { %v3126_v16 = vpop.f32.mrf.mxu0 }
 0x19e   : > { %v1618_v39 = vadd.f32 %v3126_v16, %v4712_v29  ;;  %v1509_v26 = vpop.f32.mrf.mxu1 }
 0x19f   : > { %v1612_v9 = vpop.f32.mrf.mxu0  ;;  %v4977_v21 = vpop.permute.xlu0 %2391 }
 0x1a0   : > { %v4935_v35 = vadd.f32 %v1618_v39, %v1173_v25  ;;  %v1613_v13 = vadd.f32 %v1612_v9, %v4705_v19  ;;  %v4938_v23 = vpop.f32.mrf.mxu1  ;;  %v4952_v9 = vpop.permute.xlu1 %2395 }
 0x1a1   : > { %v3129_v11 = vpop.f32.mrf.mxu0  ;;  %5335 = vst [vmem:[#allocation45_spill] sm:$0xff] %v4952_v9 }
 0x1a2   : > { %v4942_v42 = vadd.f32 %v1613_v13, %v1172_v18  ;;  %v1628_v29 = vadd.f32 %v3129_v11, %v4728_v41  ;;  %v1514_v16 = vpop.f32.mrf.mxu1 }
 0x1a3   : > { %v1622_v26 = vpop.f32.mrf.mxu0  ;;  %v5000_v60 = vpop.permute.xlu0 %2399 }
 0x1a4   : > { %v4947_v31 = vadd.f32 %v1628_v29, %v1175_v12  ;;  %v1623_v25 = vadd.f32 %v1622_v26, %v4721_v2  ;;  %v4950_v19 = vpop.f32.mrf.mxu1  ;;  %v4975_v3 = vpop.permute.xlu1 %2403 }
 0x1a5   : > { %v3132_v39 = vpop.f32.mrf.mxu0  ;;  %5336 = vst [vmem:[#allocation46_spill] sm:$0xff] %v4975_v3  ;;  %v5354_v3 = vld [vmem:[#allocation18_spill] sm:$0xff] }
 0x1a6   : > { %v4958_v41 = vadd.f32 %v1623_v25, %v1174_v30  ;;  %v1638_v11 = vadd.f32 %v3132_v39, %v4755_v7  ;;  %v1519_v13 = vpop.f32.mrf.mxu1  ;;  %v1178_v30 = vmul.f32 %v4719_v59, %v4686_v22  ;;  %v1180_v59 = vmul.f32 %v4733_v43, %v4710_v56  ;;  %v5340_v43 = vld [vmem:[#allocation10_spill] sm:$0xff] }
 0x1a7   : > { %v1632_v0 = vpop.f32.mrf.mxu0 }
 0x1a8   : > { %v4963_v2 = vadd.f32 %v1638_v11, %v1177_v48  ;;  %v1633_v18 = vadd.f32 %v1632_v0, %v4743_v10  ;;  %v4998_v62 = vpop.permute.xlu1 %2411 }
 0x1a9   : > { %v4966_v12 = vpop.f32.mrf.mxu1  ;;  %v3135_v29 = vpop.f32.mrf.mxu0 }
 0x1aa   : > { %v4970_v38 = vadd.f32 %v1633_v18, %v1176_v50  ;;  %v1648_v16 = vadd.f32 %v3135_v29, %v4784_v57  ;;  %v5337_v18 = vld [vmem:[#allocation11_spill] sm:$0xff] }
 0x1ab   : > { %v1524_v7 = vpop.f32.mrf.mxu1  ;;  %v1642_v26 = vpop.f32.mrf.mxu0  ;;  %v1183_v29 = vmul.f32 %v5337_v18, %v4731_v34  ;;  %5338 = vst [vmem:[#allocation11_spill] sm:$0xff] %v4998_v62  ;;  %v5345_v18 = vld [vmem:[#allocation19_spill] sm:$0xff] }
 0x1ac   : > { %v4979_v10 = vadd.f32 %v1648_v16, %v1179_v33  ;;  %v1643_v25 = vadd.f32 %v1642_v26, %v4768_v28  ;;  %v5339_v33 = vld [vmem:[#allocation30_spill] sm:$0xff] }
 0x1ad   : > { %v4982_v39 = vpop.f32.mrf.mxu1  ;;  %v3138_v58 = vpop.f32.mrf.mxu0  ;;  %v5341_v26 = vld [vmem:[#allocation14_spill] sm:$0xff] }
 0x1ae   : > { %v4986_v57 = vadd.f32 %v1643_v25, %v1178_v30  ;;  %v1658_v48 = vadd.f32 %v3138_v58, %v4814_v52  ;;  %v1182_v30 = vmul.f32 %v5341_v26, %v5340_v43  ;;  %v5342_v25 = vld [vmem:[#allocation27_spill] sm:$0xff]  ;;  %v5347_v43 = vld [vmem:[#allocation12_spill] sm:$0xff]  ;;  %v5021_v26 = vpop.permute.xlu1 %2419 }
 0x1af   : > { %v1529_v11 = vpop.f32.mrf.mxu1  ;;  %v1652_v22 = vpop.f32.mrf.mxu0  ;;  %5349 = vst [vmem:[#allocation30_spill] sm:$0xff] %v5021_v26 }
 0x1b0   : > { %v4991_v13 = vadd.f32 %v1658_v48, %v1181_v63  ;;  %v1653_v0 = vadd.f32 %v1652_v22, %v4797_v20  ;;  %v5343_v48 = vld [vmem:[#allocation15_spill] sm:$0xff]  ;;  %v5344_v11 = vld [vmem:[#allocation13_spill] sm:$0xff] }
 0x1b1   : > { %v4994_v28 = vpop.f32.mrf.mxu1  ;;  %v3141_v50 = vpop.f32.mrf.mxu0  ;;  %v1185_v22 = vmul.f32 %v5344_v11, %v5343_v48 }
 0x1b2   : > { %v5002_v52 = vadd.f32 %v1653_v0, %v1180_v59  ;;  %v1668_v16 = vadd.f32 %v3141_v50, %v5339_v33  ;;  %v5346_v59 = vld [vmem:[#allocation3_spill] sm:$0xff] }
 0x1b3   : > { %v1534_v7 = vpop.f32.mrf.mxu1  ;;  %v1662_v56 = vpop.f32.mrf.mxu0  ;;  %v929_v0 = vadd.f32 %v5346_v59, %v5345_v18 }
 0x1b4   : > { %v5007_v20 = vadd.f32 %v1668_v16, %v1183_v29  ;;  %v1663_v58 = vadd.f32 %v1662_v56, %v5342_v25  ;;  %v5348_v29 = vld [vmem:[#allocation17_spill] sm:$0xff]  ;;  %v5023_v56 = vpop.permute.xlu0 %2407 }
 0x1b5   : > { %v5010_v63 = vpop.f32.mrf.mxu1  ;;  %v3144_v34 = vpop.f32.mrf.mxu0  ;;  %v1184_v16 = vmul.f32 %v5348_v29, %v5347_v43  ;;  %5350 = vst [vmem:[#allocation10_spill] sm:$0xff] %v5023_v56  ;;  %v5355_v56 = vld [vmem:[#allocation21_spill] sm:$0xff] }
 0x1b6   : > { %v5016_v62 = vadd.f32 %v1663_v58, %v1182_v30  ;;  %v1678_v50 = vadd.f32 %v3144_v34, %v4844_v40  ;;  %v5351_v30 = vld [vmem:[#allocation16_spill] sm:$0xff] }
 0x1b7   : > { %v1539_v33 = vpop.f32.mrf.mxu1  ;;  %v1672_v7 = vpop.f32.mrf.mxu0  ;;  %v1187_v58 = vmul.f32 %v5351_v30, %v929_v0  ;;  %v5352_v34 = vld [vmem:[#allocation24_spill] sm:$0xff] }
 0x1b8   : > { %v5025_v25 = vadd.f32 %v1678_v50, %v1185_v22  ;;  %v1673_v48 = vadd.f32 %v1672_v7, %v4837_v49  ;;  %v5353_v33 = vld [vmem:[#allocation4_spill] sm:$0xff]  ;;  %v1186_v22 = vmul.f32 %v5355_v56, %v5354_v3 }
 0x1b9   : > { %v5028_v11 = vpop.f32.mrf.mxu1  ;;  %v3147_v18 = vpop.f32.mrf.mxu0  ;;  %v939_v43 = vadd.f32 %v5353_v33, %v5352_v34 }
 0x1ba   : > { %v5031_v59 = vadd.f32 %v1673_v48, %v1184_v16  ;;  %v1688_v40 = vadd.f32 %v3147_v18, %v4858_v51  ;;  %v5358_v16 = vld [vmem:[#allocation20_spill] sm:$0xff]  ;;  %v5359_v51 = vld [vmem:[#allocation29_spill] sm:$0xff]  ;;  %v5048_v34 = vpop.permute.xlu1 %2427  ;;  %v5050_v33 = vpop.permute.xlu0 %2415 }
 0x1bb   : > { %v1544_v29 = vpop.f32.mrf.mxu1  ;;  %v1682_v26 = vpop.f32.mrf.mxu0  ;;  %v1189_v48 = vmul.f32 %v5358_v16, %v939_v43  ;;  %v5360_v18 = vld [vmem:[#allocation5_spill] sm:$0xff]  ;;  %5361 = vst [vmem:[#allocation15_spill] sm:$0xff] %v5048_v34  ;;  %5362 = vst [vmem:[#allocation13_spill] sm:$0xff] %v5050_v33 }
 0x1bc   : > { %v5038_v50 = vadd.f32 %v1688_v40, %v1187_v58  ;;  %v1683_v49 = vadd.f32 %v1682_v26, %v4851_v37  ;;  %v949_v30 = vadd.f32 %v5360_v18, %v5359_v51  ;;  %v5363_v40 = vld [vmem:[#allocation22_spill] sm:$0xff]  ;;  %v5364_v37 = vld [vmem:[#allocation25_spill] sm:$0xff]  ;;  %v5367_v18 = vld [vmem:[#allocation23_spill] sm:$0xff] }
 0x1bd   : > { %v1188_v26 = vmul.f32 %v5364_v37, %v5363_v40  ;;  %v5365_v29 = vld [vmem:[#allocation26_spill] sm:$0xff] }
 0x1be   : > { %5356 = vst [vmem:[#allocation14_spill] sm:$0xff] %v5038_v50  ;;  %v5041_v7 = vadd.f32 %v1683_v49, %v1186_v22  ;;  %v3150_v9 = vpop.f32.mrf.mxu0  ;;  %v5043_v0 = vpop.f32.mrf.mxu1  ;;  %v5366_v22 = vld [vmem:[#allocation6_spill] sm:$0xff]  ;;  %v1191_v34 = vmul.f32 %v5367_v18, %v949_v30  ;;  %v5368_v50 = vld [vmem:[#allocation28_spill] sm:$0xff] }
 0x1bf   : > { %v1698_v3 = vadd.f32 %v3150_v9, %v4874_v17  ;;  %v944_v49 = vadd.f32 %v5366_v22, %v5365_v29  ;;  %v5067_v37 = vpop.permute.xlu1 %2435  ;;  %v5069_v29 = vpop.permute.xlu0 %2423 }
 0x1c0   : > { %5357 = vst [vmem:[#allocation27_spill] sm:$0xff] %v5041_v7  ;;  %v1692_v56 = vpop.f32.mrf.mxu0  ;;  %v1956_v58 = vpop.f32.mrf.mxu1 }
 0x1c1   : > { %v5057_v7 = vadd.f32 %v1698_v3, %v1189_v48  ;;  %v1693_v43 = vadd.f32 %v1692_v56, %v4864_v5  ;;  %v1190_v40 = vmul.f32 %v5368_v50, %v944_v49 }
 0x1c2   : > { %v3153_v16 = vpop.f32.mrf.mxu0  ;;  %v5060_v51 = vpop.f32.mrf.mxu1 }
 0x1c3   : > { %v5063_v33 = vadd.f32 %v1693_v43, %v1188_v26  ;;  %v1708_v17 = vadd.f32 %v3153_v16, %v4889_v55  ;;  %v5083_v49 = vpop.permute.xlu1 %2443 }
 0x1c4   : > { %v1702_v9 = vpop.f32.mrf.mxu0  ;;  %v1961_v58 = vpop.f32.mrf.mxu1 }
 0x1c5   : > { %v5071_v48 = vadd.f32 %v1708_v17, %v1191_v34  ;;  %v1703_v5 = vadd.f32 %v1702_v9, %v4882_v44  ;;  %v5085_v34 = vpop.permute.xlu0 %2431 }
 0x1c7   : > { %v5074_v3 = vadd.f32 %v1703_v5, %v1190_v40  ;;  %v3156_v56 = vpop.f32.mrf.mxu0  ;;  %v5076_v30 = vpop.f32.mrf.mxu1 }
 0x1c8   : > { %v1718_v26 = vadd.f32 %v3156_v56, %v4906_v4 }
 0x1c9   : > { %v1712_v55 = vpop.f32.mrf.mxu0  ;;  %v1966_v22 = vpop.f32.mrf.mxu1 }
 0x1ca   : > { %v5080_v43 = vadd.f32 %v1718_v26, %v4846_v47  ;;  %v1713_v50 = vadd.f32 %v1712_v55, %v4896_v54  ;;  %v5104_v56 = vpop.permute.xlu0 %2439 }
 0x1cc   : > { %v5088_v44 = vadd.f32 %v1713_v50, %v4839_v6  ;;  %v3159_v16 = vpop.f32.mrf.mxu0  ;;  %v5090_v18 = vpop.f32.mrf.mxu1 }
 0x1cd   : > { %v1728_v17 = vadd.f32 %v3159_v16, %v4918_v15  ;;  %v5102_v6 = vpop.permute.xlu1 %2447 }
 0x1ce   : > { %v1722_v4 = vpop.f32.mrf.mxu0  ;;  %v1971_v9 = vpop.f32.mrf.mxu1  ;;  %5369 = vst [vmem:[#allocation19_spill] sm:$0xff] %v5102_v6 }
 0x1cf   : > { %v5094_v58 = vadd.f32 %v1728_v17, %v4860_v14  ;;  %v1723_v47 = vadd.f32 %v1722_v4, %v4912_v45  ;;  %v5370_v17 = vld [vmem:[#allocation7_spill] sm:$0xff] }
 0x1d0   : > { %v999_v4 = vadd.f32 %v5370_v17, %v4904_v27  ;;  %v5375_v17 = vld [vmem:[#allocation42_spill] sm:$0xff] }
 0x1d1   : > { %v5098_v54 = vadd.f32 %v1723_v47, %v4853_v24  ;;  %v3162_v40 = vpop.f32.mrf.mxu0  ;;  %v5100_v5 = vpop.f32.mrf.mxu1 }
 0x1d2   : > { %v1738_v26 = vadd.f32 %v3162_v40, %v4938_v23  ;;  %v1160_v23 = vpop.permute.xlu1 %1159  ;;  %v5117_v40 = vpop.permute.xlu0 %2451 }
 0x1d3   : > { %v1732_v15 = vpop.f32.mrf.mxu0  ;;  %v1976_v55 = vpop.f32.mrf.mxu1  ;;  %5371 = vst [vmem:[#allocation3_spill] sm:$0xff] %v5117_v40 }
 0x1d4   : > { %v5108_v22 = vadd.f32 %v1738_v26, %v4879_v8  ;;  %v1733_v14 = vadd.f32 %v1732_v15, %v4924_v36  ;;  %v5373_v26 = vld [vmem:[#allocation33_spill] sm:$0xff] }
 0x1d6   : > { %v5112_v45 = vadd.f32 %v1733_v14, %v4870_v32  ;;  %v3165_v24 = vpop.f32.mrf.mxu0  ;;  %v1979_v50 = vpop.f32.mrf.mxu1 }
 0x1d7   : > { %v1748_v16 = vadd.f32 %v3165_v24, %v4966_v12  ;;  %v1201_v12 = vmul.f32 %v1160_v23, %v999_v4  ;;  %v1165_v4 = vpop.permute.xlu1 %1164 }
 0x1d8   : > { %v1742_v9 = vpop.f32.mrf.mxu0  ;;  %v1981_v47 = vpop.f32.mrf.mxu1 }
 0x1d9   : > { %v5120_v8 = vadd.f32 %v1748_v16, %v4893_v61  ;;  %v1743_v36 = vadd.f32 %v1742_v9, %v4950_v19  ;;  %v5376_v47 = vld [vmem:[#allocation8_spill] sm:$0xff]  ;;  %v1170_v16 = vpop.permute.xlu0 %1169  ;;  %v5377_v19 = vld [vmem:[#allocation39_spill] sm:$0xff]  ;;  %v5378_v9 = vld [vmem:[#allocation9_spill] sm:$0xff] }
 0x1da   : > { %v1009_v6 = vadd.f32 %v5376_v47, %v5375_v17 }
 0x1db   : > { %5372 = vst [vmem:[#allocation12_spill] sm:$0xff] %v5120_v8  ;;  %v5124_v32 = vadd.f32 %v1743_v36, %v5373_v26  ;;  %v3168_v15 = vpop.f32.mrf.mxu0  ;;  %v5126_v55 = vpop.f32.mrf.mxu1  ;;  %v1004_v36 = vadd.f32 %v5378_v9, %v5377_v19  ;;  %v5379_v26 = vld [vmem:[#allocation37_spill] sm:$0xff] }
 0x1dc   : > { %v1758_v14 = vadd.f32 %v3168_v15, %v4994_v28  ;;  %v1203_v28 = vmul.f32 %v1170_v16, %v1009_v6  ;;  %v5380_v6 = vld [vmem:[#allocation31_spill] sm:$0xff] }
 0x1dd   : > { %5374 = vst [vmem:[#allocation17_spill] sm:$0xff] %v5124_v32  ;;  %v1752_v27 = vpop.f32.mrf.mxu0  ;;  %v1986_v24 = vpop.f32.mrf.mxu1 }
 0x1de   : > { %v5131_v40 = vadd.f32 %v1758_v14, %v1201_v12  ;;  %v1753_v61 = vadd.f32 %v1752_v27, %v4982_v39  ;;  %v1202_v12 = vmul.f32 %v1165_v4, %v1004_v36  ;;  %v5381_v4 = vld [vmem:[#allocation35_spill] sm:$0xff] }
 0x1e0   : > { %v5137_v8 = vadd.f32 %v1753_v61, %v5379_v26  ;;  %v1989_v32 = vpop.f32.mrf.mxu1 }
 0x1e1   : > { %v3171_v23 = vpop.f32.mrf.mxu0 }
 0x1e2   : > { %v1768_v15 = vadd.f32 %v3171_v23, %v5028_v11  ;;  %v1991_v24 = vpop.f32.mrf.mxu1 }
 0x1e3   : > { %v1762_v17 = vpop.f32.mrf.mxu0 }
 0x1e4   : > { %v5140_v14 = vadd.f32 %v1768_v15, %v1203_v28  ;;  %v1763_v39 = vadd.f32 %v1762_v17, %v5010_v63  ;;  %v5382_v17 = vld [vmem:[#allocation38_spill] sm:$0xff] }
 0x1e5   : > { %v5143_v27 = vpop.f32.mrf.mxu1 }
 0x1e6   : > { %v5145_v47 = vadd.f32 %v1763_v39, %v1202_v12  ;;  %v3206_v61 = vpop.f32.mrf.mxu0 }
 0x1e7   : > { %v2185_v19 = vadd.f32 %v3206_v61, %v5060_v51  ;;  %v1996_v9 = vpop.f32.mrf.mxu1 }
 0x1e8   : > { %v2179_v26 = vpop.f32.mrf.mxu0 }
 0x1e9   : > { %v2467_v16 = vmul.f32 %v5380_v6, %v2185_v19  ;;  %v2180_v11 = vadd.f32 %v2179_v26, %v5043_v0  ;;  %v1999_v23 = vpop.f32.mrf.mxu1  ;;  %v5383_v6 = vld [vmem:[#allocation32_spill] sm:$0xff] }
 0x1ea   : > { %v3209_v63 = vpop.f32.mrf.mxu0 }
 0x1eb   : > { %v2499_v36 = vadd.f32 %v2467_v16, %v4935_v35  ;;  %v2466_v51 = vmul.f32 %v5381_v4, %v2180_v11  ;;  %v2195_v28 = vadd.f32 %v3209_v63, %v5090_v18  ;;  %v2001_v15 = vpop.f32.mrf.mxu1 }
 0x1ec   : > { %v2189_v24 = vpop.f32.mrf.mxu0  ;;  %v5384_v15 = vld [vmem:[#allocation41_spill] sm:$0xff] }
 0x1ed   : > { %2531 = vst [vmem:[%s5155_s27 + $0x8] sm:$0xff] %v2499_v36  ;;  %v2498_v0 = vadd.f32 %v2466_v51, %v4942_v42  ;;  %v2469_v12 = vmul.f32 %v5382_v17, %v2195_v28  ;;  %v2190_v39 = vadd.f32 %v2189_v24, %v5076_v30  ;;  %v5164_v61 = vpop.f32.mrf.mxu1  ;;  %v2600_v19 = vmul.f32 %v2499_v36, %v2499_v36 }
 0x1ee   : > { %v3212_v9 = vpop.f32.mrf.mxu0 }
 0x1ef   : > { %2530 = vst [vmem:[%s5155_s27] sm:$0xff] %v2498_v0  ;;  %v2562_v35 = vadd.f32 %v2499_v36, %v2498_v0  ;;  %v2599_v26 = vmul.f32 %v2498_v0, %v2498_v0  ;;  %v2501_v18 = vadd.f32 %v2469_v12, %v4947_v31  ;;  %v2468_v16 = vmul.f32 %v5383_v6, %v2190_v39  ;;  %v2006_v11 = vpop.f32.mrf.mxu1  ;;  %v5385_v0 = vld [vmem:[#allocation34_spill] sm:$0xff] }
 0x1f0   : > { %v2205_v63 = vadd.f32 %v3212_v9, %v1979_v50  ;;  %v2199_v4 = vpop.f32.mrf.mxu0 }
 0x1f1   : > { %v2631_v42 = vadd.f32 %v2600_v19, %v2599_v26  ;;  %2533 = vst [vmem:[%s5155_s27 + $0x18] sm:$0xff] %v2501_v18  ;;  %v2500_v51 = vadd.f32 %v2468_v16, %v4958_v41  ;;  %v2200_v30 = vadd.f32 %v2199_v4, %v5100_v5  ;;  %v2009_v28 = vpop.f32.mrf.mxu1  ;;  %v2602_v9 = vmul.f32 %v2501_v18, %v2501_v18  ;;  %v5386_v16 = vld [vmem:[#allocation44_spill] sm:$0xff] }
 0x1f2   : > { %v2471_v24 = vmul.f32 %v5384_v15, %v2205_v63  ;;  %v3215_v17 = vpop.f32.mrf.mxu0 }
 0x1f3   : > { %2532 = vst [vmem:[%s5155_s27 + $0x10] sm:$0xff] %v2500_v51  ;;  %v2563_v36 = vadd.f32 %v2562_v35, %v2500_v51  ;;  %v2601_v31 = vmul.f32 %v2500_v51, %v2500_v51  ;;  %v2470_v12 = vmul.f32 %v5385_v0, %v2200_v30  ;;  %v2215_v39 = vadd.f32 %v3215_v17, %v1989_v32  ;;  %v2011_v50 = vpop.f32.mrf.mxu1 }
 0x1f4   : > { %v2503_v19 = vadd.f32 %v2471_v24, %v4963_v2  ;;  %v2209_v26 = vpop.f32.mrf.mxu0  ;;  %v5387_v24 = vld [vmem:[#allocation36_spill] sm:$0xff] }
 0x1f5   : > { %v2632_v41 = vadd.f32 %v2631_v42, %v2601_v31  ;;  %v2502_v5 = vadd.f32 %v2470_v12, %v4970_v38  ;;  %v2564_v6 = vadd.f32 %v2563_v36, %v2501_v18  ;;  %v2473_v11 = vmul.f32 %v5386_v16, %v2215_v39  ;;  %v2014_v63 = vpop.f32.mrf.mxu1 }
 0x1f6   : > { %2535 = vst [vmem:[%s5155_s27 + $0x28] sm:$0xff] %v2503_v19  ;;  %v2210_v35 = vadd.f32 %v2209_v26, %v5126_v55  ;;  %v3218_v4 = vpop.f32.mrf.mxu0  ;;  %v2604_v17 = vmul.f32 %v2503_v19, %v2503_v19 }
 0x1f7   : > { %2534 = vst [vmem:[%s5155_s27 + $0x20] sm:$0xff] %v2502_v5  ;;  %v2565_v51 = vadd.f32 %v2564_v6, %v2502_v5  ;;  %v2603_v32 = vmul.f32 %v2502_v5, %v2502_v5  ;;  %v2633_v30 = vadd.f32 %v2632_v41, %v2602_v9  ;;  %v2505_v15 = vadd.f32 %v2473_v11, %v4979_v10  ;;  %v2016_v2 = vpop.f32.mrf.mxu1  ;;  %v5388_v9 = vld [vmem:[#allocation40_spill] sm:$0xff] }
 0x1f8   : > { %v2472_v42 = vmul.f32 %v5387_v24, %v2210_v35  ;;  %v2225_v38 = vadd.f32 %v3218_v4, %v1999_v23  ;;  %v2219_v18 = vpop.f32.mrf.mxu0  ;;  %v5389_v2 = vld [vmem:[#allocation43_spill] sm:$0xff] }
 0x1f9   : > { %v2634_v36 = vadd.f32 %v2633_v30, %v2603_v32  ;;  %2537 = vst [vmem:[%s5155_s27 + $0x38] sm:$0xff] %v2505_v15  ;;  %v2566_v31 = vadd.f32 %v2565_v51, %v2503_v19  ;;  %v2220_v0 = vadd.f32 %v2219_v18, %v5143_v27  ;;  %v2019_v55 = vpop.f32.mrf.mxu1  ;;  %v2606_v35 = vmul.f32 %v2505_v15, %v2505_v15 }
 0x1fa   : > { %v2504_v12 = vadd.f32 %v2472_v42, %v4986_v57  ;;  %v2475_v39 = vmul.f32 %v4933_v46, %v2225_v38  ;;  %v3221_v50 = vpop.f32.mrf.mxu0 }
 0x1fb   : > { %v2635_v10 = vadd.f32 %v2634_v36, %v2604_v17  ;;  %v2474_v26 = vmul.f32 %v5388_v9, %v2220_v0  ;;  %v2235_v41 = vadd.f32 %v3221_v50, %v2009_v28  ;;  %v2021_v23 = vpop.f32.mrf.mxu1 }
 0x1fc   : > { %2536 = vst [vmem:[%s5155_s27 + $0x30] sm:$0xff] %v2504_v12  ;;  %v2567_v5 = vadd.f32 %v2566_v31, %v2504_v12  ;;  %v2605_v6 = vmul.f32 %v2504_v12, %v2504_v12  ;;  %v2507_v19 = vadd.f32 %v2475_v39, %v4991_v13  ;;  %v2229_v16 = vpop.f32.mrf.mxu0 }
 0x1fd   : > { %v2506_v27 = vadd.f32 %v2474_v26, %v5002_v52  ;;  %v2477_v57 = vmul.f32 %v4956_v53, %v2235_v41  ;;  %v2230_v46 = vadd.f32 %v2229_v16, %v5164_v61  ;;  %v2024_v11 = vpop.f32.mrf.mxu1 }
 0x1fe   : > { %v2636_v4 = vadd.f32 %v2635_v10, %v2605_v6  ;;  %2539 = vst [vmem:[%s5155_s27 + $0x48] sm:$0xff] %v2507_v19  ;;  %v2568_v28 = vadd.f32 %v2567_v5, %v2505_v15  ;;  %v3224_v51 = vpop.f32.mrf.mxu0  ;;  %v2608_v36 = vmul.f32 %v2507_v19, %v2507_v19 }
 0x1ff   : > { %2538 = vst [vmem:[%s5155_s27 + $0x40] sm:$0xff] %v2506_v27  ;;  %v2607_v32 = vmul.f32 %v2506_v27, %v2506_v27  ;;  %v2509_v30 = vadd.f32 %v2477_v57, %v5007_v20  ;;  %v2476_v13 = vmul.f32 %v5389_v2, %v2230_v46  ;;  %v2245_v24 = vadd.f32 %v3224_v51, %v2019_v55  ;;  %v2026_v52 = vpop.f32.mrf.mxu1  ;;  %v5391_v57 = vld [vmem:[#allocation45_spill] sm:$0xff]  ;;  %v5392_v51 = vld [vmem:[#allocation27_spill] sm:$0xff] }
 0x200   : > { %v2569_v42 = vadd.f32 %v2568_v28, %v2506_v27  ;;  %v2637_v53 = vadd.f32 %v2636_v4, %v2606_v35  ;;  %v2239_v38 = vpop.f32.mrf.mxu0 }
 0x201   : > { %2541 = vst [vmem:[%s5155_s27 + $0x58] sm:$0xff] %v2509_v30  ;;  %v2508_v61 = vadd.f32 %v2476_v13, %v5016_v62  ;;  %v2479_v18 = vmul.f32 %v4977_v21, %v2245_v24  ;;  %v2240_v15 = vadd.f32 %v2239_v38, %v2014_v63  ;;  %v2029_v17 = vpop.f32.mrf.mxu1  ;;  %v2610_v5 = vmul.f32 %v2509_v30, %v2509_v30 }
 0x202   : > { %v2638_v31 = vadd.f32 %v2637_v53, %v2607_v32  ;;  %v2570_v0 = vadd.f32 %v2569_v42, %v2507_v19  ;;  %v3227_v20 = vpop.f32.mrf.mxu0  ;;  %v5393_v53 = vld [vmem:[#allocation46_spill] sm:$0xff] }
 0x203   : > { %2540 = vst [vmem:[%s5155_s27 + $0x50] sm:$0xff] %v2508_v61  ;;  %v2609_v12 = vmul.f32 %v2508_v61, %v2508_v61  ;;  %v2511_v55 = vadd.f32 %v2479_v18, %v5025_v25  ;;  %v2478_v39 = vmul.f32 %v4929_v1, %v2240_v15  ;;  %v2255_v50 = vadd.f32 %v3227_v20, %v2029_v17  ;;  %v2031_v10 = vpop.f32.mrf.mxu1  ;;  %v5390_v1 = vld [vmem:[#allocation14_spill] sm:$0xff] }
 0x204   : > { %v2571_v9 = vadd.f32 %v2570_v0, %v2508_v61  ;;  %v2639_v62 = vadd.f32 %v2638_v31, %v2608_v36  ;;  %v2249_v26 = vpop.f32.mrf.mxu0  ;;  %v5394_v17 = vld [vmem:[#allocation10_spill] sm:$0xff] }
 0x205   : > { %2543 = vst [vmem:[%s5155_s27 + $0x68] sm:$0xff] %v2511_v55  ;;  %v2510_v21 = vadd.f32 %v2478_v39, %v5031_v59  ;;  %v2481_v63 = vmul.f32 %v5000_v60, %v2255_v50  ;;  %v2250_v41 = vadd.f32 %v2249_v26, %v2024_v11  ;;  %v2034_v23 = vpop.f32.mrf.mxu1  ;;  %v2612_v2 = vmul.f32 %v2511_v55, %v2511_v55 }
 0x206   : > { %v2640_v6 = vadd.f32 %v2639_v62, %v2609_v12  ;;  %v2572_v19 = vadd.f32 %v2571_v9, %v2509_v30  ;;  %v3230_v25 = vpop.f32.mrf.mxu0 }
 0x207   : > { %2542 = vst [vmem:[%s5155_s27 + $0x60] sm:$0xff] %v2510_v21  ;;  %v2611_v16 = vmul.f32 %v2510_v21, %v2510_v21  ;;  %v2513_v27 = vadd.f32 %v2481_v63, %v5390_v1  ;;  %v2480_v46 = vmul.f32 %v5391_v57, %v2250_v41  ;;  %v2036_v35 = vpop.f32.mrf.mxu1 }
 0x208   : > { %v2573_v4 = vadd.f32 %v2572_v19, %v2510_v21  ;;  %v2641_v28 = vadd.f32 %v2640_v6, %v2610_v5  ;;  %v2259_v59 = vpop.f32.mrf.mxu0  ;;  %v5396_v35 = vld [vmem:[#allocation13_spill] sm:$0xff] }
 0x209   : > { %2545 = vst [vmem:[%s5155_s27 + $0x78] sm:$0xff] %v2513_v27  ;;  %v2512_v60 = vadd.f32 %v2480_v46, %v5392_v51  ;;  %v2260_v11 = vadd.f32 %v2259_v59, %v2034_v23  ;;  %v2039_v32 = vpop.f32.mrf.mxu1  ;;  %v2614_v0 = vmul.f32 %v2513_v27, %v2513_v27  ;;  %v5395_v23 = vld [vmem:[#allocation11_spill] sm:$0xff] }
 0x20a   : > { %v2642_v13 = vadd.f32 %v2641_v28, %v2611_v16  ;;  %v2574_v30 = vadd.f32 %v2573_v4, %v2511_v55  ;;  %v2265_v24 = vadd.f32 %v3230_v25, %v2039_v32  ;;  %v3233_v52 = vpop.f32.mrf.mxu0 }
 0x20b   : > { %2544 = vst [vmem:[%s5155_s27 + $0x70] sm:$0xff] %v2512_v60  ;;  %v2613_v42 = vmul.f32 %v2512_v60, %v2512_v60  ;;  %v2482_v38 = vmul.f32 %v5393_v53, %v2260_v11  ;;  %v2041_v61 = vpop.f32.mrf.mxu1 }
 0x20c   : > { %v2575_v18 = vadd.f32 %v2574_v30, %v2512_v60  ;;  %v2643_v15 = vadd.f32 %v2642_v13, %v2612_v2  ;;  %v2483_v36 = vmul.f32 %v5394_v17, %v2265_v24  ;;  %v2269_v31 = vpop.f32.mrf.mxu0  ;;  %v5397_v13 = vld [vmem:[#allocation30_spill] sm:$0xff] }
 0x20d   : > { %v2514_v20 = vadd.f32 %v2482_v38, %v5063_v33  ;;  %v2044_v12 = vpop.f32.mrf.mxu1 }
 0x20e   : > { %v2644_v39 = vadd.f32 %v2643_v15, %v2613_v42  ;;  %v2576_v55 = vadd.f32 %v2575_v18, %v2513_v27  ;;  %v2515_v50 = vadd.f32 %v2483_v36, %v5057_v7  ;;  %v2270_v10 = vadd.f32 %v2269_v31, %v2044_v12  ;;  %v3236_v26 = vpop.f32.mrf.mxu0 }
 0x20f   : > { %2546 = vst [vmem:[%s5155_s27 + $0x80] sm:$0xff] %v2514_v20  ;;  %v2615_v9 = vmul.f32 %v2514_v20, %v2514_v20  ;;  %v2046_v62 = vpop.f32.mrf.mxu1 }
 0x210   : > { %v2577_v21 = vadd.f32 %v2576_v55, %v2514_v20  ;;  %v2645_v63 = vadd.f32 %v2644_v39, %v2614_v0  ;;  %2547 = vst [vmem:[%s5155_s27 + $0x88] sm:$0xff] %v2515_v50  ;;  %v2616_v41 = vmul.f32 %v2515_v50, %v2515_v50  ;;  %v2484_v5 = vmul.f32 %v5395_v23, %v2270_v10  ;;  %v2279_v1 = vpop.f32.mrf.mxu0 }
 0x211   : > { %v2049_v6 = vpop.f32.mrf.mxu1 }
 0x212   : > { %v2646_v19 = vadd.f32 %v2645_v63, %v2615_v9  ;;  %v2578_v33 = vadd.f32 %v2577_v21, %v2515_v50  ;;  %v2516_v25 = vadd.f32 %v2484_v5, %v5074_v3  ;;  %v2275_v16 = vadd.f32 %v3233_v52, %v2049_v6  ;;  %v3239_v32 = vpop.f32.mrf.mxu0 }
 0x213   : > { %v2051_v7 = vpop.f32.mrf.mxu1 }
 0x214   : > { %v2647_v27 = vadd.f32 %v2646_v19, %v2616_v41  ;;  %2548 = vst [vmem:[%s5155_s27 + $0x90] sm:$0xff] %v2516_v25  ;;  %v2579_v57 = vadd.f32 %v2578_v33, %v2516_v25  ;;  %v2617_v46 = vmul.f32 %v2516_v25, %v2516_v25  ;;  %v2485_v4 = vmul.f32 %v5396_v35, %v2275_v16  ;;  %v2289_v61 = vpop.f32.mrf.mxu0 }
 0x215   : > { %v2054_v28 = vpop.f32.mrf.mxu1 }
 0x216   : > { %v2648_v59 = vadd.f32 %v2647_v27, %v2617_v46  ;;  %v2517_v51 = vadd.f32 %v2485_v4, %v5071_v48  ;;  %v2280_v60 = vadd.f32 %v2279_v1, %v2054_v28  ;;  %v3242_v12 = vpop.f32.mrf.mxu0 }
 0x217   : > { %v2056_v11 = vpop.f32.mrf.mxu1 }
 0x218   : > { %2549 = vst [vmem:[%s5155_s27 + $0x98] sm:$0xff] %v2517_v51  ;;  %v2580_v2 = vadd.f32 %v2579_v57, %v2517_v51  ;;  %v2618_v3 = vmul.f32 %v2517_v51, %v2517_v51  ;;  %v2486_v30 = vmul.f32 %v5397_v13, %v2280_v60  ;;  %v2299_v21 = vpop.f32.mrf.mxu0 }
 0x219   : > { %v2059_v24 = vpop.f32.mrf.mxu1 }
 0x21a   : > { %v2649_v52 = vadd.f32 %v2648_v59, %v2618_v3  ;;  %v2518_v42 = vadd.f32 %v2486_v30, %v5088_v44  ;;  %v2285_v53 = vadd.f32 %v3236_v26, %v2059_v24  ;;  %v5398_v44 = vld [vmem:[#allocation15_spill] sm:$0xff]  ;;  %v3245_v25 = vpop.f32.mrf.mxu0  ;;  %v5399_v24 = vld [vmem:[#allocation17_spill] sm:$0xff] }
 0x21b   : > { %v2061_v38 = vpop.f32.mrf.mxu1 }
 0x21c   : > { %2550 = vst [vmem:[%s5155_s27 + $0xa0] sm:$0xff] %v2518_v42  ;;  %v2581_v18 = vadd.f32 %v2580_v2, %v2518_v42  ;;  %v2619_v15 = vmul.f32 %v2518_v42, %v2518_v42  ;;  %v2487_v48 = vmul.f32 %v5069_v29, %v2285_v53  ;;  %v2309_v35 = vpop.f32.mrf.mxu0 }
 0x21d   : > { %v2064_v17 = vpop.f32.mrf.mxu1 }
 0x21e   : > { %v2650_v36 = vadd.f32 %v2649_v52, %v2619_v15  ;;  %v2519_v31 = vadd.f32 %v2487_v48, %v5080_v43  ;;  %v2290_v0 = vadd.f32 %v2289_v61, %v2064_v17  ;;  %v5401_v17 = vld [vmem:[#allocation12_spill] sm:$0xff] }
 0x21f   : > { %v2066_v20 = vpop.f32.mrf.mxu1 }
 0x220   : > { %2551 = vst [vmem:[%s5155_s27 + $0xa8] sm:$0xff] %v2519_v31  ;;  %v2582_v39 = vadd.f32 %v2581_v18, %v2519_v31  ;;  %v2620_v55 = vmul.f32 %v2519_v31, %v2519_v31  ;;  %v2488_v50 = vmul.f32 %v5398_v44, %v2290_v0  ;;  %v2456_v31 = vpop.permute.xlu1 %2455 }
 0x221   : > { %v2069_v10 = vpop.f32.mrf.mxu1 }
 0x222   : > { %v2651_v9 = vadd.f32 %v2650_v36, %v2620_v55  ;;  %v2520_v62 = vadd.f32 %v2488_v50, %v5098_v54  ;;  %v2295_v26 = vadd.f32 %v3239_v32, %v2069_v10  ;;  %v3248_v32 = vpop.f32.mrf.mxu0  ;;  %v5402_v55 = vld [vmem:[#allocation3_spill] sm:$0xff] }
 0x223   : > { %v2071_v29 = vpop.f32.mrf.mxu1 }
 0x224   : > { %2552 = vst [vmem:[%s5155_s27 + $0xb0] sm:$0xff] %v2520_v62  ;;  %v2583_v63 = vadd.f32 %v2582_v39, %v2520_v62  ;;  %v2621_v41 = vmul.f32 %v2520_v62, %v2520_v62  ;;  %v2489_v43 = vmul.f32 %v5085_v34, %v2295_v26  ;;  %v2319_v53 = vpop.f32.mrf.mxu0 }
 0x225   : > { %v2074_v23 = vpop.f32.mrf.mxu1 }
 0x226   : > { %v2652_v5 = vadd.f32 %v2651_v9, %v2621_v41  ;;  %v2521_v6 = vadd.f32 %v2489_v43, %v5094_v58  ;;  %v2300_v19 = vadd.f32 %v2299_v21, %v2074_v23  ;;  %v3251_v20 = vpop.f32.mrf.mxu0  ;;  %v2460_v43 = vpop.permute.xlu1 %2459 }
 0x227   : > { %v2076_v33 = vpop.f32.mrf.mxu1 }
 0x228   : > { %2553 = vst [vmem:[%s5155_s27 + $0xb8] sm:$0xff] %v2521_v6  ;;  %v2584_v16 = vadd.f32 %v2583_v63, %v2521_v6  ;;  %v2622_v7 = vmul.f32 %v2521_v6, %v2521_v6  ;;  %v2490_v54 = vmul.f32 %v5067_v37, %v2300_v19  ;;  %v2329_v29 = vpop.f32.mrf.mxu0 }
 0x229   : > { %v2079_v1 = vpop.f32.mrf.mxu1 }
 0x22a   : > { %v2653_v27 = vadd.f32 %v2652_v5, %v2622_v7  ;;  %v2522_v57 = vadd.f32 %v2490_v54, %v5112_v45  ;;  %v2305_v46 = vadd.f32 %v3242_v12, %v2079_v1 }
 0x22b   : > { %v2081_v34 = vpop.f32.mrf.mxu1 }
 0x22c   : > { %2554 = vst [vmem:[%s5155_s27 + $0xc0] sm:$0xff] %v2522_v57  ;;  %v2585_v4 = vadd.f32 %v2584_v16, %v2522_v57  ;;  %v2623_v28 = vmul.f32 %v2522_v57, %v2522_v57  ;;  %v2491_v58 = vmul.f32 %v5104_v56, %v2305_v46  ;;  %v2464_v57 = vpop.permute.xlu1 %2463 }
 0x22d   : > { %v2084_v59 = vpop.f32.mrf.mxu1 }
 0x22e   : > { %v2654_v51 = vadd.f32 %v2653_v27, %v2623_v28  ;;  %v2523_v60 = vadd.f32 %v2491_v58, %v5108_v22  ;;  %v2310_v11 = vadd.f32 %v2309_v35, %v2084_v59  ;;  %v5400_v22 = vld [vmem:[#allocation19_spill] sm:$0xff] }
 0x22f   : > { %v2086_v37 = vpop.f32.mrf.mxu1 }
 0x230   : > { %2555 = vst [vmem:[%s5155_s27 + $0xc8] sm:$0xff] %v2523_v60  ;;  %v2586_v2 = vadd.f32 %v2585_v4, %v2523_v60  ;;  %v2624_v3 = vmul.f32 %v2523_v60, %v2523_v60  ;;  %v2492_v45 = vmul.f32 %v5083_v49, %v2310_v11 }
 0x231   : > { %v2089_v13 = vpop.f32.mrf.mxu1 }
 0x232   : > { %v2655_v30 = vadd.f32 %v2654_v51, %v2624_v3  ;;  %v2524_v52 = vadd.f32 %v2492_v45, %v5399_v24  ;;  %v2315_v42 = vadd.f32 %v3245_v25, %v2089_v13 }
 0x233   : > { %v2091_v56 = vpop.f32.mrf.mxu1 }
 0x234   : > { %2556 = vst [vmem:[%s5155_s27 + $0xd0] sm:$0xff] %v2524_v52  ;;  %v2587_v38 = vadd.f32 %v2586_v2, %v2524_v52  ;;  %v2625_v61 = vmul.f32 %v2524_v52, %v2524_v52  ;;  %v2493_v18 = vmul.f32 %v5400_v22, %v2315_v42 }
 0x235   : > { %v2094_v15 = vpop.f32.mrf.mxu1 }
 0x236   : > { %v2656_v48 = vadd.f32 %v2655_v30, %v2625_v61  ;;  %v2525_v36 = vadd.f32 %v2493_v18, %v5401_v17  ;;  %v2320_v49 = vadd.f32 %v2319_v53, %v2094_v15 }
 0x237   : > { %v2096_v0 = vpop.f32.mrf.mxu1 }
 0x238   : > { %2557 = vst [vmem:[%s5155_s27 + $0xd8] sm:$0xff] %v2525_v36  ;;  %v2588_v12 = vadd.f32 %v2587_v38, %v2525_v36  ;;  %v2626_v39 = vmul.f32 %v2525_v36, %v2525_v36  ;;  %v2494_v44 = vmul.f32 %v5402_v55, %v2320_v49 }
 0x239   : > { %v2099_v50 = vpop.f32.mrf.mxu1 }
 0x23a   : > { %v2657_v10 = vadd.f32 %v2656_v48, %v2626_v39  ;;  %v2526_v9 = vadd.f32 %v2494_v44, %v5137_v8  ;;  %v2325_v62 = vadd.f32 %v3248_v32, %v2099_v50 }
 0x23b   : > { %v2101_v26 = vpop.f32.mrf.mxu1 }
 0x23c   : > { %2558 = vst [vmem:[%s5155_s27 + $0xe0] sm:$0xff] %v2526_v9  ;;  %v2589_v21 = vadd.f32 %v2588_v12, %v2526_v9  ;;  %v2627_v63 = vmul.f32 %v2526_v9, %v2526_v9  ;;  %v2495_v41 = vmul.f32 %v2456_v31, %v2325_v62 }
 0x23d   : > { %v2104_v23 = vpop.f32.mrf.mxu1 }
 0x23e   : > { %v2658_v5 = vadd.f32 %v2657_v10, %v2627_v63  ;;  %v2527_v6 = vadd.f32 %v2495_v41, %v5131_v40  ;;  %v2330_v19 = vadd.f32 %v2329_v29, %v2104_v23 }
 0x23f   : > { %v2106_v33 = vpop.f32.mrf.mxu1 }
 0x240   : > { %2559 = vst [vmem:[%s5155_s27 + $0xe8] sm:$0xff] %v2527_v6  ;;  %v2590_v25 = vadd.f32 %v2589_v21, %v2527_v6  ;;  %v2628_v16 = vmul.f32 %v2527_v6, %v2527_v6  ;;  %v2496_v8 = vmul.f32 %v2460_v43, %v2330_v19 }
 0x241   : > { %v2109_v7 = vpop.f32.mrf.mxu1 }
 0x242   : > { %v2659_v54 = vadd.f32 %v2658_v5, %v2628_v16  ;;  %v2528_v1 = vadd.f32 %v2496_v8, %v5145_v47  ;;  %v2335_v27 = vadd.f32 %v3251_v20, %v2109_v7 }
 0x243   : > { %v2111_v46 = vpop.f32.mrf.mxu1 }
 0x244   : > { %2560 = vst [vmem:[%s5155_s27 + $0xf0] sm:$0xff] %v2528_v1  ;;  %v2591_v34 = vadd.f32 %v2590_v25, %v2528_v1  ;;  %v2629_v35 = vmul.f32 %v2528_v1, %v2528_v1  ;;  %v2497_v40 = vmul.f32 %v2464_v57, %v2335_v27 }
 0x246   : > { %v2660_v4 = vadd.f32 %v2659_v54, %v2629_v35  ;;  %v2529_v28 = vadd.f32 %v2497_v40, %v5140_v14 }
 0x248   : > { %2561 = vst [vmem:[%s5155_s27 + $0xf8] sm:$0xff] %v2529_v28  ;;  %v2592_v58 = vadd.f32 %v2591_v34, %v2529_v28  ;;  %v2630_v59 = vmul.f32 %v2529_v28, %v2529_v28 }
 0x24a   : > { %v2593_v51 = vrot.slane %v2592_v58, 4  ;;  %v2661_v60 = vadd.f32 %v2660_v4, %v2630_v59 }
 0x24c   : > { %v2594_v11 = vadd.f32 %v2593_v51, %v2592_v58  ;;  %v2662_v37 = vrot.slane %v2661_v60, 4 }
 0x24e   : > { %v2595_v47 = vrot.slane %v2594_v11, 2  ;;  %v2663_v32 = vadd.f32 %v2662_v37, %v2661_v60 }
 0x250   : > { %v2596_v2 = vadd.f32 %v2595_v47, %v2594_v11  ;;  %v2664_v3 = vrot.slane %v2663_v32, 2 }
 0x252   : > { %v2597_v45 = vrot.slane %v2596_v2, 1  ;;  %v2665_v13 = vadd.f32 %v2664_v3, %v2663_v32 }
 0x254   : > { %v2666_v30 = vrot.slane %v2665_v13, 1  ;;  %v2598_v14 = vadd.f32 %v2597_v45, %v2596_v2 }
 0x256   : > { %v2667_v24 = vadd.f32 %v2666_v30, %v2665_v13 }
 0x258   : > { %v2669_v52 = vsel %vm2668_vm0, %v2598_v14, %v2667_v24 }
 0x259   : > { %2670 = vst [vmem:[%s265_s30] sm:$0x3] %v2669_v52 }
 0x25a PF: > { %s17_s21 = sadd.s32 1, %s3308_s21  }
 0x25b   : > { %p14_p5 = scmp.ge.s32.totalorder %s17_s21, 4  }
 0x25d   :  { %16 = sbr.rel (!%p14_p5) target bundleno = 1 (0x1), region = 84 }

</bundles_post_ra>
